<compile_context>
chip_gen: v7x
topology: tpu7x:2x2x1
jax: 0.10.0
libtpu: 0.0.40
codegen_flags: <defaults>
</compile_context>

<pallas_src>
import functools

import jax
import jax.numpy as jnp
from jax import lax
from jax.experimental import pallas as pl
from jax.experimental.pallas import tpu as pltpu

SSIM_W = 0.85
DISP_SMOOTH_W = 0.1
WEIGHTS = [4.0, 2.0, 1.0, 1.0, 1.0]

# Raised scoped-VMEM cap (defaults: ~16 MiB on v5e, ~32 MiB on v6e/v7x).
# 48 MiB keeps full-image double-buffered blocks resident on every generation
# while staying under v7x's 64 MiB physical VMEM.
VMEM_LIMIT_BYTES = 48 * 1024 * 1024

# Fold the whole batch into a single program when an image plane is small
# (low pyramid scales): amortizes the ~0.35 us per-grid-step overhead.
_FOLD_BATCH_MAX_PIXELS = 128 * 128


# ---------------------------------------------------------------------------
# In-kernel helpers
# ---------------------------------------------------------------------------
def _nbr_prev(a, axis):
    """out[..., i, ...] = a[..., i-1, ...] with wrap (edges masked by callers)."""
    return pltpu.roll(a, 1, axis)


def _nbr_next(a, axis):
    """out[..., i, ...] = a[..., i+1, ...] with wrap (edges masked by callers)."""
    return pltpu.roll(a, a.shape[axis] - 1, axis)


def _box3_mean(a):
    """Separable 3x3 box mean over the last two axes of a rank-3 slab.

    4 XLU rotations + 4 VALU adds + one constant multiply.  Border positions
    include wrapped neighbours and are always masked out by the caller
    (matching AvgPool2d(3,1) followed by a zero pad in the reference).
    """
    rows = a + _nbr_prev(a, 1) + _nbr_next(a, 1)
    box = rows + _nbr_prev(rows, 2) + _nbr_next(rows, 2)
    return box * (1.0 / 9.0)


# ---------------------------------------------------------------------------
# Pallas kernels
# ---------------------------------------------------------------------------
def _recon_err_kernel(x_ref, y_ref, occ_ref, num_ref, den_ref, *, ssim_w):
    """Fused _reconstruction_error + occlusion-masked reduction.

    diff = mean_c( L1(x,y)*(1-w) + SSIM_img(x,y)*w )  per pixel (SSIM is zero
    on the 1-pixel border, matching AvgPool2d(3,1) + zero pad).  Emits
    num = sum(diff * occ) and den = sum(occ) for this program's batch slice.
    """
    bb, C, H, W = x_ref.shape
    x4 = x_ref[...].astype(jnp.float32)
    y4 = y_ref[...].astype(jnp.float32)
    occ = occ_ref[...].astype(jnp.float32).reshape(bb, H, W)
    x = x4.reshape(bb * C, H, W)
    y = y4.reshape(bb * C, H, W)

    c1 = 0.01 ** 2
    c2 = 0.03 ** 2

    # Pool all five 3x3-mean quantities with one separable pass over a stacked slab.
    n = bb * C
    pooled = _box3_mean(jnp.concatenate([x, y, x * x, y * y, x * y], axis=0))
    mu_x = pooled[0 * n:1 * n]
    mu_y = pooled[1 * n:2 * n]
    p_xx = pooled[2 * n:3 * n]
    p_yy = pooled[3 * n:4 * n]
    p_xy = pooled[4 * n:5 * n]

    mu_xy = mu_x * mu_y
    mu_x2 = mu_x * mu_x
    mu_y2 = mu_y * mu_y
    sigma_x = p_xx - mu_x2
    sigma_y = p_yy - mu_y2
    sigma_xy = p_xy - mu_xy

    ssim_n = (2.0 * mu_xy + c1) * (2.0 * sigma_xy + c2)
    ssim_d = (mu_x2 + mu_y2 + c1) * (sigma_x + sigma_y + c2)
    ssim = jnp.clip((1.0 - ssim_n / ssim_d) * 0.5, 0.0, 1.0)     # (bb*C, H, W)

    # Channel mean first, then the channel-independent interior mask at (H, W)
    # (mathematically identical, 1/C of the select work).
    ssim_mean = jnp.mean(ssim.reshape(bb, C, H, W), axis=1)      # (bb, H, W)
    row = lax.broadcasted_iota(jnp.int32, (H, W), 0)
    col = lax.broadcasted_iota(jnp.int32, (H, W), 1)
    interior = (row >= 1) & (row <= H - 2) & (col >= 1) & (col <= W - 2)
    ssim_mean = jnp.where(interior[None], ssim_mean, 0.0)

    l1 = jnp.sum(jnp.abs(y4 - x4), axis=1)                       # (bb, H, W)
    diff = l1 * (1.0 - ssim_w) + ssim_mean * ssim_w

    num_ref[...] = jnp.sum(diff * occ).reshape(1, 1, 1)
    den_ref[...] = jnp.sum(occ).reshape(1, 1, 1)


def _smooth2nd_kernel(sf_ref, img_ref, o_ref, *, beta):
    """Fused _smoothness_motion_2nd(sf, img, beta) + full sum reduction."""
    bb, Cs, H, W = sf_ref.shape
    C = img_ref.shape[1]
    sf = sf_ref[...].astype(jnp.float32).reshape(bb * Cs, H, W)
    img = img_ref[...].astype(jnp.float32).reshape(bb * C, H, W)

    row = lax.broadcasted_iota(jnp.int32, (H, W), 0)
    col = lax.broadcasted_iota(jnp.int32, (H, W), 1)
    first_row = (row == 0)[None]
    last_row = (row == H - 1)[None]
    first_col = (col == 0)[None]
    last_col = (col == W - 1)[None]

    # First-order image gradients (replicate pad => zero at the far edge).
    gx_img = jnp.where(last_col, 0.0, img - _nbr_next(img, 2))
    gy_img = jnp.where(last_row, 0.0, img - _nbr_next(img, 1))
    wx = jnp.exp(-jnp.mean(jnp.abs(gx_img).reshape(bb, C, H, W), axis=1) * beta)
    wy = jnp.exp(-jnp.mean(jnp.abs(gy_img).reshape(bb, C, H, W), axis=1) * beta)

    # Second-order gradients with replicate padding.
    sf_xm = jnp.where(first_col, sf, _nbr_prev(sf, 2))   # sf[..., max(w-1, 0)]
    sf_xp = jnp.where(last_col, sf, _nbr_next(sf, 2))    # sf[..., min(w+1, W-1)]
    gxx = (sf_xm + sf_xp - 2.0 * sf).reshape(bb, Cs, H, W)
    sf_ym = jnp.where(first_row, sf, _nbr_prev(sf, 1))
    sf_yp = jnp.where(last_row, sf, _nbr_next(sf, 1))
    gyy = (sf_ym + sf_yp - 2.0 * sf).reshape(bb, Cs, H, W)

    sm = jnp.abs(gxx * wx[:, None]) + jnp.abs(gyy * wy[:, None])
    o_ref[...] = jnp.sum(sm).reshape(1, 1, 1)


# ---------------------------------------------------------------------------
# Pallas wrappers
# ---------------------------------------------------------------------------
def _block_batch(batch, h, w):
    return batch if (h * w <= _FOLD_BATCH_MAX_PIXELS) else 1


def reconstruction_error_masked_sums(x, y, occ, ssim_w=SSIM_W):
    """Returns (sum(diff[occ]), sum(occ)) over the whole batch, where
    diff = _reconstruction_error(x, y, ssim_w) from the reference module."""
    B, C, H, W = x.shape
    bb = _block_batch(B, H, W)
    G = B // bb
    occ_f = occ.astype(x.dtype)
    kern = functools.partial(_recon_err_kernel, ssim_w=ssim_w)
    # TODO(synk): for full-resolution images on v7x (64 MiB VMEM), add an
    # H-tile grid axis with a 1-row halo instead of whole-image blocks.
    num, den = pl.pallas_call(
        kern,
        out_shape=(jax.ShapeDtypeStruct((G, 1, 1), jnp.float32),
                   jax.ShapeDtypeStruct((G, 1, 1), jnp.float32)),
        grid=(G,),
        in_specs=[pl.BlockSpec((bb, C, H, W), lambda g: (g, 0, 0, 0)),
                  pl.BlockSpec((bb, C, H, W), lambda g: (g, 0, 0, 0)),
                  pl.BlockSpec((bb, 1, H, W), lambda g: (g, 0, 0, 0))],
        out_specs=(pl.BlockSpec((1, 1, 1), lambda g: (g, 0, 0)),
                   pl.BlockSpec((1, 1, 1), lambda g: (g, 0, 0))),
        compiler_params=pltpu.CompilerParams(
            dimension_semantics=("parallel",),
            vmem_limit_bytes=VMEM_LIMIT_BYTES),
    )(x, y, occ_f)
    return jnp.sum(num), jnp.sum(den)


def smoothness_motion_2nd_mean(sf, img, beta=1.0):
    """mean(_smoothness_motion_2nd(sf, img, beta)) as a fused Pallas reduction."""
    B, Cs, H, W = sf.shape
    C = img.shape[1]
    bb = _block_batch(B, H, W)
    G = B // bb
    kern = functools.partial(_smooth2nd_kernel, beta=beta)
    part = pl.pallas_call(
        kern,
        out_shape=jax.ShapeDtypeStruct((G, 1, 1), jnp.float32),
        grid=(G,),
        in_specs=[pl.BlockSpec((bb, Cs, H, W), lambda g: (g, 0, 0, 0)),
                  pl.BlockSpec((bb, C, H, W), lambda g: (g, 0, 0, 0))],
        out_specs=pl.BlockSpec((1, 1, 1), lambda g: (g, 0, 0)),
        compiler_params=pltpu.CompilerParams(
            dimension_semantics=("parallel",),
            vmem_limit_bytes=VMEM_LIMIT_BYTES),
    )(sf, img)
    return jnp.sum(part) / (B * Cs * H * W)


# ---------------------------------------------------------------------------
# JAX glue (gather / scatter warping — not a clean Pallas TPU fit)
# ---------------------------------------------------------------------------
# TODO(synk): the bilinear grid_sample gather and the forward-warp splat could
# be mapped onto the (idle) MXU as banded one-hot matmuls; kept as vectorized
# XLA ops here to preserve exact grid_sample/forward_warp semantics.
def grid_sample_bilinear_zeros(img, grid):
    """torch.nn.functional.grid_sample(mode='bilinear', padding_mode='zeros',
    align_corners=False).  grid: (B, H, W, 2) normalized (x, y) in [-1, 1]."""
    B, C, H, W = img.shape
    x = (grid[..., 0] + 1.0) * W / 2.0 - 0.5
    y = (grid[..., 1] + 1.0) * H / 2.0 - 0.5
    x0 = jnp.floor(x)
    y0 = jnp.floor(y)
    flat = img.reshape(B, C, H * W)
    out = jnp.zeros((B, C, H, W), img.dtype)
    for dx in (0, 1):
        for dy in (0, 1):
            xi = x0 + dx
            yi = y0 + dy
            w = (1.0 - jnp.abs(x - xi)) * (1.0 - jnp.abs(y - yi))
            valid = (xi >= 0) & (xi <= W - 1) & (yi >= 0) & (yi <= H - 1)
            xi_c = jnp.clip(xi, 0, W - 1).astype(jnp.int32)
            yi_c = jnp.clip(yi, 0, H - 1).astype(jnp.int32)
            idx = (yi_c * W + xi_c).reshape(B, 1, H * W)
            g = jnp.take_along_axis(flat, jnp.broadcast_to(idx, (B, C, H * W)), axis=2)
            out = out + g.reshape(B, C, H, W) * jnp.where(valid, w, 0.0)[:, None]
    return out


def apply_disparity(img, disp):
    B, C, H, W = img.shape
    x_base = jnp.broadcast_to(jnp.linspace(0.0, 1.0, W)[None, None, :], (B, H, W))
    y_base = jnp.broadcast_to(jnp.linspace(0.0, 1.0, H)[None, :, None], (B, H, W))
    x_shifts = disp[:, 0, :, :]
    flow_field = jnp.stack([x_base + x_shifts, y_base], axis=3)
    return grid_sample_bilinear_zeros(img, 2.0 * flow_field - 1.0)


def generate_image_left(img, disp):
    return apply_disparity(img, -disp)


def forward_warp_splat(mask, flow):
    """Bilinear forward-warp (splatting) of `mask` by pixel-space `flow` (B,H,W,2)."""
    B, _, H, W = mask.shape
    xs = jnp.arange(W, dtype=flow.dtype)
    ys = jnp.arange(H, dtype=flow.dtype)
    X = jnp.broadcast_to(xs[None, None, :], (B, H, W))
    Y = jnp.broadcast_to(ys[None, :, None], (B, H, W))
    xt = X + flow[..., 0]
    yt = Y + flow[..., 1]
    x0 = jnp.floor(xt)
    y0 = jnp.floor(yt)
    vals = mask[:, 0]
    out = jnp.zeros((B, H * W), dtype=mask.dtype)

    def scatter(o, i, c):
        return o.at[i.reshape(-1)].add(c.reshape(-1))

    for dx in (0, 1):
        for dy in (0, 1):
            xi = x0 + dx
            yi = y0 + dy
            w = (1.0 - jnp.abs(xt - xi)) * (1.0 - jnp.abs(yt - yi))
            valid = (xi >= 0) & (xi <= W - 1) & (yi >= 0) & (yi <= H - 1)
            xi_c = jnp.clip(xi, 0, W - 1).astype(jnp.int32)
            yi_c = jnp.clip(yi, 0, H - 1).astype(jnp.int32)
            idx = yi_c * W + xi_c
            contrib = jnp.where(valid, w * vals, 0.0)
            out = jax.vmap(scatter)(out, idx, contrib)
    return out.reshape(B, 1, H, W)


def adaptive_disocc_detection_disp(disp):
    B, _, H, W = disp.shape
    mask = jnp.ones((B, 1, H, W), disp.dtype)
    flow = jnp.concatenate([disp * W, jnp.zeros_like(disp)], axis=1)  # (B,2,H,W)
    flow = jnp.transpose(flow, (0, 2, 3, 1))
    disocc = jnp.clip(forward_warp_splat(mask, flow), 0.0, 1.0)
    disocc_map = disocc > 0.5
    fallback = jnp.sum(disocc_map.astype(jnp.float32)) < (B * H * W / 2.0)
    return jnp.where(fallback, jnp.ones_like(disocc_map), disocc_map)


def interpolate2d_as(x, target):
    B, C, H, W = x.shape
    th, tw = target.shape[2], target.shape[3]
    if (H, W) == (th, tw):
        return x
    return jax.image.resize(x, (B, C, th, tw), method="bilinear")


# ---------------------------------------------------------------------------
# Loss (implementable subset of the module's forward)
# ---------------------------------------------------------------------------
def depth_loss_left_img(disp_l, disp_r, img_l_aug, img_r_aug, ii):
    img_r_warp = generate_image_left(img_r_aug, disp_l)
    left_occ = adaptive_disocc_detection_disp(disp_r)           # .detach() is a no-op here
    num, den = reconstruction_error_masked_sums(img_l_aug, img_r_warp, left_occ, SSIM_W)
    loss_img = num / jnp.maximum(den, 1.0)                      # == img_diff[left_occ].mean()
    loss_smooth = smoothness_motion_2nd_mean(disp_l, img_l_aug, beta=10.0) / (2.0 ** ii)
    return loss_img + DISP_SMOOTH_W * loss_smooth, left_occ


def loss_forward(output_dict, target_dict):
    num_scales = len(output_dict['disp_l1'])
    loss_dp_sum = jnp.float32(0.0)
    for ii in range(num_scales):
        sf_f = output_dict['flow_f'][ii]
        img_l1 = interpolate2d_as(target_dict['input_l1_aug'], sf_f)
        img_l2 = interpolate2d_as(target_dict['input_l2_aug'], sf_f)
        img_r1 = interpolate2d_as(target_dict['input_r1_aug'], sf_f)
        img_r2 = interpolate2d_as(target_dict['input_r2_aug'], sf_f)
        disp_l1 = output_dict['disp_l1'][ii]
        disp_l2 = output_dict['disp_l2'][ii]
        disp_r1 = output_dict['output_dict_r']['disp_l1'][ii]
        disp_r2 = output_dict['output_dict_r']['disp_l2'][ii]

        loss_disp_l1, _ = depth_loss_left_img(disp_l1, disp_r1, img_l1, img_r1, ii)
        loss_disp_l2, _ = depth_loss_left_img(disp_l2, disp_r2, img_l2, img_r2, ii)
        loss_dp_sum = loss_dp_sum + (loss_disp_l1 + loss_disp_l2) * WEIGHTS[ii]
        # TODO(synk): sceneflow_loss(...) and consistency_loss(...) require external
        # geometry utilities (pixel2pts_ms, pts2pixel_ms, reconstructPts/Img,
        # projectSceneFlow2Flow, pose2flow, disp2depth_kitti, flow_warp, forward_warp)
        # not defined in the reference module — omitted rather than faked.
    # TODO(synk): the original total_loss cross-weights the sceneflow and consistency
    # sums; with only the depth branch available, total == dp loss.
    return {'dp': loss_dp_sum, 'total_loss': loss_dp_sum}


# ---------------------------------------------------------------------------
if __name__ == "__main__":
    key = jax.random.PRNGKey(0)
    B, C, H, W = 2, 3, 16, 256   # lane-aligned spatial dims (W multiple of 128)
    ks = jax.random.split(key, 10)

    def img(k, h, w):
        return jax.random.uniform(k, (B, C, h, w), dtype=jnp.float32)

    def disp(k, h, w):
        return jax.random.uniform(k, (B, 1, h, w), dtype=jnp.float32) * 0.1

    def sflow(k, h, w):
        return jax.random.normal(k, (B, 3, h, w), dtype=jnp.float32) * 0.05

    target_dict = {
        'input_l1_aug': img(ks[0], H, W),
        'input_l2_aug': img(ks[1], H, W),
        'input_r1_aug': img(ks[2], H, W),
        'input_r2_aug': img(ks[3], H, W),
        'aug_size': jnp.tile(jnp.array([[float(H), float(W)]], jnp.float32), (B, 1)),
    }

    scales = [(H, W), (H // 2, W // 2)]  # 2 pyramid levels
    output_dict = {
        'flow_f': [sflow(jax.random.fold_in(ks[4], i), h, w) for i, (h, w) in enumerate(scales)],
        'flow_b': [sflow(jax.random.fold_in(ks[5], i), h, w) for i, (h, w) in enumerate(scales)],
        'disp_l1': [disp(jax.random.fold_in(ks[6], i), h, w) for i, (h, w) in enumerate(scales)],
        'disp_l2': [disp(jax.random.fold_in(ks[7], i), h, w) for i, (h, w) in enumerate(scales)],
        'output_dict_r': {
            'disp_l1': [disp(jax.random.fold_in(ks[8], i), h, w) for i, (h, w) in enumerate(scales)],
            'disp_l2': [disp(jax.random.fold_in(ks[9], i), h, w) for i, (h, w) in enumerate(scales)],
        },
    }

    loss_dict = loss_forward(output_dict, target_dict)
    total = jax.block_until_ready(loss_dict['total_loss'])
    assert bool(jnp.isfinite(total)), "loss is not finite"
    print("KERNEL_OK")
</pallas_src>

<mosaic_0001>
module attributes {stable_mosaic.version = 11 : i64} {
  func.func @_recon_err_kernel(%arg0: i32, %arg1: memref<2x3x16x256xf32, #tpu.memory_space<vmem>>, %arg2: memref<2x3x16x256xf32, #tpu.memory_space<vmem>>, %arg3: memref<2x1x16x256xf32, #tpu.memory_space<vmem>>, %arg4: memref<1x1x1xf32, #tpu.memory_space<vmem>>, %arg5: memref<1x1x1xf32, #tpu.memory_space<vmem>>) attributes {dimension_semantics = [#tpu.dimension_semantics<parallel>], iteration_bounds = array<i64: 1>, scalar_prefetch = 0 : i64, scratch_operands = 0 : i64, tpu.core_type = #tpu.core_type<tc>, window_params = [{transform_indices = @transform_0, window_bounds = array<i64: 2, 3, 16, 256>}, {transform_indices = @transform_1, window_bounds = array<i64: 2, 3, 16, 256>}, {transform_indices = @transform_2, window_bounds = array<i64: 2, 1, 16, 256>}, {transform_indices = @transform_3, window_bounds = array<i64: 1, 1, 1>}, {transform_indices = @transform_4, window_bounds = array<i64: 1, 1, 1>}]} {
    %c0 = arith.constant 0 : index
    %c0_0 = arith.constant 0 : index
    %c0_1 = arith.constant 0 : index
    %c0_2 = arith.constant 0 : index
    %0 = vector.load %arg1[%c0, %c0_0, %c0_1, %c0_2] : memref<2x3x16x256xf32, #tpu.memory_space<vmem>>, vector<2x3x16x256xf32>
    %c0_3 = arith.constant 0 : index
    %c0_4 = arith.constant 0 : index
    %c0_5 = arith.constant 0 : index
    %c0_6 = arith.constant 0 : index
    %1 = vector.load %arg2[%c0_3, %c0_4, %c0_5, %c0_6] : memref<2x3x16x256xf32, #tpu.memory_space<vmem>>, vector<2x3x16x256xf32>
    %c0_7 = arith.constant 0 : index
    %c0_8 = arith.constant 0 : index
    %c0_9 = arith.constant 0 : index
    %c0_10 = arith.constant 0 : index
    %2 = vector.load %arg3[%c0_7, %c0_8, %c0_9, %c0_10] : memref<2x1x16x256xf32, #tpu.memory_space<vmem>>, vector<2x1x16x256xf32>
    %3 = vector.shape_cast %2 : vector<2x1x16x256xf32> to vector<2x16x256xf32>
    %4 = vector.shape_cast %0 : vector<2x3x16x256xf32> to vector<6x16x256xf32>
    %5 = vector.shape_cast %1 : vector<2x3x16x256xf32> to vector<6x16x256xf32>
    %6 = arith.mulf %4, %4 : vector<6x16x256xf32>
    %7 = arith.mulf %5, %5 : vector<6x16x256xf32>
    %8 = arith.mulf %4, %5 : vector<6x16x256xf32>
    %9 = tpu.concatenate %4, %5, %6, %7, %8 in 0 : vector<6x16x256xf32>, vector<6x16x256xf32>, vector<6x16x256xf32>, vector<6x16x256xf32>, vector<6x16x256xf32> -> vector<30x16x256xf32>
    %c1_i32 = arith.constant 1 : i32
    %10 = tpu.dynamic_rotate %9 by %c1_i32 dim 1 : vector<30x16x256xf32>, i32 -> vector<30x16x256xf32>
    %11 = arith.addf %9, %10 : vector<30x16x256xf32>
    %c15_i32 = arith.constant 15 : i32
    %12 = tpu.dynamic_rotate %9 by %c15_i32 dim 1 : vector<30x16x256xf32>, i32 -> vector<30x16x256xf32>
    %13 = arith.addf %11, %12 : vector<30x16x256xf32>
    %c1_i32_11 = arith.constant 1 : i32
    %14 = tpu.dynamic_rotate %13 by %c1_i32_11 dim 2 : vector<30x16x256xf32>, i32 -> vector<30x16x256xf32>
    %15 = arith.addf %13, %14 : vector<30x16x256xf32>
    %c255_i32 = arith.constant 255 : i32
    %16 = tpu.dynamic_rotate %13 by %c255_i32 dim 2 : vector<30x16x256xf32>, i32 -> vector<30x16x256xf32>
    %17 = arith.addf %15, %16 : vector<30x16x256xf32>
    %cst = arith.constant 0.111111112 : f32
    %18 = vector.broadcast %cst : f32 to vector<30x16x256xf32>
    %19 = arith.mulf %17, %18 : vector<30x16x256xf32>
    %20 = vector.extract_strided_slice %19 {offsets = [0, 0, 0], sizes = [6, 16, 256], strides = [1, 1, 1]} : vector<30x16x256xf32> to vector<6x16x256xf32>
    %21 = vector.extract_strided_slice %19 {offsets = [6, 0, 0], sizes = [6, 16, 256], strides = [1, 1, 1]} : vector<30x16x256xf32> to vector<6x16x256xf32>
    %22 = vector.extract_strided_slice %19 {offsets = [12, 0, 0], sizes = [6, 16, 256], strides = [1, 1, 1]} : vector<30x16x256xf32> to vector<6x16x256xf32>
    %23 = vector.extract_strided_slice %19 {offsets = [18, 0, 0], sizes = [6, 16, 256], strides = [1, 1, 1]} : vector<30x16x256xf32> to vector<6x16x256xf32>
    %24 = vector.extract_strided_slice %19 {offsets = [24, 0, 0], sizes = [6, 16, 256], strides = [1, 1, 1]} : vector<30x16x256xf32> to vector<6x16x256xf32>
    %25 = arith.mulf %20, %21 : vector<6x16x256xf32>
    %26 = arith.mulf %20, %20 : vector<6x16x256xf32>
    %27 = arith.mulf %21, %21 : vector<6x16x256xf32>
    %28 = arith.subf %22, %26 : vector<6x16x256xf32>
    %29 = arith.subf %23, %27 : vector<6x16x256xf32>
    %30 = arith.subf %24, %25 : vector<6x16x256xf32>
    %cst_12 = arith.constant 2.000000e+00 : f32
    %31 = vector.broadcast %cst_12 : f32 to vector<6x16x256xf32>
    %32 = arith.mulf %31, %25 : vector<6x16x256xf32>
    %cst_13 = arith.constant 9.99999974E-5 : f32
    %33 = vector.broadcast %cst_13 : f32 to vector<6x16x256xf32>
    %34 = arith.addf %32, %33 : vector<6x16x256xf32>
    %cst_14 = arith.constant 2.000000e+00 : f32
    %35 = vector.broadcast %cst_14 : f32 to vector<6x16x256xf32>
    %36 = arith.mulf %35, %30 : vector<6x16x256xf32>
    %cst_15 = arith.constant 8.99999984E-4 : f32
    %37 = vector.broadcast %cst_15 : f32 to vector<6x16x256xf32>
    %38 = arith.addf %36, %37 : vector<6x16x256xf32>
    %39 = arith.mulf %34, %38 : vector<6x16x256xf32>
    %40 = arith.addf %26, %27 : vector<6x16x256xf32>
    %cst_16 = arith.constant 9.99999974E-5 : f32
    %41 = vector.broadcast %cst_16 : f32 to vector<6x16x256xf32>
    %42 = arith.addf %40, %41 : vector<6x16x256xf32>
    %43 = arith.addf %28, %29 : vector<6x16x256xf32>
    %cst_17 = arith.constant 8.99999984E-4 : f32
    %44 = vector.broadcast %cst_17 : f32 to vector<6x16x256xf32>
    %45 = arith.addf %43, %44 : vector<6x16x256xf32>
    %46 = arith.mulf %42, %45 : vector<6x16x256xf32>
    %47 = arith.divf %39, %46 : vector<6x16x256xf32>
    %cst_18 = arith.constant 1.000000e+00 : f32
    %48 = vector.broadcast %cst_18 : f32 to vector<6x16x256xf32>
    %49 = arith.subf %48, %47 : vector<6x16x256xf32>
    %cst_19 = arith.constant 5.000000e-01 : f32
    %50 = vector.broadcast %cst_19 : f32 to vector<6x16x256xf32>
    %51 = arith.mulf %49, %50 : vector<6x16x256xf32>
    %cst_20 = arith.constant 0.000000e+00 : f32
    %cst_21 = arith.constant 1.000000e+00 : f32
    %52 = vector.broadcast %cst_20 : f32 to vector<6x16x256xf32>
    %53 = arith.maximumf %52, %51 : vector<6x16x256xf32>
    %54 = vector.broadcast %cst_21 : f32 to vector<6x16x256xf32>
    %55 = arith.minimumf %54, %53 : vector<6x16x256xf32>
    %56 = vector.shape_cast %55 : vector<6x16x256xf32> to vector<2x3x16x256xf32>
    %cst_22 = arith.constant dense<0.000000e+00> : vector<2x16x256xf32>
    %57 = vector.multi_reduction <add>, %56, %cst_22 [1] : vector<2x3x16x256xf32> to vector<2x16x256xf32>
    %cst_23 = arith.constant 3.000000e+00 : f32
    %58 = vector.broadcast %cst_23 : f32 to vector<2x16x256xf32>
    %59 = arith.divf %57, %58 : vector<2x16x256xf32>
    %60 = tpu.iota {dimensions = array<i32: 0>} : vector<16x256xi32>
    %61 = tpu.iota {dimensions = array<i32: 1>} : vector<16x256xi32>
    %c1_i32_24 = arith.constant 1 : i32
    %62 = vector.broadcast %c1_i32_24 : i32 to vector<16x256xi32>
    %63 = arith.cmpi sge, %60, %62 : vector<16x256xi32>
    %c14_i32 = arith.constant 14 : i32
    %64 = vector.broadcast %c14_i32 : i32 to vector<16x256xi32>
    %65 = arith.cmpi sle, %60, %64 : vector<16x256xi32>
    %66 = arith.andi %63, %65 : vector<16x256xi1>
    %c1_i32_25 = arith.constant 1 : i32
    %67 = vector.broadcast %c1_i32_25 : i32 to vector<16x256xi32>
    %68 = arith.cmpi sge, %61, %67 : vector<16x256xi32>
    %69 = arith.andi %66, %68 : vector<16x256xi1>
    %c254_i32 = arith.constant 254 : i32
    %70 = vector.broadcast %c254_i32 : i32 to vector<16x256xi32>
    %71 = arith.cmpi sle, %61, %70 : vector<16x256xi32>
    %72 = arith.andi %69, %71 : vector<16x256xi1>
    %73 = vector.shape_cast %72 : vector<16x256xi1> to vector<1x16x256xi1>
    %cst_26 = arith.constant 0.000000e+00 : f32
    %74 = vector.shape_cast %73 : vector<1x16x256xi1> to vector<1x16x256xi1>
    %75 = vector.broadcast %74 : vector<1x16x256xi1> to vector<2x16x256xi1>
    %76 = vector.broadcast %cst_26 : f32 to vector<2x16x256xf32>
    %77 = arith.select %75, %59, %76 : vector<2x16x256xi1>, vector<2x16x256xf32>
    %78 = arith.subf %1, %0 : vector<2x3x16x256xf32>
    %79 = math.absf %78 : vector<2x3x16x256xf32>
    %cst_27 = arith.constant dense<0.000000e+00> : vector<2x16x256xf32>
    %80 = vector.multi_reduction <add>, %79, %cst_27 [1] : vector<2x3x16x256xf32> to vector<2x16x256xf32>
    %cst_28 = arith.constant 1.500000e-01 : f32
    %81 = vector.broadcast %cst_28 : f32 to vector<2x16x256xf32>
    %82 = arith.mulf %80, %81 : vector<2x16x256xf32>
    %cst_29 = arith.constant 8.500000e-01 : f32
    %83 = vector.broadcast %cst_29 : f32 to vector<2x16x256xf32>
    %84 = arith.mulf %77, %83 : vector<2x16x256xf32>
    %85 = arith.addf %82, %84 : vector<2x16x256xf32>
    %86 = arith.mulf %85, %3 : vector<2x16x256xf32>
    %87 = vector.shape_cast %86 : vector<2x16x256xf32> to vector<1x2x16x256xf32>
    %cst_30 = arith.constant dense<0.000000e+00> : vector<1xf32>
    %88 = vector.multi_reduction <add>, %87, %cst_30 [1, 2, 3] : vector<1x2x16x256xf32> to vector<1xf32>
    %89 = vector.shape_cast %88 : vector<1xf32> to vector<1x1x1x1xf32>
    %90 = vector.extract %89[0, 0, 0, 0] : f32 from vector<1x1x1x1xf32>
    %91 = vector.broadcast %90 : f32 to vector<1x1x1xf32>
    %c0_31 = arith.constant 0 : index
    %c0_32 = arith.constant 0 : index
    %c0_33 = arith.constant 0 : index
    %92 = vector.load %arg4[%c0_31, %c0_32, %c0_33] : memref<1x1x1xf32, #tpu.memory_space<vmem>>, vector<1x1x1xf32>
    tpu.vector_store %arg4[%c0_31, %c0_32, %c0_33], %91 {strides = array<i32>} : memref<1x1x1xf32, #tpu.memory_space<vmem>>, vector<1x1x1xf32>,
    %93 = vector.shape_cast %3 : vector<2x16x256xf32> to vector<1x2x16x256xf32>
    %cst_34 = arith.constant dense<0.000000e+00> : vector<1xf32>
    %94 = vector.multi_reduction <add>, %93, %cst_34 [1, 2, 3] : vector<1x2x16x256xf32> to vector<1xf32>
    %95 = vector.shape_cast %94 : vector<1xf32> to vector<1x1x1x1xf32>
    %96 = vector.extract %95[0, 0, 0, 0] : f32 from vector<1x1x1x1xf32>
    %97 = vector.broadcast %96 : f32 to vector<1x1x1xf32>
    %c0_35 = arith.constant 0 : index
    %c0_36 = arith.constant 0 : index
    %c0_37 = arith.constant 0 : index
    %98 = vector.load %arg5[%c0_35, %c0_36, %c0_37] : memref<1x1x1xf32, #tpu.memory_space<vmem>>, vector<1x1x1xf32>
    tpu.vector_store %arg5[%c0_35, %c0_36, %c0_37], %97 {strides = array<i32>} : memref<1x1x1xf32, #tpu.memory_space<vmem>>, vector<1x1x1xf32>,
    return
  }
  func.func @transform_0(%arg0: i32) -> (i32, i32, i32, i32) {
    %c0_i32 = arith.constant 0 : i32
    %c0_i32_0 = arith.constant 0 : i32
    %c0_i32_1 = arith.constant 0 : i32
    %c0_i32_2 = arith.constant 0 : i32
    return %arg0, %c0_i32, %c0_i32_0, %c0_i32_1 : i32, i32, i32, i32
  }
  func.func @transform_1(%arg0: i32) -> (i32, i32, i32, i32) {
    %c0_i32 = arith.constant 0 : i32
    %c0_i32_0 = arith.constant 0 : i32
    %c0_i32_1 = arith.constant 0 : i32
    %c0_i32_2 = arith.constant 0 : i32
    return %arg0, %c0_i32, %c0_i32_0, %c0_i32_1 : i32, i32, i32, i32
  }
  func.func @transform_2(%arg0: i32) -> (i32, i32, i32, i32) {
    %c0_i32 = arith.constant 0 : i32
    %c0_i32_0 = arith.constant 0 : i32
    %c0_i32_1 = arith.constant 0 : i32
    %c0_i32_2 = arith.constant 0 : i32
    return %arg0, %c0_i32, %c0_i32_0, %c0_i32_1 : i32, i32, i32, i32
  }
  func.func @transform_3(%arg0: i32) -> (i32, i32, i32) {
    %c0_i32 = arith.constant 0 : i32
    %c0_i32_0 = arith.constant 0 : i32
    %c0_i32_1 = arith.constant 0 : i32
    return %arg0, %c0_i32, %c0_i32_0 : i32, i32, i32
  }
  func.func @transform_4(%arg0: i32) -> (i32, i32, i32) {
    %c0_i32 = arith.constant 0 : i32
    %c0_i32_0 = arith.constant 0 : i32
    %c0_i32_1 = arith.constant 0 : i32
    return %arg0, %c0_i32, %c0_i32_0 : i32, i32, i32
  }
}

</mosaic_0001>

<bundles_post_ra>
// kernel: tpu_custom_call.1
= control target key start
LH: loop header
LB: loop body
LE: loop exit
PB: predicated region body
PF: predicated region fallthrough
CT: control target
= control target key end

     0   :  { %10 = vsyncpa [#allocation3], 0  ;;  %s7380_s0 = inlined_call_operand.hbm [shape: f32[2,3,16,256], index: 0, kind: input, shape index: {}]   ;;  %s7381_s1 = inlined_call_operand.hbm [shape: f32[2,3,16,256], index: 1, kind: input, shape index: {}]   ;;  %s7382_s2 = inlined_call_operand.hbm [shape: f32[2,1,16,256], index: 2, kind: input, shape index: {}]   ;;  %s7383_s3 = inlined_call_operand.hbm [shape: f32[1,1,1], index: 3, kind: output, shape index: {0}]   ;;  %s7384_s4 = inlined_call_operand.hbm [shape: f32[1,1,1], index: 4, kind: output, shape index: {1}]  }
   0x1   :  { %11 = vsyncpa [#allocation6], 0 }
   0x2   :  { %12 = vsyncpa [#allocation4], 0 }
   0x3   :  { %13 = vsyncpa [#allocation10], 0  ;;  %s2981_s15 = smov [#allocation5]   ;;  %s2982_s17 = smov [#allocation2]  }
   0x4   :  { %s31_s16 = sshll.u32 %s2981_s15, 4  ;;  %s19_s18 = sshll.u32 %s2982_s17, 4  ;;  %s32_s16 = int_to_ptr.vmem [resolvable:$true] %s31_s16  ;;  %s3015_s18 = int_to_ptr.vmem [resolvable:$true] %s19_s18 }
   0x5   :  { %s2863_s21 = scalar_lea.hbm %s7381_s1, 3072 }
   0x6   :  { %p2864_p0 = scmp.ne.s32.totalorder %s7381_s1, %s2863_s21  ;;  %p2867_p1 = scmp.lt.u32.totalorder %s2863_s21, %s7381_s1 }
   0x8   :  { %p2869_p2 = pnand %p2867_p1, %p2864_p0 }
   0xa   :  { %2872 = shalt.err (!%p2869_p2)
}
   0xb   :  { %s2873_s26 = scalar_lea.vmem %s32_s16, 3072  ;;  %p2878_p4 = scmp.lt.s32.totalorder %s32_s16, %s32_s16 }
   0xc   :  { %p2874_p3 = scmp.ne.s32.totalorder %s32_s16, %s2873_s26  ;;  %p2879_p5 = scmp.lt.s32.totalorder %s2873_s26, %s2873_s26 }
   0xe   :  { %p2880_p6 = por %p2879_p5, %p2878_p4 }
  0x10   :  { %p2881_p7 = pnand %p2880_p6, %p2874_p3 }
  0x12   :  { %2884 = shalt.err (!%p2881_p7)
}
  0x13   :  { %s2983_s27 = smov 256   ;;  %s2984_s28 = smov 16  }
  0x14   :  { %37 = dma.hbm_to_vmem [thread:$0]  %s7381_s1, 3072, %s32_s16, [#allocation6], %s2983_s27, %s2983_s27, %s2984_s28  }
  0x15   :  { %s2885_s7 = scalar_lea.hbm %s7380_s0, 3072 }
  0x16   :  { %p2886_p8 = scmp.ne.s32.totalorder %s7380_s0, %s2885_s7  ;;  %p2889_p9 = scmp.lt.u32.totalorder %s2885_s7, %s7380_s0 }
  0x18   :  { %p2891_p10 = pnand %p2889_p9, %p2886_p8 }
  0x1a   :  { %2894 = shalt.err (!%p2891_p10)
}
  0x1b   :  { %s2895_s12 = scalar_lea.vmem %s3015_s18, 3072  ;;  %p2900_p12 = scmp.lt.s32.totalorder %s3015_s18, %s3015_s18 }
  0x1c   :  { %p2896_p11 = scmp.ne.s32.totalorder %s3015_s18, %s2895_s12  ;;  %p2901_p13 = scmp.lt.s32.totalorder %s2895_s12, %s2895_s12 }
  0x1e   :  { %p2902_p0 = por %p2901_p13, %p2900_p12 }
  0x20   :  { %p2903_p1 = pnand %p2902_p0, %p2896_p11 }
  0x22   :  { %2906 = shalt.err (!%p2903_p1)
}
  0x23   :  { %25 = dma.hbm_to_vmem [thread:$0]  %s7380_s0, 3072, %s3015_s18, [#allocation3], %s2983_s27, %s2983_s27, %s2984_s28  }
  0x24   :  { %s2985_s14 = smov [#allocation7]   ;;  %s2907_s19 = scalar_lea.hbm %s7382_s2, 1024 }
  0x25   :  { %s43_s15 = sshll.u32 %s2985_s14, 4  ;;  %p2908_p2 = scmp.ne.s32.totalorder %s7382_s2, %s2907_s19  ;;  %s44_s15 = int_to_ptr.vmem [resolvable:$true] %s43_s15 }
  0x26   :  { %p2911_p3 = scmp.lt.u32.totalorder %s2907_s19, %s7382_s2 }
  0x28   :  { %p2913_p4 = pnand %p2911_p3, %p2908_p2 }
  0x2a   :  { %2916 = shalt.err (!%p2913_p4)
}
  0x2b   :  { %s2917_s24 = scalar_lea.vmem %s44_s15, 1024  ;;  %p2922_p6 = scmp.lt.s32.totalorder %s44_s15, %s44_s15 }
  0x2c   :  { %p2918_p5 = scmp.ne.s32.totalorder %s44_s15, %s2917_s24  ;;  %p2923_p7 = scmp.lt.s32.totalorder %s2917_s24, %s2917_s24 }
  0x2e   :  { %p2924_p8 = por %p2923_p7, %p2922_p6 }
  0x30   :  { %p2925_p9 = pnand %p2924_p8, %p2918_p5 }
  0x32   :  { %2928 = shalt.err (!%p2925_p9)
}
  0x33   :  { %49 = dma.hbm_to_vmem [thread:$0]  %s7382_s2, 1024, %s44_s15, [#allocation6], %s2983_s27, %s2983_s27, %s2984_s28  }
  0x34   :  { %2973 = dma.done.wait [#allocation3], 3072  }
  0x35   :  { %2974 = vsyncadd [#allocation3], 4294964224 }
  0x36   :  { %2975 = dma.done.wait [#allocation6], 4096  }
  0x37   :  { %2976 = vsyncadd [#allocation6], 4294963200  ;;  %v7385_v0 = vlaneseq  ;;  %v3070_v2 = vld [vmem:[#allocation2 + $0x20] sm:$0xff]  ;;  %v3072_v3 = vld [vmem:[#allocation2 + $0x30] sm:$0xff]  ;;  %s2986_s2 = smov 1   ;;  %s2987_s25 = smov 127  }
  0x38   :  { %v3076_v4 = vld [vmem:[#allocation2] sm:$0xff]  ;;  %v189_v5 = vrot.slane %v3070_v2, 7  ;;  %v249_v6 = vrot.slane %v3072_v3, 7  ;;  %v552_v7 = vrot.slane %v3070_v2, 1  ;;  %v612_v8 = vrot.slane %v3072_v3, 1  ;;  %v3082_v9 = vld [vmem:[#allocation2 + $0x10] sm:$0xff] }
  0x39   :  { %v3068_v1 = vshrl.u32 %v7385_v0, 7  ;;  %v187_v10 = vrot.slane %v3076_v4, 7  ;;  %v247_v11 = vrot.slane %v3082_v9, 7  ;;  %v550_v12 = vrot.slane %v3076_v4, 1  ;;  %v3088_v14 = vld [vmem:[#allocation2 + $0x40] sm:$0xff]  ;;  %v3098_v19 = vld [vmem:[#allocation2 + $0x50] sm:$0xff] }
  0x3a   :  { %v610_v13 = vrot.slane %v3082_v9, 1  ;;  %v3106_v24 = vld [vmem:[#allocation2 + $0x60] sm:$0xff]  ;;  %v191_v28 = vrot.slane %v3088_v14, 7  ;;  %v3114_v29 = vld [vmem:[#allocation2 + $0x70] sm:$0xff]  ;;  %v251_v33 = vrot.slane %v3098_v19, 7  ;;  %v554_v35 = vrot.slane %v3088_v14, 1 }
  0x3b   :  { %7758 = vst [vmem:[#allocation15_spill] sm:$0xff] %v3068_v1  ;;  %vm309_vm0 = vcmp.lt.s32.totalorder %v3068_v1, 1  ;;  %vm670_vm1 = vcmp.lt.s32.totalorder %v3068_v1, 7  ;;  %v614_v36 = vrot.slane %v3098_v19, 1  ;;  %v193_v37 = vrot.slane %v3106_v24, 7  ;;  %v3144_v46 = vld [vmem:[#allocation2 + $0x80] sm:$0xff] }
  0x3c   :  { %v372_v15 = vsel %vm309_vm0, %v249_v6, %v189_v5  ;;  %v673_v16 = vsel %vm670_vm1, %v552_v7, %v612_v8  ;;  %v312_v17 = vsel %vm309_vm0, %v189_v5, %v249_v6  ;;  %v733_v18 = vsel %vm670_vm1, %v612_v8, %v552_v7  ;;  %v3146_v47 = vld [vmem:[#allocation2 + $0x90] sm:$0xff]  ;;  %v3157_v54 = vld [vmem:[#allocation2 + $0xa0] sm:$0xff]  ;;  %s2988_s26 = smov [#allocation8]   ;;  %s2989_s28 = smov [#allocation9]  }
  0x3d   :  { %v434_v20 = vadd.f32 %v372_v15, %v3070_v2  ;;  %v370_v21 = vsel %vm309_vm0, %v247_v11, %v187_v10  ;;  %v671_v22 = vsel %vm670_vm1, %v550_v12, %v610_v13  ;;  %v436_v23 = vadd.f32 %v312_v17, %v3072_v3  ;;  %v3159_v55 = vld [vmem:[#allocation2 + $0xb0] sm:$0xff]  ;;  %s2723_s27 = sshll.u32 %s2988_s26, 4  ;;  %s2733_s29 = sshll.u32 %s2989_s28, 4  ;;  %s2724_s27 = int_to_ptr.vmem [resolvable:$true] %s2723_s27  ;;  %s7346_s29 = int_to_ptr.vmem [resolvable:$true] %s2733_s29 }
  0x3e   :  { %v430_v25 = vadd.f32 %v370_v21, %v3076_v4  ;;  %v310_v26 = vsel %vm309_vm0, %v187_v10, %v247_v11  ;;  %v731_v27 = vsel %vm670_vm1, %v610_v13, %v550_v12  ;;  %v314_v39 = vsel %vm309_vm0, %v191_v28, %v251_v33  ;;  %v3187_v13 = vld [vmem:[#allocation5] sm:$0xff]  ;;  %v3189_v15 = vld [vmem:[#allocation5 + $0x10] sm:$0xff]  ;;  %s2929_s6 = scalar_lea.vmem %s2724_s27, 16  ;;  %s2933_s7 = scalar_lea.vmem %s2724_s27, 32 }
  0x3f   :  { %v3116_v30 = vadd.f32 %v673_v16, %v434_v20  ;;  %v3118_v31 = vadd.f32 %v733_v18, %v436_v23  ;;  %v432_v32 = vadd.f32 %v310_v26, %v3082_v9  ;;  %v374_v40 = vsel %vm309_vm0, %v251_v33, %v191_v28  ;;  %v3208_v26 = vld [vmem:[#allocation5 + $0x30] sm:$0xff]  ;;  %p2930_p10 = scmp.ne.s32.totalorder %s2724_s27, %s2929_s6  ;;  %p2934_p11 = scmp.lt.s32.totalorder %s2724_s27, %s2724_s27 }
  0x40   :  { %v3122_v34 = vadd.f32 %v671_v22, %v430_v25  ;;  %v253_v41 = vrot.slane %v3114_v29, 7  ;;  %v440_v42 = vadd.f32 %v314_v39, %v3098_v19  ;;  %v735_v43 = vsel %vm670_vm1, %v614_v36, %v554_v35  ;;  %v3206_v25 = vld [vmem:[#allocation5 + $0x20] sm:$0xff]  ;;  %p2935_p12 = scmp.lt.s32.totalorder %s2933_s7, %s2929_s6 }
  0x41   :  { %7759 = vst [vmem:[#allocation16_spill] sm:$0xff] %v3118_v31  ;;  %915 = vrot.lane.b32.xlu1 %v3116_v30, %s2986_s2  ;;  %v3129_v38 = vadd.f32 %v731_v27, %v432_v32  ;;  %v438_v44 = vadd.f32 %v374_v40, %v3088_v14  ;;  %v675_v45 = vsel %vm670_vm1, %v554_v35, %v614_v36  ;;  %v556_v49 = vrot.slane %v3106_v24, 1 }
  0x42   :  { %911 = vrot.lane.b32.xlu0 %v3122_v34, %s2986_s2  ;;  %v316_v48 = vsel %vm309_vm0, %v193_v37, %v253_v41  ;;  %v616_v50 = vrot.slane %v3114_v29, 1  ;;  %v376_v51 = vsel %vm309_vm0, %v253_v41, %v193_v37  ;;  %v3154_v52 = vadd.f32 %v735_v43, %v440_v42  ;;  %p2936_p13 = por %p2935_p12, %p2934_p11 }
  0x43   :  { %7760 = vst [vmem:[#allocation17_spill] sm:$0xff] %v3129_v38  ;;  %v444_v53 = vadd.f32 %v316_v48, %v3114_v29  ;;  %v3163_v56 = vadd.f32 %v675_v45, %v438_v44  ;;  %v195_v58 = vrot.slane %v3144_v46, 7  ;;  %v255_v59 = vrot.slane %v3146_v47, 7  ;;  %v3234_v48 = vld [vmem:[#allocation5 + $0x40] sm:$0xff] }
  0x44   :  { %7761 = vst [vmem:[#allocation18_spill] sm:$0xff] %v3154_v52  ;;  %v737_v57 = vsel %vm670_vm1, %v616_v50, %v556_v49  ;;  %v442_v60 = vadd.f32 %v376_v51, %v3106_v24  ;;  %v677_v61 = vsel %vm670_vm1, %v556_v49, %v616_v50  ;;  %v558_v62 = vrot.slane %v3144_v46, 1  ;;  %v3236_v49 = vld [vmem:[#allocation5 + $0x50] sm:$0xff]  ;;  %p2937_p0 = pnand %p2936_p13, %p2930_p10 }
  0x45   :  { %917 = vrot.lane.b32.xlu1 %v3118_v31, %s2986_s2  ;;  %7762 = vst [vmem:[#allocation19_spill] sm:$0xff] %v3163_v56  ;;  %v618_v63 = vrot.slane %v3146_v47, 1  ;;  %v318_v5 = vsel %vm309_vm0, %v195_v58, %v255_v59  ;;  %v378_v6 = vsel %vm309_vm0, %v255_v59, %v195_v58  ;;  %v197_v7 = vrot.slane %v3157_v54, 7  ;;  %v3245_v58 = vld [vmem:[#allocation5 + $0x60] sm:$0xff]  ;;  %v3247_v59 = vld [vmem:[#allocation5 + $0x70] sm:$0xff] }
  0x46   :  { %913 = vrot.lane.b32.xlu0 %v3129_v38, %s2986_s2  ;;  %v257_v8 = vrot.slane %v3159_v55, 7  ;;  %v3182_v10 = vadd.f32 %v737_v57, %v444_v53  ;;  %v448_v11 = vadd.f32 %v318_v5, %v3146_v47  ;;  %v560_v17 = vrot.slane %v3157_v54, 1 }
  0x47   :  { %v739_v12 = vsel %vm670_vm1, %v618_v63, %v558_v62  ;;  %v620_v18 = vrot.slane %v3159_v55, 1  ;;  %v3201_v21 = vadd.f32 %v677_v61, %v442_v60  ;;  %v446_v22 = vadd.f32 %v378_v6, %v3144_v46 }
  0x48   :  { %7763 = vst [vmem:[#allocation20_spill] sm:$0xff] %v3182_v10  ;;  %v320_v16 = vsel %vm309_vm0, %v197_v7, %v257_v8  ;;  %v380_v20 = vsel %vm309_vm0, %v257_v8, %v197_v7  ;;  %v679_v23 = vsel %vm670_vm1, %v558_v62, %v618_v63  ;;  %v3210_v27 = vadd.f32 %v739_v12, %v448_v11 }
  0x49   :  { %921 = vrot.lane.b32.xlu1 %v3154_v52, %s2986_s2  ;;  %7764 = vst [vmem:[#allocation21_spill] sm:$0xff] %v3201_v21  ;;  %v452_v28 = vadd.f32 %v320_v16, %v3159_v55  ;;  %v199_v32 = vrot.slane %v3187_v13, 7  ;;  %v259_v33 = vrot.slane %v3189_v15, 7  ;;  %v741_v35 = vsel %vm670_vm1, %v620_v18, %v560_v17 }
  0x4a   :  { %919 = vrot.lane.b32.xlu0 %v3163_v56, %s2986_s2  ;;  %7765 = vst [vmem:[#allocation22_spill] sm:$0xff] %v3210_v27  ;;  %v450_v36 = vadd.f32 %v380_v20, %v3157_v54  ;;  %v562_v37 = vrot.slane %v3187_v13, 1  ;;  %v622_v39 = vrot.slane %v3189_v15, 1  ;;  %v681_v40 = vsel %vm670_vm1, %v560_v17, %v620_v18  ;;  %v7933_v1 = vld [vmem:[#allocation17_spill] sm:$0xff] }
  0x4b   :  { %v322_v41 = vsel %vm309_vm0, %v199_v32, %v259_v33  ;;  %v201_v42 = vrot.slane %v3206_v25, 7  ;;  %v261_v43 = vrot.slane %v3208_v26, 7  ;;  %v3230_v44 = vadd.f32 %v679_v23, %v446_v22  ;;  %v3274_v22 = vld [vmem:[#allocation5 + $0x80] sm:$0xff]  ;;  %v3276_v23 = vld [vmem:[#allocation5 + $0x90] sm:$0xff] }
  0x4c   :  { %v382_v45 = vsel %vm309_vm0, %v259_v33, %v199_v32  ;;  %v3238_v50 = vadd.f32 %v741_v35, %v452_v28  ;;  %v3240_v51 = vadd.f32 %v681_v40, %v450_v36  ;;  %v456_v53 = vadd.f32 %v322_v41, %v3189_v15 }
  0x4d   :  { %925 = vrot.lane.b32.xlu1 %v3182_v10, %s2986_s2  ;;  %7766 = vst [vmem:[#allocation23_spill] sm:$0xff] %v3230_v44  ;;  %v743_v57 = vsel %vm670_vm1, %v622_v39, %v562_v37  ;;  %v454_v60 = vadd.f32 %v382_v45, %v3187_v13  ;;  %v683_v61 = vsel %vm670_vm1, %v562_v37, %v622_v39  ;;  %v564_v63 = vrot.slane %v3206_v25, 1 }
  0x4e   :  { %923 = vrot.lane.b32.xlu0 %v3201_v21, %s2986_s2  ;;  %7767 = vst [vmem:[#allocation24_spill] sm:$0xff] %v3238_v50  ;;  %7768 = vst [vmem:[#allocation25_spill] sm:$0xff] %v3240_v51  ;;  %v324_v62 = vsel %vm309_vm0, %v201_v42, %v261_v43  ;;  %v624_v5 = vrot.slane %v3208_v26, 1  ;;  %v384_v6 = vsel %vm309_vm0, %v261_v43, %v201_v42  ;;  %v203_v7 = vrot.slane %v3234_v48, 7 }
  0x4f   :  { %v263_v8 = vrot.slane %v3236_v49, 7  ;;  %v205_v11 = vrot.slane %v3245_v58, 7  ;;  %v265_v12 = vrot.slane %v3247_v59, 7  ;;  %v3268_v16 = vadd.f32 %v743_v57, %v456_v53  ;;  %v3301_v57 = vld [vmem:[#allocation5 + $0xa0] sm:$0xff] }
  0x50   :  { %v3270_v17 = vadd.f32 %v683_v61, %v454_v60  ;;  %v460_v18 = vadd.f32 %v324_v62, %v3208_v26  ;;  %v458_v20 = vadd.f32 %v384_v6, %v3206_v25  ;;  %v745_v28 = vsel %vm670_vm1, %v624_v5, %v564_v63  ;;  %v3303_v60 = vld [vmem:[#allocation5 + $0xb0] sm:$0xff] }
  0x51   :  { %929 = vrot.lane.b32.xlu1 %v3210_v27, %s2986_s2  ;;  %7769 = vst [vmem:[#allocation26_spill] sm:$0xff] %v3268_v16  ;;  %v326_v32 = vsel %vm309_vm0, %v203_v7, %v263_v8  ;;  %v566_v33 = vrot.slane %v3234_v48, 1  ;;  %v626_v35 = vrot.slane %v3236_v49, 1  ;;  %v685_v36 = vsel %vm670_vm1, %v564_v63, %v624_v5 }
  0x52   :  { %927 = vrot.lane.b32.xlu0 %v3230_v44, %s2986_s2  ;;  %v386_v37 = vsel %vm309_vm0, %v263_v8, %v203_v7  ;;  %v328_v39 = vsel %vm309_vm0, %v205_v11, %v265_v12  ;;  %v568_v40 = vrot.slane %v3245_v58, 1  ;;  %v628_v41 = vrot.slane %v3247_v59, 1 }
  0x53   :  { %v207_v42 = vrot.slane %v3274_v22, 7  ;;  %v267_v43 = vrot.slane %v3276_v23, 7  ;;  %v3298_v45 = vadd.f32 %v745_v28, %v460_v18  ;;  %v464_v53 = vadd.f32 %v326_v32, %v3236_v49 }
  0x54   :  { %v3307_v61 = vadd.f32 %v685_v36, %v458_v20  ;;  %v747_v62 = vsel %vm670_vm1, %v626_v35, %v566_v33  ;;  %v462_v63 = vadd.f32 %v386_v37, %v3234_v48  ;;  %v687_v5 = vsel %vm670_vm1, %v566_v33, %v626_v35 }
  0x55   :  { %933 = vrot.lane.b32.xlu1 %v3238_v50, %s2986_s2  ;;  %7770 = vst [vmem:[#allocation27_spill] sm:$0xff] %v3298_v45  ;;  %v468_v6 = vadd.f32 %v328_v39, %v3247_v59  ;;  %v388_v7 = vsel %vm309_vm0, %v265_v12, %v205_v11  ;;  %v570_v8 = vrot.slane %v3274_v22, 1  ;;  %v630_v18 = vrot.slane %v3276_v23, 1 }
  0x56   :  { %931 = vrot.lane.b32.xlu0 %v3240_v51, %s2986_s2  ;;  %v749_v20 = vsel %vm670_vm1, %v628_v41, %v568_v40  ;;  %v330_v28 = vsel %vm309_vm0, %v207_v42, %v267_v43  ;;  %v209_v32 = vrot.slane %v3301_v57, 7  ;;  %v269_v36 = vrot.slane %v3303_v60, 7 }
  0x57   :  { %v3327_v33 = vadd.f32 %v747_v62, %v464_v53  ;;  %v390_v11 = vsel %vm309_vm0, %v267_v43, %v207_v42  ;;  %v3333_v12 = vadd.f32 %v687_v5, %v462_v63  ;;  %v466_v35 = vadd.f32 %v388_v7, %v3245_v58 }
  0x58   :  { %v115_v37 = vmul.f32 %v3076_v4, %v3076_v4  ;;  %v117_v39 = vmul.f32 %v3082_v9, %v3082_v9  ;;  %v3340_v0 = vadd.f32 %v749_v20, %v468_v6  ;;  %v689_v53 = vsel %vm670_vm1, %v568_v40, %v628_v41 }
  0x59   :  { %937 = vrot.lane.b32.xlu1 %v3268_v16, %s2986_s2  ;;  %7771 = vst [vmem:[#allocation28_spill] sm:$0xff] %v3327_v33  ;;  %7772 = vst [vmem:[#allocation29_spill] sm:$0xff] %v3333_v12  ;;  %v472_v42 = vadd.f32 %v330_v28, %v3276_v23  ;;  %v751_v43 = vsel %vm670_vm1, %v630_v18, %v570_v8  ;;  %v470_v62 = vadd.f32 %v390_v11, %v3274_v22  ;;  %vm2697_vm12 = vcmask 0  }
  0x5a   :  { %935 = vrot.lane.b32.xlu0 %v3270_v17, %s2986_s2  ;;  %7773 = vst [vmem:[#allocation30_spill] sm:$0xff] %v3340_v0  ;;  %v332_v63 = vsel %vm309_vm0, %v209_v32, %v269_v36  ;;  %v572_v5 = vrot.slane %v3301_v57, 1  ;;  %v632_v7 = vrot.slane %v3303_v60, 1  ;;  %v691_v40 = vsel %vm670_vm1, %v570_v8, %v630_v18 }
  0x5b   :  { %v392_v41 = vsel %vm309_vm0, %v269_v36, %v209_v32  ;;  %v119_v6 = vmul.f32 %v3070_v2, %v3070_v2  ;;  %v121_v20 = vmul.f32 %v3072_v3, %v3072_v3  ;;  %v3364_v28 = vadd.f32 %v689_v53, %v466_v35 }
  0x5c   :  { %v211_v11 = vrot.slane %v115_v37, 7  ;;  %v271_v50 = vrot.slane %v117_v39, 7  ;;  %v3366_v51 = vadd.f32 %v751_v43, %v472_v42  ;;  %v476_v8 = vadd.f32 %v332_v63, %v3303_v60 }
  0x5d   :  { %941 = vrot.lane.b32.xlu1 %v3298_v45, %s2986_s2  ;;  %7774 = vst [vmem:[#allocation31_spill] sm:$0xff] %v3364_v28  ;;  %v3369_v18 = vadd.f32 %v691_v40, %v470_v62  ;;  %v753_v32 = vsel %vm670_vm1, %v632_v7, %v572_v5  ;;  %v474_v36 = vadd.f32 %v392_v41, %v3301_v57  ;;  %v574_v35 = vrot.slane %v115_v37, 1 }
  0x5e   :  { %939 = vrot.lane.b32.xlu0 %v3307_v61, %s2986_s2  ;;  %7775 = vst [vmem:[#allocation32_spill] sm:$0xff] %v3366_v51  ;;  %v693_v27 = vsel %vm670_vm1, %v572_v5, %v632_v7  ;;  %v634_v53 = vrot.slane %v117_v39, 1  ;;  %v213_v10 = vrot.slane %v119_v6, 7  ;;  %v273_v42 = vrot.slane %v121_v20, 7 }
  0x5f   :  { %7776 = vst [vmem:[#allocation33_spill] sm:$0xff] %v3369_v18  ;;  %v394_v43 = vsel %vm309_vm0, %v271_v50, %v211_v11  ;;  %v334_v62 = vsel %vm309_vm0, %v211_v11, %v271_v50  ;;  %v123_v63 = vmul.f32 %v3088_v14, %v3088_v14  ;;  %v125_v5 = vmul.f32 %v3098_v19, %v3098_v19 }
  0x60   :  { %v3388_v7 = vadd.f32 %v753_v32, %v476_v8  ;;  %v3390_v40 = vadd.f32 %v693_v27, %v474_v36  ;;  %v576_v41 = vrot.slane %v119_v6, 1  ;;  %v478_v50 = vadd.f32 %v394_v43, %v115_v37 }
  0x61   :  { %945 = vrot.lane.b32.xlu1 %v3327_v33, %s2986_s2  ;;  %v480_v11 = vadd.f32 %v334_v62, %v117_v39  ;;  %v755_v21 = vsel %vm670_vm1, %v634_v53, %v574_v35  ;;  %v636_v44 = vrot.slane %v121_v20, 1  ;;  %v396_v27 = vsel %vm309_vm0, %v273_v42, %v213_v10 }
  0x62   :  { %943 = vrot.lane.b32.xlu0 %v3333_v12, %s2986_s2  ;;  %7777 = vst [vmem:[#allocation34_spill] sm:$0xff] %v3388_v7  ;;  %7778 = vst [vmem:[#allocation35_spill] sm:$0xff] %v3390_v40  ;;  %v336_v8 = vsel %vm309_vm0, %v213_v10, %v273_v42  ;;  %v215_v32 = vrot.slane %v123_v63, 7  ;;  %v275_v36 = vrot.slane %v125_v5, 7  ;;  %v3410_v43 = vmul.f32 %v3144_v46, %v3144_v46 }
  0x63   :  { %v133_v62 = vmul.f32 %v3146_v47, %v3146_v47  ;;  %v482_v10 = vadd.f32 %v396_v27, %v119_v6  ;;  %v484_v42 = vadd.f32 %v336_v8, %v121_v20  ;;  %v757_v52 = vsel %vm670_vm1, %v636_v44, %v576_v41 }
  0x64   :  { %v638_v33 = vrot.slane %v125_v5, 1  ;;  %v338_v45 = vsel %vm309_vm0, %v215_v32, %v275_v36  ;;  %v219_v27 = vrot.slane %v3410_v43, 7 }
  0x65   :  { %949 = vrot.lane.b32.xlu1 %v3340_v0, %s2986_s2  ;;  %v127_v0 = vmul.f32 %v3106_v24, %v3106_v24  ;;  %v488_v8 = vadd.f32 %v338_v45, %v125_v5 }
  0x66   :  { %947 = vrot.lane.b32.xlu0 %v3364_v28, %s2986_s2  ;;  %v129_v28 = vmul.f32 %v3114_v29, %v3114_v29 }
  0x67   :  { %v217_v37 = vrot.slane %v127_v0, 7  ;;  %v580_v6 = vrot.slane %v127_v0, 1 }
  0x68   :  { %v277_v39 = vrot.slane %v129_v28, 7  ;;  %v640_v20 = vrot.slane %v129_v28, 1 }
  0x69   :  { %953 = vrot.lane.b32.xlu1 %v3366_v51, %s2986_s2  ;;  %v695_v51 = vsel %vm670_vm1, %v574_v35, %v634_v53  ;;  %v578_v53 = vrot.slane %v123_v63, 1 }
  0x6a   :  { %951 = vrot.lane.b32.xlu0 %v3369_v18, %s2986_s2  ;;  %v3416_v18 = vadd.f32 %v755_v21, %v480_v11  ;;  %v3422_v35 = vadd.f32 %v695_v51, %v478_v50  ;;  %v398_v21 = vsel %vm309_vm0, %v275_v36, %v215_v32  ;;  %v340_v11 = vsel %vm309_vm0, %v217_v37, %v277_v39 }
  0x6b   :  { %v279_v51 = vrot.slane %v133_v62, 7  ;;  %v3435_v50 = vadd.f32 %v757_v52, %v484_v42  ;;  %v486_v36 = vadd.f32 %v398_v21, %v123_v63  ;;  %v759_v52 = vsel %vm670_vm1, %v638_v33, %v578_v53 }
  0x6c   :  { %7779 = vst [vmem:[#allocation36_spill] sm:$0xff] %v3416_v18  ;;  %7780 = vst [vmem:[#allocation37_spill] sm:$0xff] %v3422_v35  ;;  %v400_v45 = vsel %vm309_vm0, %v277_v39, %v217_v37  ;;  %v492_v5 = vadd.f32 %v340_v11, %v129_v28  ;;  %v582_v42 = vrot.slane %v3410_v43, 1  ;;  %v761_v12 = vsel %vm670_vm1, %v640_v20, %v580_v6 }
  0x6d   :  { %957 = vrot.lane.b32.xlu1 %v3388_v7, %s2986_s2  ;;  %v697_v7 = vsel %vm670_vm1, %v576_v41, %v636_v44  ;;  %7781 = vst [vmem:[#allocation38_spill] sm:$0xff] %v3435_v50  ;;  %v135_v44 = vmul.f32 %v3157_v54, %v3157_v54  ;;  %v137_v41 = vmul.f32 %v3159_v55, %v3159_v55 }
  0x6e   :  { %955 = vrot.lane.b32.xlu0 %v3390_v40, %s2986_s2  ;;  %v3443_v32 = vadd.f32 %v697_v7, %v482_v10  ;;  %v699_v40 = vsel %vm670_vm1, %v578_v53, %v638_v33  ;;  %v342_v7 = vsel %vm309_vm0, %v219_v27, %v279_v51  ;;  %v139_v63 = vmul.f32 %v3187_v13, %v3187_v13 }
  0x6f   :  { %v141_v10 = vmul.f32 %v3189_v15, %v3189_v15  ;;  %v3462_v33 = vadd.f32 %v759_v52, %v488_v8  ;;  %v221_v28 = vrot.slane %v135_v44, 7  ;;  %v281_v37 = vrot.slane %v137_v41, 7 }
  0x70   :  { %7782 = vst [vmem:[#allocation39_spill] sm:$0xff] %v3443_v32  ;;  %v3466_v39 = vadd.f32 %v699_v40, %v486_v36  ;;  %v490_v53 = vadd.f32 %v400_v45, %v127_v0  ;;  %v701_v21 = vsel %vm670_vm1, %v580_v6, %v640_v20  ;;  %v3470_v11 = vadd.f32 %v761_v12, %v492_v5 }
  0x71   :  { %961 = vrot.lane.b32.xlu1 %v3416_v18, %s2986_s2  ;;  %v642_v18 = vrot.slane %v133_v62, 1  ;;  %7783 = vst [vmem:[#allocation40_spill] sm:$0xff] %v3462_v33  ;;  %v496_v56 = vadd.f32 %v342_v7, %v133_v62  ;;  %v584_v52 = vrot.slane %v135_v44, 1  ;;  %v223_v16 = vrot.slane %v139_v63, 7 }
  0x72   :  { %959 = vrot.lane.b32.xlu0 %v3422_v35, %s2986_s2  ;;  %7784 = vst [vmem:[#allocation41_spill] sm:$0xff] %v3466_v39  ;;  %7785 = vst [vmem:[#allocation42_spill] sm:$0xff] %v3470_v11  ;;  %v402_v35 = vsel %vm309_vm0, %v279_v51, %v219_v27  ;;  %v283_v38 = vrot.slane %v141_v10, 7  ;;  %v404_v0 = vsel %vm309_vm0, %v281_v37, %v221_v28  ;;  %v586_v36 = vrot.slane %v139_v63, 1 }
  0x73   :  { %v763_v8 = vsel %vm670_vm1, %v642_v18, %v582_v42  ;;  %v344_v12 = vsel %vm309_vm0, %v221_v28, %v281_v37  ;;  %v143_v40 = vmul.f32 %v3206_v25, %v3206_v25  ;;  %v145_v62 = vmul.f32 %v3208_v26, %v3208_v26 }
  0x74   :  { %v3488_v6 = vadd.f32 %v701_v21, %v490_v53  ;;  %v494_v20 = vadd.f32 %v402_v35, %v3410_v43  ;;  %v703_v27 = vsel %vm670_vm1, %v582_v42, %v642_v18  ;;  %v3493_v51 = vadd.f32 %v763_v8, %v496_v56 }
  0x75   :  { %965 = vrot.lane.b32.xlu1 %v3435_v50, %s2986_s2  ;;  %v644_v50 = vrot.slane %v137_v41, 1  ;;  %v646_v45 = vrot.slane %v141_v10, 1  ;;  %v498_v5 = vadd.f32 %v404_v0, %v135_v44  ;;  %v500_v28 = vadd.f32 %v344_v12, %v137_v41 }
  0x76   :  { %963 = vrot.lane.b32.xlu0 %v3443_v32, %s2986_s2  ;;  %7786 = vst [vmem:[#allocation43_spill] sm:$0xff] %v3488_v6  ;;  %7787 = vst [vmem:[#allocation44_spill] sm:$0xff] %v3493_v51  ;;  %v406_v37 = vsel %vm309_vm0, %v283_v38, %v223_v16  ;;  %v346_v56 = vsel %vm309_vm0, %v223_v16, %v283_v38  ;;  %v225_v18 = vrot.slane %v143_v40, 7  ;;  %v285_v35 = vrot.slane %v145_v62, 7 }
  0x77   :  { %v705_v7 = vsel %vm670_vm1, %v584_v52, %v644_v50  ;;  %v765_v43 = vsel %vm670_vm1, %v644_v50, %v584_v52  ;;  %v3507_v44 = vadd.f32 %v703_v27, %v494_v20  ;;  %v147_v41 = vmul.f32 %v3234_v48, %v3234_v48 }
  0x78   :  { %v149_v42 = vmul.f32 %v3236_v49, %v3236_v49  ;;  %v502_v53 = vadd.f32 %v406_v37, %v139_v63  ;;  %v707_v50 = vsel %vm670_vm1, %v586_v36, %v646_v45  ;;  %v3515_v21 = vadd.f32 %v705_v7, %v498_v5 }
  0x79   :  { %969 = vrot.lane.b32.xlu1 %v3462_v33, %s2986_s2  ;;  %7788 = vst [vmem:[#allocation45_spill] sm:$0xff] %v3507_v44  ;;  %v3517_v38 = vadd.f32 %v765_v43, %v500_v28  ;;  %v504_v16 = vadd.f32 %v346_v56, %v141_v10  ;;  %v767_v8 = vsel %vm670_vm1, %v646_v45, %v586_v36  ;;  %v588_v0 = vrot.slane %v143_v40, 1 }
  0x7a   :  { %967 = vrot.lane.b32.xlu0 %v3466_v39, %s2986_s2  ;;  %7789 = vst [vmem:[#allocation46_spill] sm:$0xff] %v3515_v21  ;;  %v408_v52 = vsel %vm309_vm0, %v285_v35, %v225_v18  ;;  %v648_v12 = vrot.slane %v145_v62, 1  ;;  %v348_v63 = vsel %vm309_vm0, %v225_v18, %v285_v35  ;;  %v227_v20 = vrot.slane %v147_v41, 7 }
  0x7b   :  { %7790 = vst [vmem:[#allocation47_spill] sm:$0xff] %v3517_v38  ;;  %v287_v27 = vrot.slane %v149_v42, 7  ;;  %v151_v10 = vmul.f32 %v3245_v58, %v3245_v58  ;;  %v153_v36 = vmul.f32 %v3247_v59, %v3247_v59  ;;  %v3535_v45 = vmul.f32 %v3274_v22, %v3274_v22 }
  0x7c   :  { %v3539_v5 = vmul.f32 %v3276_v23, %v3276_v23  ;;  %v3541_v7 = vadd.f32 %v707_v50, %v502_v53  ;;  %v3543_v28 = vadd.f32 %v767_v8, %v504_v16  ;;  %v506_v37 = vadd.f32 %v408_v52, %v143_v40 }
  0x7d   :  { %973 = vrot.lane.b32.xlu1 %v3470_v11, %s2986_s2  ;;  %v709_v43 = vsel %vm670_vm1, %v588_v0, %v648_v12  ;;  %v508_v56 = vadd.f32 %v348_v63, %v145_v62  ;;  %v590_v18 = vrot.slane %v147_v41, 1  ;;  %v650_v35 = vrot.slane %v149_v42, 1 }
  0x7e   :  { %971 = vrot.lane.b32.xlu0 %v3488_v6, %s2986_s2  ;;  %7791 = vst [vmem:[#allocation48_spill] sm:$0xff] %v3541_v7  ;;  %7792 = vst [vmem:[#allocation49_spill] sm:$0xff] %v3543_v28  ;;  %v350_v53 = vsel %vm309_vm0, %v227_v20, %v287_v27  ;;  %v229_v50 = vrot.slane %v151_v10, 7  ;;  %v289_v40 = vrot.slane %v153_v36, 7  ;;  %v410_v16 = vsel %vm309_vm0, %v287_v27, %v227_v20 }
  0x7f   :  { %v231_v8 = vrot.slane %v3535_v45, 7  ;;  %v291_v62 = vrot.slane %v3539_v5, 7  ;;  %v3559_v52 = vadd.f32 %v709_v43, %v506_v37  ;;  %v159_v63 = vmul.f32 %v3301_v57, %v3301_v57 }
  0x80   :  { %v711_v20 = vsel %vm670_vm1, %v590_v18, %v650_v35  ;;  %v512_v27 = vadd.f32 %v350_v53, %v149_v42  ;;  %v510_v37 = vadd.f32 %v410_v16, %v147_v41  ;;  %v592_v43 = vrot.slane %v151_v10, 1 }
  0x81   :  { %977 = vrot.lane.b32.xlu1 %v3493_v51, %s2986_s2  ;;  %v769_v51 = vsel %vm670_vm1, %v648_v12, %v588_v0  ;;  %7793 = vst [vmem:[#allocation50_spill] sm:$0xff] %v3559_v52  ;;  %v161_v0 = vmul.f32 %v3303_v60, %v3303_v60  ;;  %v352_v11 = vsel %vm309_vm0, %v229_v50, %v289_v40  ;;  %v654_v6 = vrot.slane %v3539_v5, 1 }
  0x82   :  { %975 = vrot.lane.b32.xlu0 %v3507_v44, %s2986_s2  ;;  %v3567_v12 = vadd.f32 %v769_v51, %v508_v56  ;;  %v412_v51 = vsel %vm309_vm0, %v289_v40, %v229_v50  ;;  %v594_v56 = vrot.slane %v3535_v45, 1  ;;  %v354_v42 = vsel %vm309_vm0, %v231_v8, %v291_v62 }
  0x83   :  { %v163_v41 = vmul.f32 %v3187_v13, %v3076_v4  ;;  %v165_v53 = vmul.f32 %v3189_v15, %v3082_v9  ;;  %v516_v50 = vadd.f32 %v352_v11, %v153_v36  ;;  %v3593_v40 = vadd.f32 %v711_v20, %v510_v37 }
  0x84   :  { %7794 = vst [vmem:[#allocation51_spill] sm:$0xff] %v3567_v12  ;;  %v514_v44 = vadd.f32 %v412_v51, %v151_v10  ;;  %v414_v9 = vsel %vm309_vm0, %v291_v62, %v231_v8  ;;  %v520_v13 = vadd.f32 %v354_v42, %v3539_v5  ;;  %v596_v15 = vrot.slane %v159_v63, 1 }
  0x85   :  { %981 = vrot.lane.b32.xlu1 %v3517_v38, %s2986_s2  ;;  %v771_v38 = vsel %vm670_vm1, %v650_v35, %v590_v18  ;;  %v233_v18 = vrot.slane %v159_v63, 7  ;;  %v293_v35 = vrot.slane %v161_v0, 7  ;;  %7796 = vst [vmem:[#allocation53_spill] sm:$0xff] %v3593_v40  ;;  %v775_v11 = vsel %vm670_vm1, %v654_v6, %v594_v56 }
  0x86   :  { %979 = vrot.lane.b32.xlu0 %v3515_v21, %s2986_s2  ;;  %v652_v21 = vrot.slane %v153_v36, 1  ;;  %v3589_v16 = vadd.f32 %v771_v38, %v512_v27  ;;  %v656_v38 = vrot.slane %v161_v0, 1  ;;  %v235_v10 = vrot.slane %v163_v41, 7 }
  0x87   :  { %v416_v36 = vsel %vm309_vm0, %v293_v35, %v233_v18  ;;  %v295_v20 = vrot.slane %v165_v53, 7  ;;  %v167_v5 = vmul.f32 %v3206_v25, %v3070_v2  ;;  %v169_v8 = vmul.f32 %v3208_v26, %v3072_v3 }
  0x88   :  { %7795 = vst [vmem:[#allocation52_spill] sm:$0xff] %v3589_v16  ;;  %v713_v33 = vsel %vm670_vm1, %v592_v43, %v652_v21  ;;  %v773_v4 = vsel %vm670_vm1, %v652_v21, %v592_v43  ;;  %v356_v21 = vsel %vm309_vm0, %v233_v18, %v293_v35  ;;  %v518_v37 = vadd.f32 %v414_v9, %v3535_v45 }
  0x89   :  { %985 = vrot.lane.b32.xlu1 %v3543_v28, %s2986_s2  ;;  %v3608_v27 = vadd.f32 %v773_v4, %v516_v50  ;;  %v3618_v62 = vadd.f32 %v713_v33, %v514_v44  ;;  %v715_v43 = vsel %vm670_vm1, %v594_v56, %v654_v6  ;;  %v3623_v51 = vadd.f32 %v775_v11, %v520_v13 }
  0x8a   :  { %983 = vrot.lane.b32.xlu0 %v3541_v7, %s2986_s2  ;;  %v522_v42 = vadd.f32 %v416_v36, %v159_v63  ;;  %v717_v18 = vsel %vm670_vm1, %v596_v15, %v656_v38  ;;  %v524_v2 = vadd.f32 %v356_v21, %v161_v0  ;;  %v598_v25 = vrot.slane %v163_v41, 1 }
  0x8b   :  { %7797 = vst [vmem:[#allocation54_spill] sm:$0xff] %v3608_v27  ;;  %7798 = vst [vmem:[#allocation55_spill] sm:$0xff] %v3618_v62  ;;  %v658_v35 = vrot.slane %v165_v53, 1  ;;  %v358_v3 = vsel %vm309_vm0, %v235_v10, %v295_v20  ;;  %v777_v26 = vsel %vm670_vm1, %v656_v38, %v596_v15  ;;  %v418_v33 = vsel %vm309_vm0, %v295_v20, %v235_v10 }
  0x8c   :  { %7799 = vst [vmem:[#allocation56_spill] sm:$0xff] %v3623_v51  ;;  %v237_v6 = vrot.slane %v167_v5, 7  ;;  %v297_v44 = vrot.slane %v169_v8, 7  ;;  %v3637_v45 = vadd.f32 %v715_v43, %v518_v37  ;;  %v171_v63 = vmul.f32 %v3234_v48, %v3088_v14 }
  0x8d   :  { %989 = vrot.lane.b32.xlu1 %v3567_v12, %s2986_s2  ;;  %v173_v0 = vmul.f32 %v3236_v49, %v3098_v19  ;;  %v528_v56 = vadd.f32 %v358_v3, %v165_v53  ;;  %v3643_v50 = vadd.f32 %v717_v18, %v522_v42  ;;  %v3645_v4 = vadd.f32 %v777_v26, %v524_v2 }
  0x8e   :  { %987 = vrot.lane.b32.xlu0 %v3559_v52, %s2986_s2  ;;  %7800 = vst [vmem:[#allocation57_spill] sm:$0xff] %v3637_v45  ;;  %v526_v9 = vadd.f32 %v418_v33, %v163_v41  ;;  %v779_v13 = vsel %vm670_vm1, %v658_v35, %v598_v25  ;;  %v420_v15 = vsel %vm309_vm0, %v297_v44, %v237_v6  ;;  %v600_v38 = vrot.slane %v167_v5, 1 }
  0x8f   :  { %7801 = vst [vmem:[#allocation58_spill] sm:$0xff] %v3643_v50  ;;  %7802 = vst [vmem:[#allocation59_spill] sm:$0xff] %v3645_v4  ;;  %v660_v14 = vrot.slane %v169_v8, 1  ;;  %v360_v19 = vsel %vm309_vm0, %v237_v6, %v297_v44  ;;  %v239_v48 = vrot.slane %v171_v63, 7  ;;  %v299_v49 = vrot.slane %v173_v0, 7 }
  0x90   :  { %v175_v41 = vmul.f32 %v3245_v58, %v3106_v24  ;;  %v177_v53 = vmul.f32 %v3247_v59, %v3114_v29  ;;  %v719_v11 = vsel %vm670_vm1, %v598_v25, %v658_v35  ;;  %v3663_v36 = vadd.f32 %v779_v13, %v528_v56 }
  0x91   :  { %993 = vrot.lane.b32.xlu1 %v3589_v16, %s2986_s2  ;;  %v530_v10 = vadd.f32 %v420_v15, %v167_v5  ;;  %v532_v20 = vadd.f32 %v360_v19, %v169_v8  ;;  %v179_v21 = vmul.f32 %v3274_v22, %v3144_v46  ;;  %v181_v37 = vmul.f32 %v3276_v23, %v3146_v47  ;;  %v3709_v15 = vld [vmem:[#allocation2 + $0x8] sm:$0xff] }
  0x92   :  { %991 = vrot.lane.b32.xlu0 %v3593_v40, %s2986_s2  ;;  %7803 = vst [vmem:[#allocation60_spill] sm:$0xff] %v3663_v36  ;;  %v721_v24 = vsel %vm670_vm1, %v600_v38, %v660_v14  ;;  %v781_v29 = vsel %vm670_vm1, %v660_v14, %v600_v38  ;;  %v602_v58 = vrot.slane %v171_v63, 1  ;;  %v662_v59 = vrot.slane %v173_v0, 1  ;;  %v3711_v38 = vld [vmem:[#allocation2 + $0x18] sm:$0xff] }
  0x93   :  { %v3677_v5 = vadd.f32 %v719_v11, %v526_v9  ;;  %v362_v46 = vsel %vm309_vm0, %v239_v48, %v299_v49  ;;  %v241_v47 = vrot.slane %v175_v41, 7  ;;  %v301_v22 = vrot.slane %v177_v53, 7 }
  0x94   :  { %v422_v23 = vsel %vm309_vm0, %v299_v49, %v239_v48  ;;  %v3683_v8 = vadd.f32 %v721_v24, %v530_v10  ;;  %v3685_v43 = vadd.f32 %v781_v29, %v532_v20  ;;  %v243_v42 = vrot.slane %v179_v21, 7 }
  0x95   :  { %997 = vrot.lane.b32.xlu1 %v3608_v27, %s2986_s2  ;;  %7804 = vst [vmem:[#allocation61_spill] sm:$0xff] %v3677_v5  ;;  %v303_v18 = vrot.slane %v181_v37, 7  ;;  %v536_v2 = vadd.f32 %v362_v46, %v173_v0  ;;  %v783_v25 = vsel %vm670_vm1, %v662_v59, %v602_v58  ;;  %v183_v35 = vmul.f32 %v3301_v57, %v3157_v54 }
  0x96   :  { %995 = vrot.lane.b32.xlu0 %v3618_v62, %s2986_s2  ;;  %7805 = vst [vmem:[#allocation62_spill] sm:$0xff] %v3683_v8  ;;  %7806 = vst [vmem:[#allocation63_spill] sm:$0xff] %v3685_v43  ;;  %v185_v3 = vmul.f32 %v3303_v60, %v3159_v55  ;;  %v534_v26 = vadd.f32 %v422_v23, %v171_v63  ;;  %v604_v33 = vrot.slane %v175_v41, 1  ;;  %v664_v6 = vrot.slane %v177_v53, 1 }
  0x97   :  { %v364_v44 = vsel %vm309_vm0, %v241_v47, %v301_v22  ;;  %v723_v0 = vsel %vm670_vm1, %v602_v58, %v662_v59  ;;  %v424_v56 = vsel %vm309_vm0, %v301_v22, %v241_v47  ;;  %v606_v9 = vrot.slane %v179_v21, 1  ;;  %v3737_v47 = vld [vmem:[#allocation2 + $0x28] sm:$0xff]  ;;  %v3739_v22 = vld [vmem:[#allocation2 + $0x38] sm:$0xff] }
  0x98   :  { %v666_v54 = vrot.slane %v181_v37, 1  ;;  %v366_v55 = vsel %vm309_vm0, %v243_v42, %v303_v18  ;;  %v3707_v57 = vadd.f32 %v783_v25, %v536_v2  ;;  %v540_v60 = vadd.f32 %v364_v44, %v177_v53 }
  0x99   :  { %1001 = vrot.lane.b32.xlu1 %v3623_v51, %s2986_s2  ;;  %v245_v63 = vrot.slane %v183_v35, 7  ;;  %v305_v13 = vrot.slane %v185_v3, 7  ;;  %v3715_v14 = vadd.f32 %v723_v0, %v534_v26  ;;  %v538_v19 = vadd.f32 %v424_v56, %v175_v41 }
  0x9a   :  { %999 = vrot.lane.b32.xlu0 %v3637_v45, %s2986_s2  ;;  %7807 = vst [vmem:[#allocation64_spill] sm:$0xff] %v3707_v57  ;;  %v785_v48 = vsel %vm670_vm1, %v664_v6, %v604_v33  ;;  %v725_v49 = vsel %vm670_vm1, %v604_v33, %v664_v6  ;;  %v426_v53 = vsel %vm309_vm0, %v303_v18, %v243_v42  ;;  %v608_v20 = vrot.slane %v183_v35, 1  ;;  %v3915_v45 = vld [vmem:[#allocation5 + $0x28] sm:$0xff] }
  0x9b   :  { %7808 = vst [vmem:[#allocation65_spill] sm:$0xff] %v3715_v14  ;;  %v544_v11 = vadd.f32 %v366_v55, %v181_v37  ;;  %v787_v10 = vsel %vm670_vm1, %v666_v54, %v606_v9  ;;  %v668_v24 = vrot.slane %v185_v3, 1  ;;  %v188_v29 = vrot.slane %v3709_v15, 7  ;;  %v3767_v55 = vld [vmem:[#allocation2 + $0x58] sm:$0xff] }
  0x9c   :  { %v248_v58 = vrot.slane %v3711_v38, 7  ;;  %v3729_v41 = vadd.f32 %v785_v48, %v540_v60  ;;  %v368_v59 = vsel %vm309_vm0, %v245_v63, %v305_v13  ;;  %v3735_v37 = vadd.f32 %v725_v49, %v538_v19 }
  0x9d   :  { %1005 = vrot.lane.b32.xlu1 %v3645_v4, %s2986_s2  ;;  %v542_v46 = vadd.f32 %v426_v53, %v179_v21  ;;  %v727_v23 = vsel %vm670_vm1, %v606_v9, %v666_v54  ;;  %v3743_v42 = vadd.f32 %v787_v10, %v544_v11  ;;  %v428_v18 = vsel %vm309_vm0, %v305_v13, %v245_v63  ;;  %v3765_v54 = vld [vmem:[#allocation2 + $0x48] sm:$0xff] }
  0x9e   :  { %1003 = vrot.lane.b32.xlu0 %v3643_v50, %s2986_s2  ;;  %7809 = vst [vmem:[#allocation66_spill] sm:$0xff] %v3729_v41  ;;  %7810 = vst [vmem:[#allocation67_spill] sm:$0xff] %v3735_v37  ;;  %v548_v2 = vadd.f32 %v368_v59, %v185_v3  ;;  %v789_v25 = vsel %vm670_vm1, %v668_v24, %v608_v20  ;;  %v371_v26 = vsel %vm309_vm0, %v248_v58, %v188_v29 }
  0x9f   :  { %7811 = vst [vmem:[#allocation68_spill] sm:$0xff] %v3743_v42  ;;  %v551_v21 = vrot.slane %v3709_v15, 1  ;;  %v611_v33 = vrot.slane %v3711_v38, 1  ;;  %v311_v6 = vsel %vm309_vm0, %v188_v29, %v248_v58  ;;  %v190_v44 = vrot.slane %v3737_v47, 7  ;;  %v3791_v29 = vld [vmem:[#allocation2 + $0x78] sm:$0xff] }
  0xa0   :  { %v250_v3 = vrot.slane %v3739_v22, 7  ;;  %v3761_v0 = vadd.f32 %v727_v23, %v542_v46  ;;  %v546_v56 = vadd.f32 %v428_v18, %v183_v35  ;;  %v729_v9 = vsel %vm670_vm1, %v608_v20, %v668_v24  ;;  %v3789_v24 = vld [vmem:[#allocation2 + $0x68] sm:$0xff] }
  0xa1   :  { %1009 = vrot.lane.b32.xlu1 %v3663_v36, %s2986_s2  ;;  %v3769_v60 = vadd.f32 %v789_v25, %v548_v2  ;;  %v431_v63 = vadd.f32 %v371_v26, %v3709_v15  ;;  %v433_v13 = vadd.f32 %v311_v6, %v3711_v38  ;;  %v672_v19 = vsel %vm670_vm1, %v551_v21, %v611_v33  ;;  %v3812_v6 = vld [vmem:[#allocation2 + $0x98] sm:$0xff] }
  0xa2   :  { %1007 = vrot.lane.b32.xlu0 %v3677_v5, %s2986_s2  ;;  %7812 = vst [vmem:[#allocation69_spill] sm:$0xff] %v3761_v0  ;;  %v553_v35 = vrot.slane %v3737_v47, 1  ;;  %v613_v48 = vrot.slane %v3739_v22, 1  ;;  %v313_v49 = vsel %vm309_vm0, %v190_v44, %v250_v3  ;;  %v3783_v53 = vadd.f32 %v729_v9, %v546_v56  ;;  %v3879_v5 = vld [vmem:[#allocation5 + $0x18] sm:$0xff] }
  0xa3   :  { %7813 = vst [vmem:[#allocation70_spill] sm:$0xff] %v3769_v60  ;;  %v732_v11 = vsel %vm670_vm1, %v611_v33, %v551_v21  ;;  %v192_v10 = vrot.slane %v3765_v54, 7  ;;  %v252_v20 = vrot.slane %v3767_v55, 7  ;;  %v373_v59 = vsel %vm309_vm0, %v250_v3, %v190_v44  ;;  %v3810_v33 = vld [vmem:[#allocation2 + $0x88] sm:$0xff] }
  0xa4   :  { %7814 = vst [vmem:[#allocation71_spill] sm:$0xff] %v3783_v53  ;;  %v3799_v23 = vadd.f32 %v672_v19, %v431_v63  ;;  %v437_v18 = vadd.f32 %v313_v49, %v3739_v22  ;;  %v3804_v2 = vadd.f32 %v732_v11, %v433_v13  ;;  %v734_v25 = vsel %vm670_vm1, %v613_v48, %v553_v35 }
  0xa5   :  { %1013 = vrot.lane.b32.xlu1 %v3685_v43, %s2986_s2  ;;  %v194_v26 = vrot.slane %v3789_v24, 7  ;;  %v254_v21 = vrot.slane %v3791_v29, 7  ;;  %v435_v44 = vadd.f32 %v373_v59, %v3737_v47  ;;  %v555_v3 = vrot.slane %v3765_v54, 1  ;;  %v3877_v43 = vld [vmem:[#allocation5 + $0x8] sm:$0xff] }
  0xa6   :  { %1011 = vrot.lane.b32.xlu0 %v3683_v8, %s2986_s2  ;;  %7817 = vst [vmem:[#allocation74_spill] sm:$0xff] %v3804_v2  ;;  %v615_v56 = vrot.slane %v3767_v55, 1  ;;  %v315_v9 = vsel %vm309_vm0, %v192_v10, %v252_v20  ;;  %v674_v13 = vsel %vm670_vm1, %v553_v35, %v613_v48  ;;  %v375_v19 = vsel %vm309_vm0, %v252_v20, %v192_v10 }
  0xa7   :  { %v3829_v11 = vadd.f32 %v734_v25, %v437_v18  ;;  %v196_v59 = vrot.slane %v3810_v33, 7  ;;  %v617_v35 = vrot.slane %v3791_v29, 1  ;;  %v317_v48 = vsel %vm309_vm0, %v194_v26, %v254_v21  ;;  %v3847_v25 = vld [vmem:[#allocation2 + $0xa8] sm:$0xff] }
  0xa8   :  { %v3842_v10 = vadd.f32 %v674_v13, %v435_v44  ;;  %v439_v20 = vadd.f32 %v375_v19, %v3765_v54  ;;  %v736_v18 = vsel %vm670_vm1, %v615_v56, %v555_v3  ;;  %v445_v44 = vadd.f32 %v317_v48, %v3791_v29 }
  0xa9   :  { %1017 = vrot.lane.b32.xlu1 %v3707_v57, %s2986_s2  ;;  %7820 = vst [vmem:[#allocation77_spill] sm:$0xff] %v3829_v11  ;;  %v559_v13 = vrot.slane %v3810_v33, 1  ;;  %v619_v19 = vrot.slane %v3812_v6, 1 }
  0xaa   :  { %1015 = vrot.lane.b32.xlu0 %v3715_v14, %s2986_s2 }
  0xab   :  { %v680_v27 = vsel %vm670_vm1, %v559_v13, %v619_v19 }
  0xad   :  { %1021 = vrot.lane.b32.xlu1 %v3729_v41, %s2986_s2  ;;  %v377_v41 = vsel %vm309_vm0, %v254_v21, %v194_v26  ;;  %v198_v26 = vrot.slane %v3847_v25, 7 }
  0xae   :  { %1019 = vrot.lane.b32.xlu0 %v3735_v37, %s2986_s2  ;;  %v676_v37 = vsel %vm670_vm1, %v555_v3, %v615_v56  ;;  %v443_v48 = vadd.f32 %v377_v41, %v3789_v24  ;;  %v740_v41 = vsel %vm670_vm1, %v619_v19, %v559_v13  ;;  %v563_v13 = vrot.slane %v3877_v43, 1 }
  0xaf   :  { %v3874_v56 = vadd.f32 %v676_v37, %v439_v20  ;;  %v561_v20 = vrot.slane %v3847_v25, 1  ;;  %v623_v19 = vrot.slane %v3879_v5, 1 }
  0xb1   :  { %1025 = vrot.lane.b32.xlu1 %v3743_v42, %s2986_s2  ;;  %v557_v42 = vrot.slane %v3789_v24, 1  ;;  %7824 = vst [vmem:[#allocation81_spill] sm:$0xff] %v3874_v56 }
  0xb2   :  { %1023 = vrot.lane.b32.xlu0 %v3761_v0, %s2986_s2 }
  0xb3   :  { %v3793_v58 = vpop.permute.xlu1 %915  ;;  %v738_v3 = vsel %vm670_vm1, %v617_v35, %v557_v42 }
  0xb4   :  { %7815 = vst [vmem:[#allocation72_spill] sm:$0xff] %v3793_v58  ;;  %v3797_v46 = vpop.permute.xlu0 %911  ;;  %v3890_v37 = vadd.f32 %v738_v3, %v445_v44  ;;  %v3989_v58 = vld [vmem:[#allocation5 + $0x88] sm:$0xff] }
  0xb5   :  { %7816 = vst [vmem:[#allocation73_spill] sm:$0xff] %v3797_v46  ;;  %1029 = vrot.lane.b32.xlu1 %v3769_v60, %s2986_s2  ;;  %v441_v60 = vadd.f32 %v315_v9, %v3767_v55  ;;  %v3849_v9 = vld [vmem:[#allocation2 + $0xb8] sm:$0xff]  ;;  %v208_v46 = vrot.slane %v3989_v58, 7  ;;  %v571_v40 = vrot.slane %v3989_v58, 1 }
  0xb6   :  { %1027 = vrot.lane.b32.xlu0 %v3783_v53, %s2986_s2  ;;  %v256_v53 = vrot.slane %v3812_v6, 7  ;;  %v258_v21 = vrot.slane %v3849_v9, 7  ;;  %7827 = vst [vmem:[#allocation84_spill] sm:$0xff] %v3890_v37  ;;  %v621_v51 = vrot.slane %v3849_v9, 1 }
  0xb7   :  { %v3821_v63 = vpop.permute.xlu1 %917  ;;  %v3866_v8 = vadd.f32 %v736_v18, %v441_v60  ;;  %v678_v18 = vsel %vm670_vm1, %v557_v42, %v617_v35 }
  0xb8   :  { %7818 = vst [vmem:[#allocation75_spill] sm:$0xff] %v3821_v63  ;;  %v3827_v49 = vpop.permute.xlu0 %913  ;;  %v319_v14 = vsel %vm309_vm0, %v196_v59, %v256_v53  ;;  %v379_v36 = vsel %vm309_vm0, %v256_v53, %v196_v59  ;;  %v381_v42 = vsel %vm309_vm0, %v258_v21, %v198_v26  ;;  %v200_v53 = vrot.slane %v3877_v43, 7 }
  0xb9   :  { %7819 = vst [vmem:[#allocation76_spill] sm:$0xff] %v3827_v49  ;;  %1033 = vrot.lane.b32.xlu1 %v3804_v2, %s2986_s2  ;;  %7823 = vst [vmem:[#allocation80_spill] sm:$0xff] %v3866_v8  ;;  %v449_v4 = vadd.f32 %v319_v14, %v3812_v6  ;;  %v321_v14 = vsel %vm309_vm0, %v198_v26, %v258_v21  ;;  %v260_v59 = vrot.slane %v3879_v5, 7  ;;  %v3917_v26 = vld [vmem:[#allocation5 + $0x38] sm:$0xff] }
  0xba   :  { %1031 = vrot.lane.b32.xlu0 %v3799_v23, %s2986_s2  ;;  %v3906_v35 = vadd.f32 %v678_v18, %v443_v48  ;;  %v447_v44 = vadd.f32 %v379_v36, %v3810_v33  ;;  %v682_v48 = vsel %vm670_vm1, %v561_v20, %v621_v51  ;;  %v453_v36 = vadd.f32 %v321_v14, %v3849_v9 }
  0xbb   :  { %v3851_v0 = vpop.permute.xlu1 %921  ;;  %v3913_v62 = vadd.f32 %v740_v41, %v449_v4  ;;  %v742_v18 = vsel %vm670_vm1, %v621_v51, %v561_v20  ;;  %v383_v4 = vsel %vm309_vm0, %v260_v59, %v200_v53  ;;  %v323_v41 = vsel %vm309_vm0, %v200_v53, %v260_v59 }
  0xbc   :  { %7821 = vst [vmem:[#allocation78_spill] sm:$0xff] %v3851_v0  ;;  %v3857_v57 = vpop.permute.xlu0 %919  ;;  %7828 = vst [vmem:[#allocation85_spill] sm:$0xff] %v3906_v35  ;;  %v202_v51 = vrot.slane %v3915_v45, 7  ;;  %v262_v20 = vrot.slane %v3917_v26, 7  ;;  %v3951_v53 = vadd.f32 %v742_v18, %v453_v36  ;;  %v455_v59 = vadd.f32 %v383_v4, %v3877_v43  ;;  %v3965_v36 = vld [vmem:[#allocation5 + $0x78] sm:$0xff] }
  0xbd   :  { %7822 = vst [vmem:[#allocation79_spill] sm:$0xff] %v3857_v57  ;;  %1037 = vrot.lane.b32.xlu1 %v3829_v11, %s2986_s2  ;;  %7830 = vst [vmem:[#allocation87_spill] sm:$0xff] %v3913_v62  ;;  %v266_v0 = vrot.slane %v3965_v36, 7  ;;  %v629_v16 = vrot.slane %v3965_v36, 1 }
  0xbe   :  { %1035 = vrot.lane.b32.xlu0 %v3842_v10, %s2986_s2  ;;  %7836 = vst [vmem:[#allocation93_spill] sm:$0xff] %v3951_v53  ;;  %v385_v18 = vsel %vm309_vm0, %v262_v20, %v202_v51  ;;  %v325_v4 = vsel %vm309_vm0, %v202_v51, %v262_v20 }
  0xbf   :  { %v3881_v60 = vpop.permute.xlu1 %925  ;;  %v459_v51 = vadd.f32 %v385_v18, %v3915_v45  ;;  %v461_v20 = vadd.f32 %v325_v4, %v3917_v26 }
  0xc0   :  { %7825 = vst [vmem:[#allocation82_spill] sm:$0xff] %v3881_v60  ;;  %v3888_v50 = vpop.permute.xlu0 %923 }
  0xc1   :  { %7826 = vst [vmem:[#allocation83_spill] sm:$0xff] %v3888_v50  ;;  %1041 = vrot.lane.b32.xlu1 %v3866_v8, %s2986_s2  ;;  %v451_v50 = vadd.f32 %v381_v42, %v3847_v25  ;;  %v3937_v42 = vadd.f32 %v680_v27, %v447_v44  ;;  %v457_v27 = vadd.f32 %v323_v41, %v3879_v5 }
  0xc2   :  { %1039 = vrot.lane.b32.xlu0 %v3874_v56, %s2986_s2  ;;  %v684_v44 = vsel %vm670_vm1, %v563_v13, %v623_v19 }
  0xc3   :  { %v3909_v3 = vpop.permute.xlu1 %929  ;;  %7832 = vst [vmem:[#allocation89_spill] sm:$0xff] %v3937_v42  ;;  %v3949_v60 = vadd.f32 %v682_v48, %v451_v50  ;;  %v625_v50 = vrot.slane %v3917_v26, 1  ;;  %v3963_v48 = vld [vmem:[#allocation5 + $0x68] sm:$0xff] }
  0xc4   :  { %7829 = vst [vmem:[#allocation86_spill] sm:$0xff] %v3909_v3  ;;  %v3919_v21 = vpop.permute.xlu0 %927  ;;  %v569_v4 = vrot.slane %v3963_v48, 1 }
  0xc5   :  { %7831 = vst [vmem:[#allocation88_spill] sm:$0xff] %v3919_v21  ;;  %1045 = vrot.lane.b32.xlu1 %v3890_v37, %s2986_s2  ;;  %v3943_v21 = vld [vmem:[#allocation5 + $0x48] sm:$0xff]  ;;  %v3945_v37 = vld [vmem:[#allocation5 + $0x58] sm:$0xff]  ;;  %7835 = vst [vmem:[#allocation92_spill] sm:$0xff] %v3949_v60 }
  0xc6   :  { %1043 = vrot.lane.b32.xlu0 %v3906_v35, %s2986_s2  ;;  %v565_v35 = vrot.slane %v3915_v45, 1  ;;  %v204_v41 = vrot.slane %v3943_v21, 7  ;;  %v690_v28 = vsel %vm670_vm1, %v569_v4, %v629_v16 }
  0xc7   :  { %v3941_v14 = vpop.permute.xlu1 %933 }
  0xc8   :  { %7833 = vst [vmem:[#allocation90_spill] sm:$0xff] %v3941_v14  ;;  %v3947_v3 = vpop.permute.xlu0 %931  ;;  %v744_v14 = vsel %vm670_vm1, %v623_v19, %v563_v13  ;;  %v264_v13 = vrot.slane %v3945_v37, 7 }
  0xc9   :  { %7834 = vst [vmem:[#allocation91_spill] sm:$0xff] %v3947_v3  ;;  %1049 = vrot.lane.b32.xlu1 %v3913_v62, %s2986_s2  ;;  %v206_v3 = vrot.slane %v3963_v48, 7  ;;  %v3985_v57 = vadd.f32 %v744_v14, %v457_v27 }
  0xca   :  { %1047 = vrot.lane.b32.xlu0 %v3937_v42, %s2986_s2  ;;  %v3983_v42 = vadd.f32 %v684_v44, %v455_v59  ;;  %v627_v59 = vrot.slane %v3945_v37, 1  ;;  %v327_v14 = vsel %vm309_vm0, %v204_v41, %v264_v13  ;;  %v686_v44 = vsel %vm670_vm1, %v565_v35, %v625_v50 }
  0xcb   :  { %v3975_v19 = vpop.permute.xlu1 %937  ;;  %7840 = vst [vmem:[#allocation97_spill] sm:$0xff] %v3985_v57  ;;  %v387_v18 = vsel %vm309_vm0, %v264_v13, %v204_v41  ;;  %v329_v63 = vsel %vm309_vm0, %v206_v3, %v266_v0  ;;  %v4020_v41 = vld [vmem:[#allocation5 + $0xa8] sm:$0xff]  ;;  %v4022_v13 = vld [vmem:[#allocation5 + $0xb8] sm:$0xff] }
  0xcc   :  { %7837 = vst [vmem:[#allocation94_spill] sm:$0xff] %v3975_v19  ;;  %v3977_v62 = vpop.permute.xlu0 %935  ;;  %7839 = vst [vmem:[#allocation96_spill] sm:$0xff] %v3983_v42  ;;  %v3991_v19 = vld [vmem:[#allocation5 + $0x98] sm:$0xff]  ;;  %v469_v12 = vadd.f32 %v329_v63, %v3965_v36  ;;  %v116_v63 = vmul.f32 %v3709_v15, %v3709_v15 }
  0xcd   :  { %7838 = vst [vmem:[#allocation95_spill] sm:$0xff] %v3977_v62  ;;  %1053 = vrot.lane.b32.xlu1 %v3951_v53, %s2986_s2  ;;  %v746_v62 = vsel %vm670_vm1, %v625_v50, %v565_v35  ;;  %v567_v53 = vrot.slane %v3943_v21, 1  ;;  %v268_v49 = vrot.slane %v3991_v19, 7  ;;  %v465_v50 = vadd.f32 %v327_v14, %v3945_v37 }
  0xce   :  { %1051 = vrot.lane.b32.xlu0 %v3949_v60, %s2986_s2  ;;  %v4017_v35 = vadd.f32 %v746_v62, %v461_v20  ;;  %v389_v14 = vsel %vm309_vm0, %v266_v0, %v206_v3  ;;  %v118_v3 = vmul.f32 %v3711_v38, %v3711_v38 }
  0xcf   :  { %v4001_v27 = vpop.permute.xlu1 %941  ;;  %v688_v8 = vsel %vm670_vm1, %v567_v53, %v627_v59  ;;  %v748_v62 = vsel %vm670_vm1, %v627_v59, %v567_v53  ;;  %v331_v39 = vsel %vm309_vm0, %v208_v46, %v268_v49  ;;  %v210_v53 = vrot.slane %v4020_v41, 7 }
  0xd0   :  { %7841 = vst [vmem:[#allocation98_spill] sm:$0xff] %v4001_v27  ;;  %v4008_v60 = vpop.permute.xlu0 %939  ;;  %7843 = vst [vmem:[#allocation100_spill] sm:$0xff] %v4017_v35  ;;  %v463_v27 = vadd.f32 %v387_v18, %v3943_v21  ;;  %v750_v18 = vsel %vm670_vm1, %v629_v16, %v569_v4  ;;  %v270_v59 = vrot.slane %v4022_v13, 7  ;;  %v4050_v0 = vadd.f32 %v748_v62, %v465_v50 }
  0xd1   :  { %7842 = vst [vmem:[#allocation99_spill] sm:$0xff] %v4008_v60  ;;  %1057 = vrot.lane.b32.xlu1 %v3985_v57, %s2986_s2  ;;  %v4026_v60 = vadd.f32 %v686_v44, %v459_v51  ;;  %v631_v51 = vrot.slane %v3991_v19, 1  ;;  %v4065_v50 = vadd.f32 %v750_v18, %v469_v12  ;;  %v391_v62 = vsel %vm309_vm0, %v268_v49, %v208_v46 }
  0xd2   :  { %1055 = vrot.lane.b32.xlu0 %v3983_v42, %s2986_s2  ;;  %7846 = vst [vmem:[#allocation103_spill] sm:$0xff] %v4050_v0  ;;  %v633_v16 = vrot.slane %v4022_v13, 1  ;;  %v333_v12 = vsel %vm309_vm0, %v210_v53, %v270_v59  ;;  %v212_v46 = vrot.slane %v116_v63, 7  ;;  %v120_v49 = vmul.f32 %v3737_v47, %v3737_v47 }
  0xd3   :  { %v4033_v20 = vpop.permute.xlu1 %945  ;;  %7849 = vst [vmem:[#allocation106_spill] sm:$0xff] %v4065_v50  ;;  %v752_v57 = vsel %vm670_vm1, %v631_v51, %v571_v40  ;;  %v122_v4 = vmul.f32 %v3739_v22, %v3739_v22  ;;  %v471_v18 = vadd.f32 %v391_v62, %v3989_v58  ;;  %v635_v62 = vrot.slane %v118_v3, 1 }
  0xd4   :  { %7844 = vst [vmem:[#allocation101_spill] sm:$0xff] %v4033_v20  ;;  %v4040_v44 = vpop.permute.xlu0 %943  ;;  %v4058_v20 = vadd.f32 %v688_v8, %v463_v27  ;;  %v393_v8 = vsel %vm309_vm0, %v270_v59, %v210_v53  ;;  %v573_v27 = vrot.slane %v4020_v41, 1  ;;  %v692_v53 = vsel %vm670_vm1, %v571_v40, %v631_v51 }
  0xd5   :  { %7845 = vst [vmem:[#allocation102_spill] sm:$0xff] %v4040_v44  ;;  %1061 = vrot.lane.b32.xlu1 %v4017_v35, %s2986_s2  ;;  %v467_v44 = vadd.f32 %v389_v14, %v3963_v48  ;;  %v473_v35 = vadd.f32 %v331_v39, %v3991_v19  ;;  %v272_v39 = vrot.slane %v118_v3, 7  ;;  %v274_v51 = vrot.slane %v122_v4, 7 }
  0xd6   :  { %1059 = vrot.lane.b32.xlu0 %v4026_v60, %s2986_s2  ;;  %7847 = vst [vmem:[#allocation104_spill] sm:$0xff] %v4058_v20 }
  0xd7   :  { %v4063_v56 = vpop.permute.xlu1 %949  ;;  %v4088_v14 = vadd.f32 %v690_v28, %v467_v44  ;;  %v4095_v59 = vadd.f32 %v752_v57, %v473_v35  ;;  %v754_v28 = vsel %vm670_vm1, %v633_v16, %v573_v27  ;;  %v575_v44 = vrot.slane %v116_v63, 1 }
  0xd8   :  { %7848 = vst [vmem:[#allocation105_spill] sm:$0xff] %v4063_v56  ;;  %v4072_v2 = vpop.permute.xlu0 %947  ;;  %v475_v56 = vadd.f32 %v393_v8, %v4020_v41  ;;  %v395_v40 = vsel %vm309_vm0, %v272_v39, %v212_v46  ;;  %v335_v57 = vsel %vm309_vm0, %v212_v46, %v272_v39  ;;  %v214_v35 = vrot.slane %v120_v49, 7 }
  0xd9   :  { %7850 = vst [vmem:[#allocation107_spill] sm:$0xff] %v4072_v2  ;;  %1065 = vrot.lane.b32.xlu1 %v4050_v0, %s2986_s2  ;;  %7851 = vst [vmem:[#allocation108_spill] sm:$0xff] %v4088_v14  ;;  %v477_v0 = vadd.f32 %v333_v12, %v4022_v13  ;;  %v4113_v8 = vadd.f32 %v692_v53, %v471_v18  ;;  %v479_v39 = vadd.f32 %v395_v40, %v116_v63 }
  0xda   :  { %1063 = vrot.lane.b32.xlu0 %v4058_v20, %s2986_s2  ;;  %7853 = vst [vmem:[#allocation110_spill] sm:$0xff] %v4095_v59  ;;  %v694_v20 = vsel %vm670_vm1, %v573_v27, %v633_v16  ;;  %v124_v27 = vmul.f32 %v3765_v54, %v3765_v54  ;;  %v126_v16 = vmul.f32 %v3767_v55, %v3767_v55 }
  0xdb   :  { %v4091_v2 = vpop.permute.xlu1 %953  ;;  %7855 = vst [vmem:[#allocation112_spill] sm:$0xff] %v4113_v8  ;;  %v481_v18 = vadd.f32 %v335_v57, %v118_v3  ;;  %v756_v53 = vsel %vm670_vm1, %v635_v62, %v575_v44  ;;  %v128_v3 = vmul.f32 %v3789_v24, %v3789_v24  ;;  %v4147_v40 = vmul.f32 %v3810_v33, %v3810_v33 }
  0xdc   :  { %7852 = vst [vmem:[#allocation109_spill] sm:$0xff] %v4091_v2  ;;  %v4099_v11 = vpop.permute.xlu0 %951  ;;  %v696_v2 = vsel %vm670_vm1, %v575_v44, %v635_v62  ;;  %v216_v63 = vrot.slane %v124_v27, 7  ;;  %v130_v44 = vmul.f32 %v3791_v29, %v3791_v29  ;;  %v4151_v57 = vmul.f32 %v3812_v6, %v3812_v6 }
  0xdd   :  { %7854 = vst [vmem:[#allocation111_spill] sm:$0xff] %v4099_v11  ;;  %1069 = vrot.lane.b32.xlu1 %v4065_v50, %s2986_s2  ;;  %v4121_v11 = vadd.f32 %v694_v20, %v475_v56  ;;  %v4123_v50 = vadd.f32 %v754_v28, %v477_v0  ;;  %v577_v56 = vrot.slane %v120_v49, 1  ;;  %v637_v20 = vrot.slane %v122_v4, 1 }
  0xde   :  { %1067 = vrot.lane.b32.xlu0 %v4088_v14, %s2986_s2  ;;  %v337_v0 = vsel %vm309_vm0, %v214_v35, %v274_v51  ;;  %v276_v28 = vrot.slane %v126_v16, 7  ;;  %v639_v7 = vrot.slane %v126_v16, 1 }
  0xdf   :  { %v4119_v12 = vpop.permute.xlu1 %957  ;;  %7857 = vst [vmem:[#allocation114_spill] sm:$0xff] %v4121_v11  ;;  %7858 = vst [vmem:[#allocation115_spill] sm:$0xff] %v4123_v50  ;;  %v485_v14 = vadd.f32 %v337_v0, %v122_v4  ;;  %v220_v4 = vrot.slane %v4147_v40, 7 }
  0xe0   :  { %7856 = vst [vmem:[#allocation113_spill] sm:$0xff] %v4119_v12  ;;  %v4125_v46 = vpop.permute.xlu0 %955  ;;  %v397_v12 = vsel %vm309_vm0, %v274_v51, %v214_v35  ;;  %v4155_v51 = vadd.f32 %v696_v2, %v479_v39  ;;  %v339_v2 = vsel %vm309_vm0, %v216_v63, %v276_v28  ;;  %v218_v39 = vrot.slane %v128_v3, 7 }
  0xe1   :  { %7859 = vst [vmem:[#allocation116_spill] sm:$0xff] %v4125_v46  ;;  %1073 = vrot.lane.b32.xlu1 %v4095_v59, %s2986_s2  ;;  %v4157_v59 = vadd.f32 %v756_v53, %v481_v18  ;;  %v483_v46 = vadd.f32 %v397_v12, %v120_v49  ;;  %v278_v49 = vrot.slane %v130_v44, 7  ;;  %v399_v18 = vsel %vm309_vm0, %v276_v28, %v216_v63 }
  0xe2   :  { %1071 = vrot.lane.b32.xlu0 %v4113_v8, %s2986_s2  ;;  %7862 = vst [vmem:[#allocation119_spill] sm:$0xff] %v4155_v51  ;;  %v579_v8 = vrot.slane %v124_v27, 1  ;;  %v280_v53 = vrot.slane %v4151_v57, 7 }
  0xe3   :  { %v4143_v62 = vpop.permute.xlu1 %961  ;;  %7863 = vst [vmem:[#allocation120_spill] sm:$0xff] %v4157_v59  ;;  %v341_v52 = vsel %vm309_vm0, %v218_v39, %v278_v49 }
  0xe4   :  { %7860 = vst [vmem:[#allocation117_spill] sm:$0xff] %v4143_v62  ;;  %v4153_v35 = vpop.permute.xlu0 %959  ;;  %v698_v62 = vsel %vm670_vm1, %v577_v56, %v637_v20  ;;  %v700_v28 = vsel %vm670_vm1, %v579_v8, %v639_v7 }
  0xe5   :  { %7861 = vst [vmem:[#allocation118_spill] sm:$0xff] %v4153_v35  ;;  %1077 = vrot.lane.b32.xlu1 %v4123_v50, %s2986_s2  ;;  %v758_v35 = vsel %vm670_vm1, %v637_v20, %v577_v56  ;;  %v4181_v56 = vmul.f32 %v3847_v25, %v3847_v25  ;;  %v4185_v20 = vmul.f32 %v3849_v9, %v3849_v9  ;;  %v641_v50 = vrot.slane %v130_v44, 1 }
  0xe6   :  { %1075 = vrot.lane.b32.xlu0 %v4121_v11, %s2986_s2  ;;  %v4177_v11 = vadd.f32 %v698_v62, %v483_v46  ;;  %v4189_v63 = vadd.f32 %v758_v35, %v485_v14  ;;  %v760_v46 = vsel %vm670_vm1, %v639_v7, %v579_v8  ;;  %v487_v62 = vadd.f32 %v399_v18, %v124_v27 }
  0xe7   :  { %v4169_v12 = vpop.permute.xlu1 %965  ;;  %v401_v14 = vsel %vm309_vm0, %v278_v49, %v218_v39  ;;  %v583_v35 = vrot.slane %v4147_v40, 1  ;;  %v343_v7 = vsel %vm309_vm0, %v220_v4, %v280_v53  ;;  %v222_v27 = vrot.slane %v4181_v56, 7 }
  0xe8   :  { %7864 = vst [vmem:[#allocation121_spill] sm:$0xff] %v4169_v12  ;;  %v4175_v0 = vpop.permute.xlu0 %963  ;;  %7866 = vst [vmem:[#allocation123_spill] sm:$0xff] %v4177_v11  ;;  %v489_v12 = vadd.f32 %v339_v2, %v126_v16  ;;  %v643_v16 = vrot.slane %v4151_v57, 1  ;;  %v282_v2 = vrot.slane %v4185_v20, 7  ;;  %v140_v18 = vmul.f32 %v3877_v43, %v3877_v43 }
  0xe9   :  { %7865 = vst [vmem:[#allocation122_spill] sm:$0xff] %v4175_v0  ;;  %1081 = vrot.lane.b32.xlu1 %v4157_v59, %s2986_s2  ;;  %7867 = vst [vmem:[#allocation124_spill] sm:$0xff] %v4189_v63  ;;  %v581_v0 = vrot.slane %v128_v3, 1  ;;  %v493_v49 = vadd.f32 %v341_v52, %v130_v44  ;;  %v491_v59 = vadd.f32 %v401_v14, %v128_v3  ;;  %v585_v52 = vrot.slane %v4181_v56, 1 }
  0xea   :  { %1079 = vrot.lane.b32.xlu0 %v4155_v51, %s2986_s2  ;;  %v4217_v39 = vadd.f32 %v760_v46, %v489_v12  ;;  %v497_v12 = vadd.f32 %v343_v7, %v4151_v57  ;;  %v645_v44 = vrot.slane %v4185_v20, 1  ;;  %v764_v3 = vsel %vm670_vm1, %v643_v16, %v583_v35 }
  0xeb   :  { %v4199_v32 = vpop.permute.xlu1 %969  ;;  %v702_v51 = vsel %vm670_vm1, %v581_v0, %v641_v50  ;;  %v762_v31 = vsel %vm670_vm1, %v641_v50, %v581_v0  ;;  %v345_v46 = vsel %vm309_vm0, %v222_v27, %v282_v2  ;;  %v224_v50 = vrot.slane %v140_v18, 7 }
  0xec   :  { %7868 = vst [vmem:[#allocation125_spill] sm:$0xff] %v4199_v32  ;;  %v4207_v8 = vpop.permute.xlu0 %967  ;;  %v142_v32 = vmul.f32 %v3879_v5, %v3879_v5  ;;  %7870 = vst [vmem:[#allocation127_spill] sm:$0xff] %v4217_v39  ;;  %v144_v57 = vmul.f32 %v3915_v45, %v3915_v45  ;;  %v704_v7 = vsel %vm670_vm1, %v583_v35, %v643_v16 }
  0xed   :  { %7869 = vst [vmem:[#allocation126_spill] sm:$0xff] %v4207_v8  ;;  %1085 = vrot.lane.b32.xlu1 %v4189_v63, %s2986_s2  ;;  %v4221_v8 = vadd.f32 %v700_v28, %v487_v62  ;;  %v403_v63 = vsel %vm309_vm0, %v280_v53, %v220_v4  ;;  %v4242_v4 = vadd.f32 %v762_v31, %v493_v49 }
  0xee   :  { %1083 = vrot.lane.b32.xlu0 %v4177_v11, %s2986_s2  ;;  %v284_v0 = vrot.slane %v142_v32, 7  ;;  %v146_v53 = vmul.f32 %v3917_v26, %v3917_v26  ;;  %v4250_v62 = vadd.f32 %v702_v51, %v491_v59  ;;  %v495_v14 = vadd.f32 %v403_v63, %v4147_v40 }
  0xef   :  { %7871 = vst [vmem:[#allocation128_spill] sm:$0xff] %v4221_v8  ;;  %v4227_v42 = vpop.permute.xlu1 %973  ;;  %7874 = vst [vmem:[#allocation131_spill] sm:$0xff] %v4242_v4  ;;  %v4257_v31 = vadd.f32 %v764_v3, %v497_v12  ;;  %v405_v49 = vsel %vm309_vm0, %v282_v2, %v222_v27  ;;  %v587_v40 = vrot.slane %v140_v18, 1  ;;  %v647_v51 = vrot.slane %v142_v32, 1 }
  0xf0   :  { %7872 = vst [vmem:[#allocation129_spill] sm:$0xff] %v4227_v42  ;;  %v4234_v28 = vpop.permute.xlu0 %971  ;;  %7875 = vst [vmem:[#allocation132_spill] sm:$0xff] %v4250_v62  ;;  %v501_v42 = vadd.f32 %v345_v46, %v4185_v20  ;;  %v407_v59 = vsel %vm309_vm0, %v284_v0, %v224_v50  ;;  %v347_v63 = vsel %vm309_vm0, %v224_v50, %v284_v0  ;;  %v226_v35 = vrot.slane %v144_v57, 7 }
  0xf1   :  { %7873 = vst [vmem:[#allocation130_spill] sm:$0xff] %v4234_v28  ;;  %1089 = vrot.lane.b32.xlu1 %v4217_v39, %s2986_s2  ;;  %7877 = vst [vmem:[#allocation134_spill] sm:$0xff] %v4257_v31  ;;  %v766_v39 = vsel %vm670_vm1, %v645_v44, %v585_v52  ;;  %v286_v16 = vrot.slane %v146_v53, 7  ;;  %v148_v20 = vmul.f32 %v3943_v21, %v3943_v21 }
  0xf2   :  { %1087 = vrot.lane.b32.xlu0 %v4221_v8, %s2986_s2  ;;  %v150_v27 = vmul.f32 %v3945_v37, %v3945_v37  ;;  %v4278_v2 = vadd.f32 %v704_v7, %v495_v14  ;;  %v499_v12 = vadd.f32 %v405_v49, %v4181_v56  ;;  %v706_v46 = vsel %vm670_vm1, %v585_v52, %v645_v44 }
  0xf3   :  { %v4255_v28 = vpop.permute.xlu1 %977  ;;  %v4285_v50 = vadd.f32 %v766_v39, %v501_v42  ;;  %v503_v0 = vadd.f32 %v407_v59, %v140_v18  ;;  %v768_v14 = vsel %vm670_vm1, %v647_v51, %v587_v40  ;;  %v589_v7 = vrot.slane %v144_v57, 1 }
  0xf4   :  { %7876 = vst [vmem:[#allocation133_spill] sm:$0xff] %v4255_v28  ;;  %v4264_v8 = vpop.permute.xlu0 %975  ;;  %7879 = vst [vmem:[#allocation136_spill] sm:$0xff] %v4278_v2  ;;  %v708_v28 = vsel %vm670_vm1, %v587_v40, %v647_v51  ;;  %v409_v56 = vsel %vm309_vm0, %v286_v16, %v226_v35  ;;  %v349_v42 = vsel %vm309_vm0, %v226_v35, %v286_v16  ;;  %v288_v18 = vrot.slane %v150_v27, 7 }
  0xf5   :  { %7878 = vst [vmem:[#allocation135_spill] sm:$0xff] %v4264_v8  ;;  %1093 = vrot.lane.b32.xlu1 %v4242_v4, %s2986_s2  ;;  %7881 = vst [vmem:[#allocation138_spill] sm:$0xff] %v4285_v50  ;;  %v505_v8 = vadd.f32 %v347_v63, %v142_v32  ;;  %v228_v32 = vrot.slane %v148_v20, 7  ;;  %v4301_v39 = vadd.f32 %v706_v46, %v499_v12  ;;  %v591_v16 = vrot.slane %v148_v20, 1 }
  0xf6   :  { %1091 = vrot.lane.b32.xlu0 %v4250_v62, %s2986_s2  ;;  %v649_v62 = vrot.slane %v146_v53, 1  ;;  %v152_v52 = vmul.f32 %v3963_v48, %v3963_v48  ;;  %v154_v44 = vmul.f32 %v3965_v36, %v3965_v36  ;;  %v4309_v59 = vadd.f32 %v708_v28, %v503_v0 }
  0xf7   :  { %v4281_v3 = vpop.permute.xlu1 %981  ;;  %7883 = vst [vmem:[#allocation140_spill] sm:$0xff] %v4301_v39  ;;  %v4311_v40 = vadd.f32 %v768_v14, %v505_v8  ;;  %v507_v63 = vadd.f32 %v409_v56, %v144_v57  ;;  %v509_v35 = vadd.f32 %v349_v42, %v146_v53  ;;  %v411_v28 = vsel %vm309_vm0, %v288_v18, %v228_v32 }
  0xf8   :  { %7880 = vst [vmem:[#allocation137_spill] sm:$0xff] %v4281_v3  ;;  %v4287_v4 = vpop.permute.xlu0 %979  ;;  %7885 = vst [vmem:[#allocation142_spill] sm:$0xff] %v4309_v59  ;;  %v710_v12 = vsel %vm670_vm1, %v589_v7, %v649_v62  ;;  %v770_v46 = vsel %vm670_vm1, %v649_v62, %v589_v7  ;;  %v351_v8 = vsel %vm309_vm0, %v228_v32, %v288_v18  ;;  %v230_v57 = vrot.slane %v152_v52, 7 }
  0xf9   :  { %7882 = vst [vmem:[#allocation139_spill] sm:$0xff] %v4287_v4  ;;  %1097 = vrot.lane.b32.xlu1 %v4257_v31, %s2986_s2  ;;  %7886 = vst [vmem:[#allocation143_spill] sm:$0xff] %v4311_v40  ;;  %v651_v31 = vrot.slane %v150_v27, 1  ;;  %v290_v53 = vrot.slane %v154_v44, 7  ;;  %v156_v0 = vmul.f32 %v3989_v58, %v3989_v58  ;;  %v158_v14 = vmul.f32 %v3991_v19, %v3991_v19  ;;  %v7958_v4 = vld [vmem:[#allocation18_spill] sm:$0xff] }
  0xfa   :  { %1095 = vrot.lane.b32.xlu0 %v4278_v2, %s2986_s2  ;;  %v4335_v62 = vmul.f32 %v4020_v41, %v4020_v41  ;;  %v4339_v7 = vmul.f32 %v4022_v13, %v4022_v13  ;;  %v4343_v32 = vadd.f32 %v710_v12, %v507_v63  ;;  %v4345_v18 = vadd.f32 %v770_v46, %v509_v35 }
  0xfb   :  { %v4307_v49 = vpop.permute.xlu1 %985  ;;  %v653_v2 = vrot.slane %v154_v44, 1  ;;  %v413_v63 = vsel %vm309_vm0, %v290_v53, %v230_v57  ;;  %v232_v35 = vrot.slane %v156_v0, 7  ;;  %v292_v12 = vrot.slane %v158_v14, 7 }
  0xfc   :  { %7884 = vst [vmem:[#allocation141_spill] sm:$0xff] %v4307_v49  ;;  %v4313_v51 = vpop.permute.xlu0 %983  ;;  %7890 = vst [vmem:[#allocation147_spill] sm:$0xff] %v4343_v32  ;;  %v593_v49 = vrot.slane %v152_v52, 1 }
  0xfd   :  { %7887 = vst [vmem:[#allocation144_spill] sm:$0xff] %v4313_v51  ;;  %1101 = vrot.lane.b32.xlu1 %v4285_v50, %s2986_s2  ;;  %7891 = vst [vmem:[#allocation148_spill] sm:$0xff] %v4345_v18  ;;  %v712_v51 = vsel %vm670_vm1, %v591_v16, %v651_v31  ;;  %v772_v50 = vsel %vm670_vm1, %v651_v31, %v591_v16 }
  0xfe   :  { %1099 = vrot.lane.b32.xlu0 %v4301_v39, %s2986_s2  ;;  %v511_v39 = vadd.f32 %v411_v28, %v148_v20  ;;  %v353_v20 = vsel %vm309_vm0, %v230_v57, %v290_v53  ;;  %v294_v28 = vrot.slane %v4339_v7, 7  ;;  %v515_v53 = vadd.f32 %v413_v63, %v152_v52 }
  0xff   :  { %v4331_v56 = vpop.permute.xlu1 %989  ;;  %v597_v52 = vrot.slane %v4335_v62, 1  ;;  %v168_v63 = vmul.f32 %v3915_v45, %v3737_v47 }
 0x100   :  { %7888 = vst [vmem:[#allocation145_spill] sm:$0xff] %v4331_v56  ;;  %v4341_v42 = vpop.permute.xlu0 %987  ;;  %v513_v56 = vadd.f32 %v351_v8, %v150_v27  ;;  %v234_v27 = vrot.slane %v4335_v62, 7  ;;  %v4365_v16 = vadd.f32 %v712_v51, %v511_v39  ;;  %v4369_v8 = vmul.f32 %v3877_v43, %v3709_v15 }
 0x101   :  { %7889 = vst [vmem:[#allocation146_spill] sm:$0xff] %v4341_v42  ;;  %1105 = vrot.lane.b32.xlu1 %v4311_v40, %s2986_s2  ;;  %v4373_v42 = vmul.f32 %v3879_v5, %v3711_v38  ;;  %v774_v43 = vsel %vm670_vm1, %v653_v2, %v593_v49  ;;  %v595_v15 = vrot.slane %v156_v0, 1  ;;  %v655_v39 = vrot.slane %v158_v14, 1 }
 0x102   :  { %1103 = vrot.lane.b32.xlu0 %v4309_v59, %s2986_s2  ;;  %7894 = vst [vmem:[#allocation151_spill] sm:$0xff] %v4365_v16  ;;  %v4377_v57 = vadd.f32 %v772_v50, %v513_v56  ;;  %v355_v5 = vsel %vm309_vm0, %v232_v35, %v292_v12  ;;  %v415_v50 = vsel %vm309_vm0, %v292_v12, %v232_v35 }
 0x103   :  { %v4359_v46 = vpop.permute.xlu1 %993  ;;  %v357_v51 = vsel %vm309_vm0, %v234_v27, %v294_v28  ;;  %v521_v12 = vadd.f32 %v355_v5, %v158_v14  ;;  %v716_v3 = vsel %vm670_vm1, %v595_v15, %v655_v39  ;;  %v776_v45 = vsel %vm670_vm1, %v655_v39, %v595_v15 }
 0x104   :  { %7892 = vst [vmem:[#allocation149_spill] sm:$0xff] %v4359_v46  ;;  %v4363_v31 = vpop.permute.xlu0 %991  ;;  %v714_v46 = vsel %vm670_vm1, %v593_v49, %v653_v2  ;;  %v236_v2 = vrot.slane %v4369_v8, 7  ;;  %v296_v49 = vrot.slane %v4373_v42, 7  ;;  %v599_v14 = vrot.slane %v4369_v8, 1 }
 0x105   :  { %7893 = vst [vmem:[#allocation150_spill] sm:$0xff] %v4363_v31  ;;  %1109 = vrot.lane.b32.xlu1 %v4345_v18, %s2986_s2  ;;  %v517_v31 = vadd.f32 %v353_v20, %v154_v44  ;;  %v657_v44 = vrot.slane %v4339_v7, 1  ;;  %v170_v20 = vmul.f32 %v3917_v26, %v3739_v22  ;;  %v417_v22 = vsel %vm309_vm0, %v294_v28, %v234_v27 }
 0x106   :  { %1107 = vrot.lane.b32.xlu0 %v4343_v32, %s2986_s2  ;;  %v525_v26 = vadd.f32 %v357_v51, %v4339_v7  ;;  %v4430_v27 = vadd.f32 %v776_v45, %v521_v12  ;;  %v172_v7 = vmul.f32 %v3943_v21, %v3765_v54  ;;  %v174_v28 = vmul.f32 %v3945_v37, %v3767_v55 }
 0x107   :  { %v4387_v38 = vpop.permute.xlu1 %997  ;;  %v4405_v35 = vadd.f32 %v774_v43, %v517_v31  ;;  %v659_v31 = vrot.slane %v4373_v42, 1  ;;  %v238_v43 = vrot.slane %v168_v63, 7  ;;  %v298_v15 = vrot.slane %v170_v20, 7 }
 0x108   :  { %7895 = vst [vmem:[#allocation152_spill] sm:$0xff] %v4387_v38  ;;  %v4395_v56 = vpop.permute.xlu0 %995  ;;  %v519_v38 = vadd.f32 %v415_v50, %v156_v0  ;;  %v778_v0 = vsel %vm670_vm1, %v657_v44, %v597_v52  ;;  %7901 = vst [vmem:[#allocation158_spill] sm:$0xff] %v4430_v27  ;;  %v523_v5 = vadd.f32 %v417_v22, %v4335_v62  ;;  %v601_v62 = vrot.slane %v168_v63, 1 }
 0x109   :  { %7896 = vst [vmem:[#allocation153_spill] sm:$0xff] %v4395_v56  ;;  %1113 = vrot.lane.b32.xlu1 %v4377_v57, %s2986_s2  ;;  %7897 = vst [vmem:[#allocation154_spill] sm:$0xff] %v4405_v35  ;;  %v4409_v56 = vadd.f32 %v714_v46, %v515_v53  ;;  %v359_v53 = vsel %vm309_vm0, %v236_v2, %v296_v49  ;;  %v718_v50 = vsel %vm670_vm1, %v597_v52, %v657_v44 }
 0x10a   :  { %1111 = vrot.lane.b32.xlu0 %v4365_v16, %s2986_s2  ;;  %v4438_v39 = vadd.f32 %v716_v3, %v519_v38  ;;  %v4445_v12 = vadd.f32 %v778_v0, %v525_v26  ;;  %v419_v54 = vsel %vm309_vm0, %v296_v49, %v236_v2  ;;  %v529_v21 = vadd.f32 %v359_v53, %v4373_v42 }
 0x10b   :  { %7898 = vst [vmem:[#allocation155_spill] sm:$0xff] %v4409_v56  ;;  %v4415_v47 = vpop.permute.xlu1 %1001  ;;  %v780_v55 = vsel %vm670_vm1, %v659_v31, %v599_v14  ;;  %v421_v3 = vsel %vm309_vm0, %v298_v15, %v238_v43  ;;  %v661_v38 = vrot.slane %v170_v20, 1  ;;  %v361_v52 = vsel %vm309_vm0, %v238_v43, %v298_v15 }
 0x10c   :  { %7899 = vst [vmem:[#allocation156_spill] sm:$0xff] %v4415_v47  ;;  %v4422_v46 = vpop.permute.xlu0 %999  ;;  %7902 = vst [vmem:[#allocation159_spill] sm:$0xff] %v4438_v39  ;;  %v240_v44 = vrot.slane %v172_v7, 7  ;;  %v300_v2 = vrot.slane %v174_v28, 7  ;;  %v176_v42 = vmul.f32 %v3963_v48, %v3789_v24  ;;  %v178_v49 = vmul.f32 %v3965_v36, %v3791_v29 }
 0x10d   :  { %7900 = vst [vmem:[#allocation157_spill] sm:$0xff] %v4422_v46  ;;  %1117 = vrot.lane.b32.xlu1 %v4405_v35, %s2986_s2  ;;  %7904 = vst [vmem:[#allocation161_spill] sm:$0xff] %v4445_v12  ;;  %v4466_v45 = vadd.f32 %v718_v50, %v523_v5  ;;  %v527_v22 = vadd.f32 %v419_v54, %v4369_v8  ;;  %v720_v0 = vsel %vm670_vm1, %v599_v14, %v659_v31  ;;  %v7952_v35 = vld [vmem:[#allocation119_spill] sm:$0xff] }
 0x10e   :  { %1115 = vrot.lane.b32.xlu0 %v4409_v56, %s2986_s2  ;;  %v4473_v53 = vadd.f32 %v780_v55, %v529_v21  ;;  %v531_v43 = vadd.f32 %v421_v3, %v168_v63  ;;  %v533_v15 = vadd.f32 %v361_v52, %v170_v20  ;;  %v722_v29 = vsel %vm670_vm1, %v601_v62, %v661_v38 }
 0x10f   :  { %v4443_v51 = vpop.permute.xlu1 %1005  ;;  %7906 = vst [vmem:[#allocation163_spill] sm:$0xff] %v4466_v45  ;;  %v782_v48 = vsel %vm670_vm1, %v661_v38, %v601_v62  ;;  %v603_v36 = vrot.slane %v172_v7, 1  ;;  %v663_v5 = vrot.slane %v174_v28, 1  ;;  %v423_v8 = vsel %vm309_vm0, %v300_v2, %v240_v44 }
 0x110   :  { %7903 = vst [vmem:[#allocation160_spill] sm:$0xff] %v4443_v51  ;;  %v4452_v37 = vpop.permute.xlu0 %1003  ;;  %7908 = vst [vmem:[#allocation165_spill] sm:$0xff] %v4473_v53  ;;  %v363_v63 = vsel %vm309_vm0, %v240_v44, %v300_v2  ;;  %v242_v20 = vrot.slane %v176_v42, 7  ;;  %v302_v14 = vrot.slane %v178_v49, 7  ;;  %v4489_v31 = vadd.f32 %v720_v0, %v527_v22  ;;  %v7949_v51 = vld [vmem:[#allocation100_spill] sm:$0xff] }
 0x111   :  { %7905 = vst [vmem:[#allocation162_spill] sm:$0xff] %v4452_v37  ;;  %1121 = vrot.lane.b32.xlu1 %v4430_v27, %s2986_s2  ;;  %v180_v50 = vmul.f32 %v3989_v58, %v3810_v33  ;;  %v182_v54 = vmul.f32 %v3991_v19, %v3812_v6  ;;  %v4497_v55 = vadd.f32 %v722_v29, %v531_v43  ;;  %v605_v33 = vrot.slane %v176_v42, 1  ;;  %v7948_v27 = vld [vmem:[#allocation104_spill] sm:$0xff] }
 0x112   :  { %1119 = vrot.lane.b32.xlu0 %v4438_v39, %s2986_s2  ;;  %7910 = vst [vmem:[#allocation167_spill] sm:$0xff] %v4489_v31  ;;  %v4499_v3 = vadd.f32 %v782_v48, %v533_v15  ;;  %v535_v38 = vadd.f32 %v423_v8, %v172_v7  ;;  %v724_v52 = vsel %vm670_vm1, %v603_v36, %v663_v5  ;;  %v665_v6 = vrot.slane %v178_v49, 1  ;;  %v7957_v39 = vld [vmem:[#allocation28_spill] sm:$0xff] }
 0x113   :  { %v4469_v26 = vpop.permute.xlu1 %1009  ;;  %7912 = vst [vmem:[#allocation169_spill] sm:$0xff] %v4497_v55  ;;  %v537_v44 = vadd.f32 %v363_v63, %v174_v28  ;;  %v784_v2 = vsel %vm670_vm1, %v663_v5, %v603_v36  ;;  %v425_v58 = vsel %vm309_vm0, %v302_v14, %v242_v20  ;;  %v365_v19 = vsel %vm309_vm0, %v242_v20, %v302_v14 }
 0x114   :  { %7907 = vst [vmem:[#allocation164_spill] sm:$0xff] %v4469_v26  ;;  %v4475_v24 = vpop.permute.xlu0 %1007  ;;  %7913 = vst [vmem:[#allocation170_spill] sm:$0xff] %v4499_v3  ;;  %v244_v7 = vrot.slane %v180_v50, 7  ;;  %v304_v22 = vrot.slane %v182_v54, 7  ;;  %v184_v28 = vmul.f32 %v4020_v41, %v3847_v25  ;;  %v186_v0 = vmul.f32 %v4022_v13, %v3849_v9 }
 0x115   :  { %7909 = vst [vmem:[#allocation166_spill] sm:$0xff] %v4475_v24  ;;  %1125 = vrot.lane.b32.xlu1 %v4445_v12, %s2986_s2  ;;  %v4523_v29 = vadd.f32 %v724_v52, %v535_v38  ;;  %v4525_v48 = vadd.f32 %v784_v2, %v537_v44  ;;  %v539_v36 = vadd.f32 %v425_v58, %v176_v42  ;;  %v607_v25 = vrot.slane %v180_v50, 1  ;;  %v7945_v24 = vld [vmem:[#allocation81_spill] sm:$0xff] }
 0x116   :  { %1123 = vrot.lane.b32.xlu0 %v4466_v45, %s2986_s2  ;;  %v726_v5 = vsel %vm670_vm1, %v605_v33, %v665_v6  ;;  %v541_v8 = vadd.f32 %v365_v19, %v178_v49  ;;  %v667_v41 = vrot.slane %v182_v54, 1  ;;  %v786_v9 = vsel %vm670_vm1, %v665_v6, %v605_v33  ;;  %v7944_v45 = vld [vmem:[#allocation97_spill] sm:$0xff] }
 0x117   :  { %v4495_v21 = vpop.permute.xlu1 %1013  ;;  %7917 = vst [vmem:[#allocation174_spill] sm:$0xff] %v4523_v29  ;;  %7918 = vst [vmem:[#allocation175_spill] sm:$0xff] %v4525_v48  ;;  %v367_v13 = vsel %vm309_vm0, %v244_v7, %v304_v22  ;;  %v246_v63 = vrot.slane %v184_v28, 7  ;;  %v306_v42 = vrot.slane %v186_v0, 7  ;;  %v427_v14 = vsel %vm309_vm0, %v304_v22, %v244_v7 }
 0x118   :  { %7911 = vst [vmem:[#allocation168_spill] sm:$0xff] %v4495_v21  ;;  %v4501_v62 = vpop.permute.xlu0 %1011  ;;  %v4545_v49 = vadd.f32 %v726_v5, %v539_v36  ;;  %v4547_v52 = vadd.f32 %v786_v9, %v541_v8  ;;  %v545_v44 = vadd.f32 %v367_v13, %v182_v54  ;;  %v788_v2 = vsel %vm670_vm1, %v667_v41, %v607_v25 }
 0x119   :  { %7914 = vst [vmem:[#allocation171_spill] sm:$0xff] %v4501_v62  ;;  %1129 = vrot.lane.b32.xlu1 %v4473_v53, %s2986_s2  ;;  %v543_v58 = vadd.f32 %v427_v14, %v180_v50  ;;  %v609_v33 = vrot.slane %v184_v28, 1  ;;  %v669_v6 = vrot.slane %v186_v0, 1  ;;  %v369_v19 = vsel %vm309_vm0, %v246_v63, %v306_v42  ;;  %v7943_v62 = vld [vmem:[#allocation74_spill] sm:$0xff] }
 0x11a   :  { %1127 = vrot.lane.b32.xlu0 %v4489_v31, %s2986_s2  ;;  %7921 = vst [vmem:[#allocation178_spill] sm:$0xff] %v4545_v49  ;;  %7922 = vst [vmem:[#allocation179_spill] sm:$0xff] %v4547_v52  ;;  %v728_v22 = vsel %vm670_vm1, %v607_v25, %v667_v41  ;;  %v429_v54 = vsel %vm309_vm0, %v306_v42, %v246_v63  ;;  %v4565_v5 = vadd.f32 %v788_v2, %v545_v44 }
 0x11b   :  { %v4519_v43 = vpop.permute.xlu1 %1017  ;;  %v549_v50 = vadd.f32 %v369_v19, %v186_v0  ;;  %v4569_v8 = vadd.f32 %v728_v22, %v543_v58  ;;  %v547_v9 = vadd.f32 %v429_v54, %v184_v28  ;;  %v790_v25 = vsel %vm670_vm1, %v669_v6, %v609_v33 }
 0x11c   :  { %7915 = vst [vmem:[#allocation172_spill] sm:$0xff] %v4519_v43  ;;  %v4521_v15 = vpop.permute.xlu0 %1015  ;;  %7925 = vst [vmem:[#allocation182_spill] sm:$0xff] %v4565_v5  ;;  %v730_v13 = vsel %vm670_vm1, %v609_v33, %v669_v6 }
 0x11d   :  { %7916 = vst [vmem:[#allocation173_spill] sm:$0xff] %v4521_v15  ;;  %1133 = vrot.lane.b32.xlu1 %v4499_v3, %s2986_s2  ;;  %7926 = vst [vmem:[#allocation183_spill] sm:$0xff] %v4569_v8  ;;  %v4581_v0 = vadd.f32 %v790_v25, %v549_v50  ;;  %v4585_v42 = vadd.f32 %v730_v13, %v547_v9  ;;  %v7931_v50 = vld [vmem:[#allocation96_spill] sm:$0xff]  ;;  %v7942_v15 = vld [vmem:[#allocation77_spill] sm:$0xff] }
 0x11e   :  { %1131 = vrot.lane.b32.xlu0 %v4497_v55, %s2986_s2  ;;  %v7932_v13 = vld [vmem:[#allocation16_spill] sm:$0xff]  ;;  %v7940_v55 = vld [vmem:[#allocation50_spill] sm:$0xff] }
 0x11f   :  { %v4537_v20 = vpop.permute.xlu1 %1021  ;;  %7929 = vst [vmem:[#allocation186_spill] sm:$0xff] %v4581_v0  ;;  %7930 = vst [vmem:[#allocation187_spill] sm:$0xff] %v4585_v42  ;;  %v7941_v3 = vld [vmem:[#allocation48_spill] sm:$0xff] }
 0x120   :  { %7919 = vst [vmem:[#allocation176_spill] sm:$0xff] %v4537_v20  ;;  %v4541_v38 = vpop.permute.xlu0 %1019  ;;  %v7939_v20 = vld [vmem:[#allocation37_spill] sm:$0xff] }
 0x121   :  { %7920 = vst [vmem:[#allocation177_spill] sm:$0xff] %v4541_v38  ;;  %1137 = vrot.lane.b32.xlu1 %v4525_v48, %s2986_s2  ;;  %v7938_v38 = vld [vmem:[#allocation39_spill] sm:$0xff] }
 0x122   :  { %1135 = vrot.lane.b32.xlu0 %v4523_v29, %s2986_s2 }
 0x123   :  { %v4555_v7 = vpop.permute.xlu1 %1025 }
 0x124   :  { %7923 = vst [vmem:[#allocation180_spill] sm:$0xff] %v4555_v7  ;;  %v4561_v36 = vpop.permute.xlu0 %1023 }
 0x125   :  { %7924 = vst [vmem:[#allocation181_spill] sm:$0xff] %v4561_v36  ;;  %1141 = vrot.lane.b32.xlu1 %v4547_v52, %s2986_s2  ;;  %v7936_v52 = vld [vmem:[#allocation29_spill] sm:$0xff] }
 0x126   :  { %1139 = vrot.lane.b32.xlu0 %v4545_v49, %s2986_s2  ;;  %v7937_v49 = vld [vmem:[#allocation27_spill] sm:$0xff] }
 0x127   :  { %v4573_v41 = vpop.permute.xlu1 %1029 }
 0x128   :  { %7927 = vst [vmem:[#allocation184_spill] sm:$0xff] %v4573_v41  ;;  %v4577_v63 = vpop.permute.xlu0 %1027  ;;  %v7935_v41 = vld [vmem:[#allocation19_spill] sm:$0xff] }
 0x129   :  { %7928 = vst [vmem:[#allocation185_spill] sm:$0xff] %v4577_v63  ;;  %1145 = vrot.lane.b32.xlu1 %v4565_v5, %s2986_s2  ;;  %v7934_v63 = vld [vmem:[#allocation26_spill] sm:$0xff] }
 0x12a   :  { %1143 = vrot.lane.b32.xlu0 %v4569_v8, %s2986_s2 }
 0x12b   :  { %v4587_v28 = vpop.permute.xlu1 %1033 }
 0x12c   :  { %v4589_v14 = vpop.permute.xlu0 %1031 }
 0x12d   :  { %1149 = vrot.lane.b32.xlu1 %v4581_v0, %s2986_s2 }
 0x12e   :  { %1147 = vrot.lane.b32.xlu0 %v4585_v42, %s2986_s2 }
 0x12f   :  { %v4595_v44 = vpop.permute.xlu1 %1037 }
 0x130   :  { %v4597_v2 = vpop.permute.xlu0 %1035 }
 0x131   :  { %1398 = vrot.lane.b32.xlu1 %v3116_v30, %s2987_s25 }
 0x132   :  { %1394 = vrot.lane.b32.xlu0 %v3122_v34, %s2987_s25 }
 0x133   :  { %v4603_v58 = vpop.permute.xlu1 %1041 }
 0x134   :  { %v4605_v33 = vpop.permute.xlu0 %1039 }
 0x135   :  { %1422 = vrot.lane.b32.xlu1 %v3307_v61, %s2987_s25 }
 0x136   :  { %1418 = vrot.lane.b32.xlu0 %v3270_v17, %s2987_s25 }
 0x137   :  { %v4611_v6 = vpop.permute.xlu1 %1045 }
 0x138   :  { %v4613_v19 = vpop.permute.xlu0 %1043 }
 0x139   :  { %1518 = vrot.lane.b32.xlu1 %v3842_v10, %s2987_s25 }
 0x13a   :  { %1514 = vrot.lane.b32.xlu0 %v3799_v23, %s2987_s25 }
 0x13b   :  { %v4619_v22 = vpop.permute.xlu1 %1049 }
 0x13c   :  { %v4621_v54 = vpop.permute.xlu0 %1047 }
 0x13d   :  { %1542 = vrot.lane.b32.xlu1 %v4026_v60, %s2987_s25 }
 0x13e   :  { %1538 = vrot.lane.b32.xlu0 %v7931_v50, %s2987_s25 }
 0x13f   :  { %v4627_v9 = vpop.permute.xlu1 %1053 }
 0x140   :  { %v4629_v25 = vpop.permute.xlu0 %1051 }
 0x141   :  { %1400 = vrot.lane.b32.xlu1 %v7932_v13, %s2987_s25 }
 0x142   :  { %1396 = vrot.lane.b32.xlu0 %v7933_v1, %s2987_s25 }
 0x143   :  { %v4635_v42 = vpop.permute.xlu1 %1057 }
 0x144   :  { %v4637_v0 = vpop.permute.xlu0 %1055 }
 0x145   :  { %1420 = vrot.lane.b32.xlu1 %v7934_v63, %s2987_s25 }
 0x146   :  { %1402 = vrot.lane.b32.xlu0 %v7935_v41, %s2987_s25 }
 0x147   :  { %v4643_v8 = vpop.permute.xlu1 %1061 }
 0x148   :  { %v4645_v5 = vpop.permute.xlu0 %1059 }
 0x149   :  { %1426 = vrot.lane.b32.xlu1 %v7936_v52, %s2987_s25 }
 0x14a   :  { %1424 = vrot.lane.b32.xlu0 %v7937_v49, %s2987_s25 }
 0x14b   :  { %v4651_v36 = vpop.permute.xlu1 %1065 }
 0x14c   :  { %v4653_v7 = vpop.permute.xlu0 %1063 }
 0x14d   :  { %1446 = vrot.lane.b32.xlu1 %v7938_v38, %s2987_s25 }
 0x14e   :  { %1442 = vrot.lane.b32.xlu0 %v7939_v20, %s2987_s25 }
 0x14f   :  { %v4659_v29 = vpop.permute.xlu1 %1069 }
 0x150   :  { %v4661_v48 = vpop.permute.xlu0 %1067 }
 0x151   :  { %1470 = vrot.lane.b32.xlu1 %v7940_v55, %s2987_s25 }
 0x152   :  { %1466 = vrot.lane.b32.xlu0 %v7941_v3, %s2987_s25 }
 0x153   :  { %v4667_v31 = vpop.permute.xlu1 %1073 }
 0x154   :  { %v4669_v43 = vpop.permute.xlu0 %1071 }
 0x155   :  { %1520 = vrot.lane.b32.xlu1 %v7942_v15, %s2987_s25 }
 0x156   :  { %1516 = vrot.lane.b32.xlu0 %v7943_v62, %s2987_s25 }
 0x157   :  { %v4675_v53 = vpop.permute.xlu1 %1077 }
 0x158   :  { %v4677_v21 = vpop.permute.xlu0 %1075 }
 0x159   :  { %1540 = vrot.lane.b32.xlu1 %v7944_v45, %s2987_s25 }
 0x15a   :  { %1522 = vrot.lane.b32.xlu0 %v7945_v24, %s2987_s25 }
 0x15b   :  { %v4683_v12 = vpop.permute.xlu1 %1081 }
 0x15c   :  { %7946 = vst [vmem:[#allocation96_spill] sm:$0xff] %v4683_v12  ;;  %v4685_v26 = vpop.permute.xlu0 %1079 }
 0x15d   :  { %7947 = vst [vmem:[#allocation16_spill] sm:$0xff] %v4685_v26  ;;  %1546 = vrot.lane.b32.xlu1 %v7948_v27, %s2987_s25  ;;  %v7997_v26 = vld [vmem:[#allocation75_spill] sm:$0xff] }
 0x15e   :  { %1544 = vrot.lane.b32.xlu0 %v7949_v51, %s2987_s25 }
 0x15f   :  { %v4691_v37 = vpop.permute.xlu1 %1085 }
 0x160   :  { %7950 = vst [vmem:[#allocation17_spill] sm:$0xff] %v4691_v37  ;;  %v4693_v46 = vpop.permute.xlu0 %1083 }
 0x161   :  { %7951 = vst [vmem:[#allocation26_spill] sm:$0xff] %v4693_v46  ;;  %1566 = vrot.lane.b32.xlu1 %v4177_v11, %s2987_s25 }
 0x162   :  { %1562 = vrot.lane.b32.xlu0 %v7952_v35, %s2987_s25  ;;  %v7961_v35 = vld [vmem:[#allocation38_spill] sm:$0xff] }
 0x163   :  { %v4699_v47 = vpop.permute.xlu1 %1089 }
 0x164   :  { %7953 = vst [vmem:[#allocation19_spill] sm:$0xff] %v4699_v47  ;;  %v4701_v55 = vpop.permute.xlu0 %1087  ;;  %v7966_v47 = vld [vmem:[#allocation41_spill] sm:$0xff] }
 0x165   :  { %7954 = vst [vmem:[#allocation29_spill] sm:$0xff] %v4701_v55  ;;  %1590 = vrot.lane.b32.xlu1 %v4343_v32, %s2987_s25  ;;  %v7962_v32 = vld [vmem:[#allocation36_spill] sm:$0xff] }
 0x166   :  { %1586 = vrot.lane.b32.xlu0 %v4309_v59, %s2987_s25 }
 0x167   :  { %v4707_v3 = vpop.permute.xlu1 %1093 }
 0x168   :  { %7955 = vst [vmem:[#allocation27_spill] sm:$0xff] %v4707_v3  ;;  %v4709_v56 = vpop.permute.xlu0 %1091 }
 0x169   :  { %7956 = vst [vmem:[#allocation77_spill] sm:$0xff] %v4709_v56  ;;  %1428 = vrot.lane.b32.xlu1 %v7957_v39, %s2987_s25  ;;  %v7965_v56 = vld [vmem:[#allocation49_spill] sm:$0xff] }
 0x16a   :  { %1404 = vrot.lane.b32.xlu0 %v7958_v4, %s2987_s25 }
 0x16b   :  { %v4715_v11 = vpop.permute.xlu1 %1097 }
 0x16c   :  { %7959 = vst [vmem:[#allocation74_spill] sm:$0xff] %v4715_v11  ;;  %v4717_v38 = vpop.permute.xlu0 %1095 }
 0x16d   :  { %7960 = vst [vmem:[#allocation97_spill] sm:$0xff] %v4717_v38  ;;  %1448 = vrot.lane.b32.xlu1 %v7961_v35, %s2987_s25  ;;  %v7969_v38 = vld [vmem:[#allocation53_spill] sm:$0xff]  ;;  %v7970_v35 = vld [vmem:[#allocation51_spill] sm:$0xff] }
 0x16e   :  { %1444 = vrot.lane.b32.xlu0 %v7962_v32, %s2987_s25 }
 0x16f   :  { %v4723_v59 = vpop.permute.xlu1 %1101 }
 0x170   :  { %7963 = vst [vmem:[#allocation81_spill] sm:$0xff] %v4723_v59  ;;  %v4725_v3 = vpop.permute.xlu0 %1099 }
 0x171   :  { %7964 = vst [vmem:[#allocation104_spill] sm:$0xff] %v4725_v3  ;;  %1468 = vrot.lane.b32.xlu1 %v7965_v56, %s2987_s25  ;;  %v7973_v3 = vld [vmem:[#allocation103_spill] sm:$0xff]  ;;  %v7974_v56 = vld [vmem:[#allocation80_spill] sm:$0xff] }
 0x172   :  { %1450 = vrot.lane.b32.xlu0 %v7966_v47, %s2987_s25 }
 0x173   :  { %v4731_v55 = vpop.permute.xlu1 %1105 }
 0x174   :  { %7967 = vst [vmem:[#allocation100_spill] sm:$0xff] %v4731_v55  ;;  %v4733_v11 = vpop.permute.xlu0 %1103 }
 0x175   :  { %7968 = vst [vmem:[#allocation28_spill] sm:$0xff] %v4733_v11  ;;  %1474 = vrot.lane.b32.xlu1 %v7969_v38, %s2987_s25  ;;  %v7977_v11 = vld [vmem:[#allocation124_spill] sm:$0xff] }
 0x176   :  { %1472 = vrot.lane.b32.xlu0 %v7970_v35, %s2987_s25  ;;  %v7978_v38 = vld [vmem:[#allocation120_spill] sm:$0xff] }
 0x177   :  { %v4739_v20 = vpop.permute.xlu1 %1109 }
 0x178   :  { %7971 = vst [vmem:[#allocation18_spill] sm:$0xff] %v4739_v20  ;;  %v4741_v59 = vpop.permute.xlu0 %1107 }
 0x179   :  { %7972 = vst [vmem:[#allocation188_spill] sm:$0xff] %v4741_v59  ;;  %1548 = vrot.lane.b32.xlu1 %v7973_v3, %s2987_s25  ;;  %v7981_v59 = vld [vmem:[#allocation128_spill] sm:$0xff] }
 0x17a   :  { %1524 = vrot.lane.b32.xlu0 %v7974_v56, %s2987_s25 }
 0x17b   :  { %v4747_v47 = vpop.permute.xlu1 %1113 }
 0x17c   :  { %7975 = vst [vmem:[#allocation103_spill] sm:$0xff] %v4747_v47  ;;  %v4749_v55 = vpop.permute.xlu0 %1111 }
 0x17d   :  { %7976 = vst [vmem:[#allocation80_spill] sm:$0xff] %v4749_v55  ;;  %1568 = vrot.lane.b32.xlu1 %v7977_v11, %s2987_s25 }
 0x17e   :  { %1564 = vrot.lane.b32.xlu0 %v7978_v38, %s2987_s25  ;;  %v7995_v38 = vld [vmem:[#allocation73_spill] sm:$0xff] }
 0x17f   :  { %v4755_v35 = vpop.permute.xlu1 %1117 }
 0x180   :  { %7979 = vst [vmem:[#allocation189_spill] sm:$0xff] %v4755_v35  ;;  %v4757_v20 = vpop.permute.xlu0 %1115  ;;  %v7985_v35 = vlaneseq }
 0x181   :  { %7980 = vst [vmem:[#allocation190_spill] sm:$0xff] %v4757_v20  ;;  %1588 = vrot.lane.b32.xlu1 %v4311_v40, %s2987_s25  ;;  %v7987_v40 = vld [vmem:[#allocation23_spill] sm:$0xff] }
 0x182   :  { %1570 = vrot.lane.b32.xlu0 %v7981_v59, %s2987_s25  ;;  %v4774_v20 = vand.u32 127, %v7985_v35  ;;  %v7992_v35 = vld [vmem:[#allocation31_spill] sm:$0xff] }
 0x183   :  { %v4763_v46 = vpop.permute.xlu1 %1121 }
 0x184   :  { %7982 = vst [vmem:[#allocation191_spill] sm:$0xff] %v4763_v46  ;;  %v4765_v47 = vpop.permute.xlu0 %1119  ;;  %v7988_v46 = vld [vmem:[#allocation21_spill] sm:$0xff]  ;;  %vm1153_vm2 = vcmp.lt.s32.totalorder %v4774_v20, 1  ;;  %vm1634_vm3 = vcmp.lt.s32.totalorder %v4774_v20, 127  ;;  %vm2556_vm5 = vcmp.ge.s32.totalorder %v4774_v20, 1 }
 0x185   :  { %7983 = vst [vmem:[#allocation192_spill] sm:$0xff] %v4765_v47  ;;  %1594 = vrot.lane.b32.xlu1 %v4365_v16, %s2987_s25  ;;  %v1154_v37 = vsel %vm1153_vm2, %v7995_v38, %v4589_v14  ;;  %v1157_v12 = vsel %vm1153_vm2, %v7997_v26, %v4595_v44 }
 0x186   :  { %1592 = vrot.lane.b32.xlu0 %v4345_v18, %s2987_s25  ;;  %v7991_v18 = vld [vmem:[#allocation33_spill] sm:$0xff] }
 0x187   :  { %v4771_v55 = vpop.permute.xlu1 %1125 }
 0x188   :  { %7984 = vst [vmem:[#allocation193_spill] sm:$0xff] %v4771_v55  ;;  %v4776_v11 = vpop.permute.xlu0 %1123  ;;  %v7993_v55 = vld [vmem:[#allocation76_spill] sm:$0xff] }
 0x189   :  { %7986 = vst [vmem:[#allocation194_spill] sm:$0xff] %v4776_v11  ;;  %1410 = vrot.lane.b32.xlu1 %v7987_v40, %s2987_s25  ;;  %v1155_v11 = vsel %vm1153_vm2, %v7993_v55, %v4587_v28 }
 0x18a   :  { %1406 = vrot.lane.b32.xlu0 %v7988_v46, %s2987_s25 }
 0x18b   :  { %v4782_v47 = vpop.permute.xlu1 %1129 }
 0x18c   :  { %7989 = vst [vmem:[#allocation23_spill] sm:$0xff] %v4782_v47  ;;  %v4785_v16 = vpop.permute.xlu0 %1127  ;;  %v1215_v47 = vsel %vm1153_vm2, %v4587_v28, %v7993_v55  ;;  %v1217_v55 = vsel %vm1153_vm2, %v4595_v44, %v7997_v26  ;;  %v7998_v28 = vld [vmem:[#allocation52_spill] sm:$0xff] }
 0x18d   :  { %7990 = vst [vmem:[#allocation21_spill] sm:$0xff] %v4785_v16  ;;  %1434 = vrot.lane.b32.xlu1 %v7991_v18, %s2987_s25  ;;  %v1214_v16 = vsel %vm1153_vm2, %v4589_v14, %v7995_v38  ;;  %v8001_v38 = vld [vmem:[#allocation72_spill] sm:$0xff] }
 0x18e   :  { %1430 = vrot.lane.b32.xlu0 %v7992_v35, %s2987_s25  ;;  %v1156_v14 = vsel %vm1153_vm2, %v8001_v38, %v4597_v2  ;;  %v1216_v18 = vsel %vm1153_vm2, %v4597_v2, %v8001_v38  ;;  %v8002_v26 = vld [vmem:[#allocation40_spill] sm:$0xff]  ;;  %v4838_v44 = vadd.f32 %v1214_v16, %v3122_v34  ;;  %v4855_v34 = vadd.f32 %v1154_v37, %v3799_v23  ;;  %v8008_v23 = vld [vmem:[#allocation82_spill] sm:$0xff] }
 0x18f   :  { %v4799_v59 = vpop.permute.xlu1 %1133  ;;  %v4858_v16 = vadd.f32 %v1217_v55, %v7932_v13  ;;  %v1161_v37 = vsel %vm1153_vm2, %v8008_v23, %v4611_v6  ;;  %v8014_v55 = vld [vmem:[#allocation85_spill] sm:$0xff] }
 0x190   :  { %7994 = vst [vmem:[#allocation31_spill] sm:$0xff] %v4799_v59  ;;  %v4805_v32 = vpop.permute.xlu0 %1131  ;;  %v4825_v59 = vadd.f32 %v1155_v11, %v7943_v62  ;;  %8003 = vst [vmem:[#allocation52_spill] sm:$0xff] %v4838_v44 }
 0x191   :  { %7996 = vst [vmem:[#allocation76_spill] sm:$0xff] %v4805_v32  ;;  %1476 = vrot.lane.b32.xlu1 %v7998_v28, %s2987_s25  ;;  %v4822_v32 = vadd.f32 %v1215_v47, %v7933_v1  ;;  %v8004_v1 = vld [vmem:[#allocation79_spill] sm:$0xff]  ;;  %v8005_v47 = vld [vmem:[#allocation78_spill] sm:$0xff]  ;;  %8006 = vst [vmem:[#allocation72_spill] sm:$0xff] %v4858_v16 }
 0x192   :  { %8000 = vst [vmem:[#allocation75_spill] sm:$0xff] %v4825_v59  ;;  %1452 = vrot.lane.b32.xlu0 %v8002_v26, %s2987_s25  ;;  %v1218_v11 = vsel %vm1153_vm2, %v4605_v33, %v8004_v1  ;;  %v1159_v62 = vsel %vm1153_vm2, %v8005_v47, %v4603_v58  ;;  %v1219_v2 = vsel %vm1153_vm2, %v4603_v58, %v8005_v47  ;;  %v8182_v16 = vld [vmem:[#allocation148_spill] sm:$0xff] }
 0x193   :  { %7999 = vst [vmem:[#allocation73_spill] sm:$0xff] %v4822_v32  ;;  %v4852_v38 = vpop.permute.xlu1 %1137  ;;  %v4861_v59 = vadd.f32 %v1157_v12, %v7942_v15  ;;  %v1158_v32 = vsel %vm1153_vm2, %v8004_v1, %v4605_v33  ;;  %v4870_v58 = vadd.f32 %v1216_v18, %v3116_v30  ;;  %v4873_v47 = vadd.f32 %v1156_v14, %v3842_v10  ;;  %v8009_v15 = vld [vmem:[#allocation89_spill] sm:$0xff]  ;;  %v8013_v18 = vld [vmem:[#allocation83_spill] sm:$0xff] }
 0x194   :  { %v4867_v44 = vpop.permute.xlu0 %1135  ;;  %v1221_v12 = vsel %vm1153_vm2, %v4611_v6, %v8008_v23  ;;  %v4886_v33 = vadd.f32 %v1218_v11, %v7935_v41  ;;  %v4889_v30 = vadd.f32 %v1219_v2, %v7958_v4  ;;  %v4892_v10 = vadd.f32 %v1159_v62, %v7974_v56  ;;  %v8016_v41 = vld [vmem:[#allocation86_spill] sm:$0xff]  ;;  %v8017_v11 = vld [vmem:[#allocation20_spill] sm:$0xff] }
 0x195   :  { %8007 = vst [vmem:[#allocation40_spill] sm:$0xff] %v4861_v59  ;;  %1530 = vrot.lane.b32.xlu1 %v8009_v15, %s2987_s25  ;;  %v1220_v13 = vsel %vm1153_vm2, %v4613_v19, %v8013_v18  ;;  %v4901_v6 = vadd.f32 %v1158_v32, %v7945_v24  ;;  %v1160_v4 = vsel %vm1153_vm2, %v8013_v18, %v4613_v19  ;;  %v8019_v24 = vld [vmem:[#allocation84_spill] sm:$0xff] }
 0x196   :  { %8010 = vst [vmem:[#allocation79_spill] sm:$0xff] %v4886_v33  ;;  %8011 = vst [vmem:[#allocation78_spill] sm:$0xff] %v4889_v30  ;;  %1526 = vrot.lane.b32.xlu0 %v8014_v55, %s2987_s25  ;;  %v1163_v56 = vsel %vm1153_vm2, %v8016_v41, %v4619_v22  ;;  %v1223_v14 = vsel %vm1153_vm2, %v4619_v22, %v8016_v41  ;;  %v4918_v32 = vadd.f32 %v1221_v12, %v8017_v11  ;;  %v8021_v19 = vld [vmem:[#allocation88_spill] sm:$0xff]  ;;  %v8023_v12 = vld [vmem:[#allocation91_spill] sm:$0xff] }
 0x197   :  { %8012 = vst [vmem:[#allocation82_spill] sm:$0xff] %v4892_v10  ;;  %8015 = vst [vmem:[#allocation89_spill] sm:$0xff] %v4901_v6  ;;  %v4915_v1 = vpop.permute.xlu1 %1141  ;;  %v4921_v62 = vadd.f32 %v1161_v37, %v8019_v24  ;;  %v1162_v2 = vsel %vm1153_vm2, %v8021_v19, %v4621_v54  ;;  %v1222_v23 = vsel %vm1153_vm2, %v4621_v54, %v8021_v19  ;;  %v8024_v41 = vld [vmem:[#allocation90_spill] sm:$0xff]  ;;  %v8025_v19 = vld [vmem:[#allocation112_spill] sm:$0xff] }
 0x198   :  { %8018 = vst [vmem:[#allocation83_spill] sm:$0xff] %v4918_v32  ;;  %v4931_v18 = vpop.permute.xlu0 %1139  ;;  %v4934_v22 = vadd.f32 %v1220_v13, %v7988_v46  ;;  %v1224_v37 = vsel %vm1153_vm2, %v4629_v25, %v8023_v12  ;;  %v1225_v54 = vsel %vm1153_vm2, %v4627_v9, %v8024_v41  ;;  %v4951_v46 = vadd.f32 %v1160_v4, %v8014_v55  ;;  %v8027_v13 = vld [vmem:[#allocation22_spill] sm:$0xff]  ;;  %v8031_v6 = vld [vmem:[#allocation108_spill] sm:$0xff]  ;;  %v8112_v33 = vld [vmem:[#allocation39_spill] sm:$0xff] }
 0x199   :  { %8020 = vst [vmem:[#allocation85_spill] sm:$0xff] %v4921_v62  ;;  %v1165_v62 = vsel %vm1153_vm2, %v8024_v41, %v4627_v9  ;;  %1554 = vrot.lane.b32.xlu1 %v8025_v19, %s2987_s25  ;;  %v4954_v32 = vadd.f32 %v1223_v14, %v8027_v13  ;;  %v1164_v30 = vsel %vm1153_vm2, %v8023_v12, %v4629_v25  ;;  %v8034_v4 = vld [vmem:[#allocation94_spill] sm:$0xff]  ;;  %v8035_v12 = vld [vmem:[#allocation25_spill] sm:$0xff] }
 0x19a   :  { %8022 = vst [vmem:[#allocation86_spill] sm:$0xff] %v4934_v22  ;;  %8026 = vst [vmem:[#allocation20_spill] sm:$0xff] %v4951_v46  ;;  %v8029_v22 = vld [vmem:[#allocation87_spill] sm:$0xff]  ;;  %1550 = vrot.lane.b32.xlu0 %v8031_v6, %s2987_s25  ;;  %v4966_v9 = vadd.f32 %v1222_v23, %v7987_v40  ;;  %v4969_v55 = vadd.f32 %v1162_v2, %v8009_v15  ;;  %v1227_v14 = vsel %vm1153_vm2, %v4635_v42, %v8034_v4  ;;  %v8037_v40 = vld [vmem:[#allocation24_spill] sm:$0xff] }
 0x19b   :  { %8028 = vst [vmem:[#allocation84_spill] sm:$0xff] %v4954_v32  ;;  %v4957_v10 = vadd.f32 %v1163_v56, %v8029_v22  ;;  %v1167_v56 = vsel %vm1153_vm2, %v8034_v4, %v4635_v42  ;;  %v4979_v25 = vpop.permute.xlu1 %1145  ;;  %v4982_v41 = vadd.f32 %v1224_v37, %v8035_v12  ;;  %v4985_v23 = vadd.f32 %v1225_v54, %v8037_v40  ;;  %v8039_v15 = vld [vmem:[#allocation93_spill] sm:$0xff]  ;;  %v8044_v54 = vld [vmem:[#allocation98_spill] sm:$0xff] }
 0x19c   :  { %8032 = vst [vmem:[#allocation91_spill] sm:$0xff] %v4966_v9  ;;  %8033 = vst [vmem:[#allocation90_spill] sm:$0xff] %v4969_v55  ;;  %v4988_v2 = vadd.f32 %v1165_v62, %v8039_v15  ;;  %v4994_v55 = vpop.permute.xlu0 %1143  ;;  %v8042_v9 = vld [vmem:[#allocation92_spill] sm:$0xff]  ;;  %v1169_v62 = vsel %vm1153_vm2, %v8044_v54, %v4643_v8  ;;  %v1229_v4 = vsel %vm1153_vm2, %v4643_v8, %v8044_v54  ;;  %v8048_v8 = vld [vmem:[#allocation127_spill] sm:$0xff] }
 0x19d   :  { %8030 = vst [vmem:[#allocation88_spill] sm:$0xff] %v4957_v10  ;;  %8036 = vst [vmem:[#allocation112_spill] sm:$0xff] %v4982_v41  ;;  %v8041_v10 = vld [vmem:[#allocation95_spill] sm:$0xff]  ;;  %v4997_v42 = vadd.f32 %v1164_v30, %v8042_v9  ;;  %1596 = vrot.lane.b32.xlu1 %v4377_v57, %s2987_s25  ;;  %v5014_v30 = vadd.f32 %v1227_v14, %v7934_v63  ;;  %v8049_v63 = vld [vmem:[#allocation102_spill] sm:$0xff] }
 0x19e   :  { %8038 = vst [vmem:[#allocation22_spill] sm:$0xff] %v4985_v23  ;;  %8040 = vst [vmem:[#allocation87_spill] sm:$0xff] %v4988_v2  ;;  %v1226_v32 = vsel %vm1153_vm2, %v4637_v0, %v8041_v10  ;;  %v1166_v37 = vsel %vm1153_vm2, %v8041_v10, %v4637_v0  ;;  %v5017_v2 = vadd.f32 %v1167_v56, %v7944_v45  ;;  %v8047_v0 = vld [vmem:[#allocation99_spill] sm:$0xff]  ;;  %1572 = vrot.lane.b32.xlu0 %v8048_v8, %s2987_s25  ;;  %v8050_v56 = vld [vmem:[#allocation101_spill] sm:$0xff] }
 0x19f   :  { %8043 = vst [vmem:[#allocation108_spill] sm:$0xff] %v4997_v42  ;;  %8045 = vst [vmem:[#allocation94_spill] sm:$0xff] %v5014_v30  ;;  %v1168_v10 = vsel %vm1153_vm2, %v8047_v0, %v4645_v5  ;;  %v1228_v23 = vsel %vm1153_vm2, %v4645_v5, %v8047_v0  ;;  %v5030_v54 = vadd.f32 %v1226_v32, %v3270_v17  ;;  %v5044_v0 = vpop.permute.xlu1 %1149  ;;  %v8110_v30 = vld [vmem:[#allocation124_spill] sm:$0xff] }
 0x1a0   :  { %8046 = vst [vmem:[#allocation25_spill] sm:$0xff] %v5017_v2  ;;  %v1230_v45 = vsel %vm1153_vm2, %v4653_v7, %v8049_v63  ;;  %v1171_v14 = vsel %vm1153_vm2, %v8050_v56, %v4651_v36  ;;  %v1231_v5 = vsel %vm1153_vm2, %v4651_v36, %v8050_v56  ;;  %v5047_v17 = vadd.f32 %v1166_v37, %v7931_v50  ;;  %v5059_v46 = vpop.permute.xlu0 %1147  ;;  %v8053_v50 = vld [vmem:[#allocation105_spill] sm:$0xff] }
 0x1a1   :  { %v5050_v32 = vadd.f32 %v1229_v4, %v7937_v49  ;;  %v5053_v42 = vadd.f32 %v1169_v62, %v7949_v51  ;;  %v1170_v41 = vsel %vm1153_vm2, %v8049_v63, %v4653_v7  ;;  %v5062_v36 = vadd.f32 %v1228_v23, %v3307_v61  ;;  %v8054_v7 = vld [vmem:[#allocation35_spill] sm:$0xff] }
 0x1a2   :  { %v5065_v56 = vadd.f32 %v1168_v10, %v4026_v60  ;;  %v1173_v49 = vsel %vm1153_vm2, %v8053_v50, %v4659_v29  ;;  %v1233_v51 = vsel %vm1153_vm2, %v4659_v29, %v8053_v50  ;;  %1438 = vrot.lane.b32.xlu1 %v8054_v7, %s2987_s25  ;;  %v5078_v37 = vadd.f32 %v1230_v45, %v7936_v52  ;;  %v8058_v23 = vld [vmem:[#allocation107_spill] sm:$0xff]  ;;  %v8060_v52 = vld [vmem:[#allocation109_spill] sm:$0xff]  ;;  %v8067_v50 = vld [vmem:[#allocation116_spill] sm:$0xff] }
 0x1a3   :  { %8051 = vst [vmem:[#allocation24_spill] sm:$0xff] %v5050_v32  ;;  %8052 = vst [vmem:[#allocation95_spill] sm:$0xff] %v5053_v42  ;;  %v5081_v61 = vadd.f32 %v1231_v5, %v7957_v39  ;;  %v5084_v60 = vadd.f32 %v1171_v14, %v7973_v3  ;;  %v1232_v62 = vsel %vm1153_vm2, %v4661_v48, %v8058_v23  ;;  %1414 = vrot.lane.b32.xlu0 %v8035_v12, %s2987_s25  ;;  %v5107_v10 = vpop.permute.xlu1 %1398  ;;  %v8061_v12 = vld [vmem:[#allocation30_spill] sm:$0xff]  ;;  %v8106_v32 = vld [vmem:[#allocation119_spill] sm:$0xff] }
 0x1a4   :  { %8055 = vst [vmem:[#allocation92_spill] sm:$0xff] %v5078_v37  ;;  %v5093_v29 = vadd.f32 %v1170_v41, %v7948_v27  ;;  %v1172_v39 = vsel %vm1153_vm2, %v8058_v23, %v4661_v48  ;;  %v1175_v3 = vsel %vm1153_vm2, %v8060_v52, %v4667_v31  ;;  %v1235_v4 = vsel %vm1153_vm2, %v4667_v31, %v8060_v52  ;;  %v8063_v41 = vld [vmem:[#allocation106_spill] sm:$0xff]  ;;  %v8065_v48 = vld [vmem:[#allocation111_spill] sm:$0xff]  ;;  %v5123_v5 = vpop.permute.xlu0 %1394  ;;  %v8069_v52 = vld [vmem:[#allocation45_spill] sm:$0xff] }
 0x1a5   :  { %8056 = vst [vmem:[#allocation98_spill] sm:$0xff] %v5081_v61  ;;  %8057 = vst [vmem:[#allocation99_spill] sm:$0xff] %v5084_v60  ;;  %v5110_v27 = vadd.f32 %v1233_v51, %v8061_v12  ;;  %v5113_v63 = vadd.f32 %v1173_v49, %v8063_v41  ;;  %v1174_v45 = vsel %vm1153_vm2, %v8065_v48, %v4669_v43  ;;  %v8068_v51 = vld [vmem:[#allocation113_spill] sm:$0xff]  ;;  %v8075_v60 = vld [vmem:[#allocation43_spill] sm:$0xff] }
 0x1a6   :  { %8059 = vst [vmem:[#allocation127_spill] sm:$0xff] %v5093_v29  ;;  %v1234_v14 = vsel %vm1153_vm2, %v4669_v43, %v8065_v48  ;;  %v5126_v31 = vadd.f32 %v1232_v62, %v7992_v35  ;;  %v1236_v49 = vsel %vm1153_vm2, %v4677_v21, %v8067_v50  ;;  %v1177_v23 = vsel %vm1153_vm2, %v8068_v51, %v4675_v53  ;;  %v8071_v62 = vld [vmem:[#allocation32_spill] sm:$0xff]  ;;  %v8088_v61 = vld [vmem:[#allocation114_spill] sm:$0xff] }
 0x1a7   :  { %8062 = vst [vmem:[#allocation102_spill] sm:$0xff] %v5110_v27  ;;  %8064 = vst [vmem:[#allocation101_spill] sm:$0xff] %v5113_v63  ;;  %v1237_v43 = vsel %vm1153_vm2, %v4675_v53, %v8068_v51  ;;  %1458 = vrot.lane.b32.xlu1 %v8069_v52, %s2987_s25  ;;  %v5143_v35 = vadd.f32 %v1172_v39, %v8031_v6  ;;  %v5146_v48 = vadd.f32 %v1235_v4, %v8071_v62  ;;  %v8073_v63 = vld [vmem:[#allocation110_spill] sm:$0xff]  ;;  %v8076_v53 = vld [vmem:[#allocation33_spill] sm:$0xff] }
 0x1a8   :  { %8066 = vst [vmem:[#allocation105_spill] sm:$0xff] %v5126_v31  ;;  %v5149_v27 = vadd.f32 %v1175_v3, %v8073_v63  ;;  %v1176_v31 = vsel %vm1153_vm2, %v8067_v50, %v4677_v21  ;;  %1454 = vrot.lane.b32.xlu0 %v8075_v60, %s2987_s25  ;;  %v5158_v51 = vadd.f32 %v1234_v14, %v8076_v53  ;;  %v8079_v39 = vld [vmem:[#allocation96_spill] sm:$0xff]  ;;  %v8080_v4 = vld [vmem:[#allocation117_spill] sm:$0xff]  ;;  %v5171_v21 = vpop.permute.xlu1 %1422  ;;  %v8082_v14 = vld [vmem:[#allocation34_spill] sm:$0xff] }
 0x1a9   :  { %8070 = vst [vmem:[#allocation35_spill] sm:$0xff] %v5143_v35  ;;  %8072 = vst [vmem:[#allocation107_spill] sm:$0xff] %v5146_v48  ;;  %v5161_v6 = vadd.f32 %v1174_v45, %v8025_v19  ;;  %v1179_v3 = vsel %vm1153_vm2, %v8080_v4, %v8079_v39  ;;  %v5174_v50 = vadd.f32 %v1236_v49, %v8054_v7  ;;  %v8084_v19 = vld [vmem:[#allocation115_spill] sm:$0xff]  ;;  %v8086_v48 = vld [vmem:[#allocation118_spill] sm:$0xff]  ;;  %v5186_v35 = vpop.permute.xlu0 %1418 }
 0x1aa   :  { %8074 = vst [vmem:[#allocation109_spill] sm:$0xff] %v5149_v27  ;;  %8077 = vst [vmem:[#allocation30_spill] sm:$0xff] %v5158_v51  ;;  %v1239_v27 = vsel %vm1153_vm2, %v8079_v39, %v8080_v4  ;;  %v5177_v53 = vadd.f32 %v1237_v43, %v8082_v14  ;;  %v5180_v45 = vadd.f32 %v1177_v23, %v8084_v19  ;;  %v8090_v49 = vld [vmem:[#allocation17_spill] sm:$0xff] }
 0x1ab   :  { %8078 = vst [vmem:[#allocation106_spill] sm:$0xff] %v5161_v6  ;;  %8081 = vst [vmem:[#allocation111_spill] sm:$0xff] %v5174_v50  ;;  %v8087_v6 = vld [vmem:[#allocation16_spill] sm:$0xff]  ;;  %v5189_v39 = vadd.f32 %v1176_v31, %v8088_v61  ;;  %v8091_v43 = vld [vmem:[#allocation121_spill] sm:$0xff] }
 0x1ac   :  { %8083 = vst [vmem:[#allocation116_spill] sm:$0xff] %v5177_v53  ;;  %8085 = vst [vmem:[#allocation113_spill] sm:$0xff] %v5180_v45  ;;  %v1238_v51 = vsel %vm1153_vm2, %v8087_v6, %v8086_v48  ;;  %v1178_v7 = vsel %vm1153_vm2, %v8086_v48, %v8087_v6  ;;  %v1181_v23 = vsel %vm1153_vm2, %v8091_v43, %v8090_v49  ;;  %v8092_v45 = vld [vmem:[#allocation57_spill] sm:$0xff]  ;;  %v8093_v31 = vld [vmem:[#allocation36_spill] sm:$0xff] }
 0x1ad   :  { %8089 = vst [vmem:[#allocation45_spill] sm:$0xff] %v5189_v39  ;;  %v1241_v4 = vsel %vm1153_vm2, %v8090_v49, %v8091_v43  ;;  %1482 = vrot.lane.b32.xlu1 %v8092_v45, %s2987_s25  ;;  %v5206_v53 = vadd.f32 %v1239_v27, %v8093_v31  ;;  %v8095_v39 = vld [vmem:[#allocation120_spill] sm:$0xff]  ;;  %v8097_v48 = vld [vmem:[#allocation26_spill] sm:$0xff]  ;;  %v8099_v49 = vld [vmem:[#allocation55_spill] sm:$0xff]  ;;  %v5245_v15 = vadd.f32 %v1181_v23, %v8110_v30 }
 0x1ae   :  { %v5209_v50 = vadd.f32 %v1179_v3, %v8095_v39  ;;  %v8098_v6 = vld [vmem:[#allocation122_spill] sm:$0xff]  ;;  %1478 = vrot.lane.b32.xlu0 %v8099_v49, %s2987_s25  ;;  %v8100_v43 = vld [vmem:[#allocation37_spill] sm:$0xff]  ;;  %v8104_v39 = vld [vmem:[#allocation19_spill] sm:$0xff] }
 0x1af   :  { %8094 = vst [vmem:[#allocation32_spill] sm:$0xff] %v5206_v53  ;;  %v1180_v29 = vsel %vm1153_vm2, %v8098_v6, %v8097_v48  ;;  %v1240_v37 = vsel %vm1153_vm2, %v8097_v48, %v8098_v6  ;;  %v5222_v42 = vadd.f32 %v1238_v51, %v8100_v43  ;;  %v8102_v27 = vld [vmem:[#allocation126_spill] sm:$0xff]  ;;  %v8103_v31 = vld [vmem:[#allocation29_spill] sm:$0xff]  ;;  %v5236_v6 = vpop.permute.xlu1 %1518  ;;  %v5239_v51 = vadd.f32 %v1178_v7, %v8106_v32  ;;  %v8116_v32 = vld [vmem:[#allocation27_spill] sm:$0xff] }
 0x1b0   :  { %8096 = vst [vmem:[#allocation110_spill] sm:$0xff] %v5209_v50  ;;  %v1242_v3 = vsel %vm1153_vm2, %v8103_v31, %v8102_v27  ;;  %v8105_v50 = vld [vmem:[#allocation125_spill] sm:$0xff]  ;;  %v8108_v43 = vld [vmem:[#allocation38_spill] sm:$0xff]  ;;  %8111 = vst [vmem:[#allocation117_spill] sm:$0xff] %v5245_v15  ;;  %v1182_v19 = vsel %vm1153_vm2, %v8102_v27, %v8103_v31 }
 0x1b1   :  { %8101 = vst [vmem:[#allocation43_spill] sm:$0xff] %v5222_v42  ;;  %v1183_v53 = vsel %vm1153_vm2, %v8105_v50, %v8104_v39  ;;  %v1243_v48 = vsel %vm1153_vm2, %v8104_v39, %v8105_v50  ;;  %8107 = vst [vmem:[#allocation33_spill] sm:$0xff] %v5239_v51  ;;  %v5242_v2 = vadd.f32 %v1241_v4, %v8108_v43  ;;  %v5251_v42 = vpop.permute.xlu0 %1514  ;;  %v8114_v39 = vld [vmem:[#allocation123_spill] sm:$0xff]  ;;  %v8117_v7 = vld [vmem:[#allocation129_spill] sm:$0xff]  ;;  %1558 = vrot.lane.b32.xlu1 %v8088_v61, %s2987_s25 }
 0x1b2   :  { %v5254_v50 = vadd.f32 %v1240_v37, %v8112_v33  ;;  %v5257_v59 = vadd.f32 %v1180_v29, %v8114_v39  ;;  %v1185_v4 = vsel %vm1153_vm2, %v8117_v7, %v8116_v32  ;;  %v1245_v30 = vsel %vm1153_vm2, %v8116_v32, %v8117_v7  ;;  %v8118_v23 = vld [vmem:[#allocation41_spill] sm:$0xff]  ;;  %v8122_v29 = vld [vmem:[#allocation130_spill] sm:$0xff]  ;;  %1534 = vrot.lane.b32.xlu0 %v8042_v9, %s2987_s25  ;;  %v8124_v39 = vld [vmem:[#allocation128_spill] sm:$0xff] }
 0x1b3   :  { %8109 = vst [vmem:[#allocation96_spill] sm:$0xff] %v5242_v2  ;;  %v5270_v27 = vadd.f32 %v1242_v3, %v8118_v23  ;;  %v5273_v33 = vadd.f32 %v1243_v48, %v8002_v26  ;;  %v5276_v37 = vadd.f32 %v1183_v53, %v8048_v8  ;;  %v8123_v31 = vld [vmem:[#allocation77_spill] sm:$0xff]  ;;  %v5285_v32 = vadd.f32 %v1182_v19, %v8124_v39  ;;  %v8126_v61 = vld [vmem:[#allocation74_spill] sm:$0xff]  ;;  %v5299_v48 = vpop.permute.xlu1 %1542  ;;  %v8130_v7 = vld [vmem:[#allocation131_spill] sm:$0xff] }
 0x1b4   :  { %8113 = vst [vmem:[#allocation34_spill] sm:$0xff] %v5254_v50  ;;  %8115 = vst [vmem:[#allocation118_spill] sm:$0xff] %v5257_v59  ;;  %v1244_v43 = vsel %vm1153_vm2, %v8123_v31, %v8122_v29  ;;  %v1184_v26 = vsel %vm1153_vm2, %v8122_v29, %v8123_v31  ;;  %v8127_v3 = vld [vmem:[#allocation133_spill] sm:$0xff]  ;;  %v8128_v9 = vld [vmem:[#allocation42_spill] sm:$0xff]  ;;  %v5305_v23 = vadd.f32 %v1185_v4, %v8130_v7 }
 0x1b5   :  { %8119 = vst [vmem:[#allocation16_spill] sm:$0xff] %v5270_v27  ;;  %8120 = vst [vmem:[#allocation114_spill] sm:$0xff] %v5273_v33  ;;  %v1187_v8 = vsel %vm1153_vm2, %v8127_v3, %v8126_v61  ;;  %v1247_v53 = vsel %vm1153_vm2, %v8126_v61, %v8127_v3  ;;  %v5302_v19 = vadd.f32 %v1245_v30, %v8128_v9  ;;  %v8132_v39 = vld [vmem:[#allocation97_spill] sm:$0xff]  ;;  %v8133_v29 = vld [vmem:[#allocation135_spill] sm:$0xff]  ;;  %v5315_v33 = vpop.permute.xlu0 %1538 }
 0x1b6   :  { %8121 = vst [vmem:[#allocation17_spill] sm:$0xff] %v5276_v37  ;;  %8125 = vst [vmem:[#allocation121_spill] sm:$0xff] %v5285_v32  ;;  %v1186_v31 = vsel %vm1153_vm2, %v8133_v29, %v8132_v39  ;;  %v1246_v37 = vsel %vm1153_vm2, %v8132_v39, %v8133_v29  ;;  %v5318_v61 = vadd.f32 %v1244_v43, %v8075_v60  ;;  %v8135_v30 = vld [vmem:[#allocation139_spill] sm:$0xff]  ;;  %v8136_v3 = vld [vmem:[#allocation104_spill] sm:$0xff] }
 0x1b7   :  { %8129 = vst [vmem:[#allocation57_spill] sm:$0xff] %v5302_v19  ;;  %8131 = vst [vmem:[#allocation36_spill] sm:$0xff] %v5305_v23  ;;  %v1248_v4 = vsel %vm1153_vm2, %v8136_v3, %v8135_v30  ;;  %v8137_v23 = vld [vmem:[#allocation81_spill] sm:$0xff]  ;;  %v8139_v29 = vld [vmem:[#allocation136_spill] sm:$0xff]  ;;  %v1188_v7 = vsel %vm1153_vm2, %v8135_v30, %v8136_v3  ;;  %v5363_v30 = vpop.permute.xlu1 %1400 }
 0x1b8   :  { %8134 = vst [vmem:[#allocation120_spill] sm:$0xff] %v5318_v61  ;;  %v8138_v19 = vld [vmem:[#allocation137_spill] sm:$0xff]  ;;  %1578 = vrot.lane.b32.xlu1 %v8139_v29, %s2987_s25  ;;  %v8140_v60 = vld [vmem:[#allocation132_spill] sm:$0xff]  ;;  %v8144_v15 = vld [vmem:[#allocation134_spill] sm:$0xff] }
 0x1b9   :  { %v1189_v32 = vsel %vm1153_vm2, %v8138_v19, %v8137_v23  ;;  %v1249_v39 = vsel %vm1153_vm2, %v8137_v23, %v8138_v19  ;;  %v5335_v43 = vadd.f32 %v1184_v26, %v8140_v60  ;;  %v8142_v61 = vld [vmem:[#allocation44_spill] sm:$0xff]  ;;  %v5341_v2 = vadd.f32 %v1187_v8, %v8144_v15  ;;  %1574 = vrot.lane.b32.xlu0 %v8140_v60, %s2987_s25  ;;  %v8151_v3 = vld [vmem:[#allocation46_spill] sm:$0xff] }
 0x1ba   :  { %v5338_v27 = vadd.f32 %v1247_v53, %v8142_v61  ;;  %v5350_v19 = vadd.f32 %v1246_v37, %v8069_v52  ;;  %v5353_v26 = vadd.f32 %v1186_v31, %v8139_v29  ;;  %v8148_v23 = vld [vmem:[#allocation100_spill] sm:$0xff]  ;;  %v8149_v53 = vld [vmem:[#allocation141_spill] sm:$0xff]  ;;  %8150 = vst [vmem:[#allocation29_spill] sm:$0xff] %v5363_v30  ;;  %v5366_v60 = vadd.f32 %v1248_v4, %v8151_v3  ;;  %v8153_v52 = vld [vmem:[#allocation47_spill] sm:$0xff] }
 0x1bb   :  { %8141 = vst [vmem:[#allocation26_spill] sm:$0xff] %v5335_v43  ;;  %8145 = vst [vmem:[#allocation55_spill] sm:$0xff] %v5341_v2  ;;  %v1191_v8 = vsel %vm1153_vm2, %v8149_v53, %v8148_v23  ;;  %v1251_v2 = vsel %vm1153_vm2, %v8148_v23, %v8149_v53  ;;  %v5369_v37 = vadd.f32 %v1249_v39, %v8153_v52  ;;  %v8155_v31 = vld [vmem:[#allocation138_spill] sm:$0xff]  ;;  %v5378_v43 = vpop.permute.xlu0 %1396  ;;  %v8160_v15 = vld [vmem:[#allocation140_spill] sm:$0xff] }
 0x1bc   :  { %8143 = vst [vmem:[#allocation122_spill] sm:$0xff] %v5338_v27  ;;  %8146 = vst [vmem:[#allocation37_spill] sm:$0xff] %v5350_v19  ;;  %v5372_v29 = vadd.f32 %v1189_v32, %v8155_v31  ;;  %v8157_v27 = vld [vmem:[#allocation144_spill] sm:$0xff]  ;;  %v5381_v23 = vadd.f32 %v1188_v7, %v8160_v15  ;;  %v8162_v39 = vld [vmem:[#allocation18_spill] sm:$0xff] }
 0x1bd   :  { %8147 = vst [vmem:[#allocation126_spill] sm:$0xff] %v5353_v26  ;;  %8152 = vst [vmem:[#allocation19_spill] sm:$0xff] %v5366_v60  ;;  %v8158_v26 = vld [vmem:[#allocation28_spill] sm:$0xff]  ;;  %v8163_v53 = vld [vmem:[#allocation145_spill] sm:$0xff] }
 0x1be   :  { %8154 = vst [vmem:[#allocation125_spill] sm:$0xff] %v5369_v37  ;;  %8156 = vst [vmem:[#allocation119_spill] sm:$0xff] %v5372_v29  ;;  %v1250_v19 = vsel %vm1153_vm2, %v8158_v26, %v8157_v27  ;;  %v1190_v4 = vsel %vm1153_vm2, %v8157_v27, %v8158_v26  ;;  %v1193_v32 = vsel %vm1153_vm2, %v8163_v53, %v8162_v39  ;;  %v8164_v37 = vld [vmem:[#allocation159_spill] sm:$0xff]  ;;  %v8165_v7 = vld [vmem:[#allocation49_spill] sm:$0xff] }
 0x1bf   :  { %8159 = vst [vmem:[#allocation38_spill] sm:$0xff] %v5378_v43  ;;  %8161 = vst [vmem:[#allocation124_spill] sm:$0xff] %v5381_v23  ;;  %v1253_v29 = vsel %vm1153_vm2, %v8162_v39, %v8163_v53  ;;  %1602 = vrot.lane.b32.xlu1 %v8164_v37, %s2987_s25  ;;  %v5398_v23 = vadd.f32 %v1251_v2, %v8165_v7  ;;  %v8167_v60 = vld [vmem:[#allocation143_spill] sm:$0xff]  ;;  %v8169_v27 = vld [vmem:[#allocation188_spill] sm:$0xff]  ;;  %v5437_v30 = vadd.f32 %v1193_v32, %v8182_v16  ;;  %v5443_v9 = vpop.permute.xlu0 %1402 }
 0x1c0   :  { %v5401_v31 = vadd.f32 %v1191_v8, %v8167_v60  ;;  %v8170_v26 = vld [vmem:[#allocation146_spill] sm:$0xff]  ;;  %v8171_v39 = vld [vmem:[#allocation155_spill] sm:$0xff]  ;;  %v8172_v53 = vld [vmem:[#allocation48_spill] sm:$0xff] }
 0x1c1   :  { %8166 = vst [vmem:[#allocation39_spill] sm:$0xff] %v5398_v23  ;;  %v1192_v52 = vsel %vm1153_vm2, %v8170_v26, %v8169_v27  ;;  %v1252_v59 = vsel %vm1153_vm2, %v8169_v27, %v8170_v26  ;;  %1598 = vrot.lane.b32.xlu0 %v8171_v39, %s2987_s25  ;;  %v5414_v50 = vadd.f32 %v1250_v19, %v8172_v53  ;;  %v8174_v2 = vld [vmem:[#allocation150_spill] sm:$0xff]  ;;  %v8175_v7 = vld [vmem:[#allocation80_spill] sm:$0xff]  ;;  %v8176_v60 = vld [vmem:[#allocation103_spill] sm:$0xff]  ;;  %v5428_v26 = vpop.permute.xlu1 %1420 }
 0x1c2   :  { %8168 = vst [vmem:[#allocation123_spill] sm:$0xff] %v5401_v31  ;;  %v1254_v8 = vsel %vm1153_vm2, %v8175_v7, %v8174_v2  ;;  %v8177_v31 = vld [vmem:[#allocation149_spill] sm:$0xff]  ;;  %8178 = vst [vmem:[#allocation129_spill] sm:$0xff] %v5428_v26  ;;  %v8179_v51 = vld [vmem:[#allocation142_spill] sm:$0xff]  ;;  %v1194_v43 = vsel %vm1153_vm2, %v8174_v2, %v8175_v7 }
 0x1c3   :  { %8173 = vst [vmem:[#allocation27_spill] sm:$0xff] %v5414_v50  ;;  %v1195_v23 = vsel %vm1153_vm2, %v8177_v31, %v8176_v60  ;;  %v1255_v27 = vsel %vm1153_vm2, %v8176_v60, %v8177_v31  ;;  %v5431_v19 = vadd.f32 %v1190_v4, %v8179_v51  ;;  %v8180_v53 = vld [vmem:[#allocation51_spill] sm:$0xff]  ;;  %8183 = vst [vmem:[#allocation130_spill] sm:$0xff] %v5437_v30  ;;  %v8184_v61 = vld [vmem:[#allocation50_spill] sm:$0xff]  ;;  %1412 = vrot.lane.b32.xlu1 %v8027_v13, %s2987_s25 }
 0x1c4   :  { %v5434_v50 = vadd.f32 %v1253_v29, %v8180_v53  ;;  %v5446_v31 = vadd.f32 %v1252_v59, %v8184_v61  ;;  %v8185_v60 = vld [vmem:[#allocation147_spill] sm:$0xff]  ;;  %v8186_v51 = vld [vmem:[#allocation189_spill] sm:$0xff]  ;;  %v8187_v4 = vld [vmem:[#allocation152_spill] sm:$0xff]  ;;  %v5465_v59 = vadd.f32 %v1255_v27, %v7998_v28  ;;  %v5468_v61 = vadd.f32 %v1195_v23, %v4377_v57 }
 0x1c5   :  { %v5449_v26 = vadd.f32 %v1192_v52, %v8185_v60  ;;  %v1197_v29 = vsel %vm1153_vm2, %v8187_v4, %v8186_v51  ;;  %v1257_v16 = vsel %vm1153_vm2, %v8186_v51, %v8187_v4  ;;  %v8188_v32 = vld [vmem:[#allocation53_spill] sm:$0xff]  ;;  %v8193_v7 = vld [vmem:[#allocation190_spill] sm:$0xff]  ;;  %1408 = vrot.lane.b32.xlu0 %v8017_v11, %s2987_s25  ;;  %v8194_v60 = vld [vmem:[#allocation151_spill] sm:$0xff]  ;;  %v5492_v11 = vpop.permute.xlu1 %1426 }
 0x1c6   :  { %8181 = vst [vmem:[#allocation41_spill] sm:$0xff] %v5434_v50  ;;  %v5462_v2 = vadd.f32 %v1254_v8, %v8188_v32  ;;  %8190 = vst [vmem:[#allocation128_spill] sm:$0xff] %v5465_v59  ;;  %v8192_v52 = vld [vmem:[#allocation153_spill] sm:$0xff]  ;;  %v5477_v51 = vadd.f32 %v1194_v43, %v8194_v60  ;;  %v8196_v13 = vld [vmem:[#allocation191_spill] sm:$0xff] }
 0x1c7   :  { %8191 = vst [vmem:[#allocation74_spill] sm:$0xff] %v5468_v61  ;;  %v1256_v53 = vsel %vm1153_vm2, %v8193_v7, %v8192_v52  ;;  %v1196_v28 = vsel %vm1153_vm2, %v8192_v52, %v8193_v7  ;;  %v8197_v8 = vld [vmem:[#allocation156_spill] sm:$0xff]  ;;  %8198 = vst [vmem:[#allocation97_spill] sm:$0xff] %v5492_v11  ;;  %v8199_v43 = vld [vmem:[#allocation54_spill] sm:$0xff]  ;;  %1436 = vrot.lane.b32.xlu1 %v8071_v62, %s2987_s25 }
 0x1c8   :  { %8189 = vst [vmem:[#allocation77_spill] sm:$0xff] %v5462_v2  ;;  %8195 = vst [vmem:[#allocation133_spill] sm:$0xff] %v5477_v51  ;;  %v1199_v57 = vsel %vm1153_vm2, %v8197_v8, %v8196_v13  ;;  %v1259_v23 = vsel %vm1153_vm2, %v8196_v13, %v8197_v8  ;;  %v5495_v27 = vadd.f32 %v1257_v16, %v8199_v43  ;;  %v8201_v4 = vld [vmem:[#allocation154_spill] sm:$0xff]  ;;  %v8203_v52 = vld [vmem:[#allocation192_spill] sm:$0xff]  ;;  %v5508_v8 = vpop.permute.xlu0 %1424 }
 0x1c9   :  { %v5498_v32 = vadd.f32 %v1197_v29, %v8201_v4  ;;  %v8204_v7 = vld [vmem:[#allocation157_spill] sm:$0xff]  ;;  %v5511_v61 = vadd.f32 %v1256_v53, %v8099_v49  ;;  %v8206_v16 = vld [vmem:[#allocation162_spill] sm:$0xff]  ;;  %v8209_v59 = vld [vmem:[#allocation160_spill] sm:$0xff]  ;;  %v5528_v49 = vadd.f32 %v1196_v28, %v8171_v39  ;;  %1432 = vrot.lane.b32.xlu0 %v8061_v12, %s2987_s25 }
 0x1ca   :  { %8200 = vst [vmem:[#allocation135_spill] sm:$0xff] %v5495_v27  ;;  %v1198_v60 = vsel %vm1153_vm2, %v8204_v7, %v8203_v52  ;;  %v1258_v13 = vsel %vm1153_vm2, %v8203_v52, %v8204_v7  ;;  %v8207_v27 = vld [vmem:[#allocation194_spill] sm:$0xff]  ;;  %v8211_v53 = vld [vmem:[#allocation56_spill] sm:$0xff]  ;;  %v8217_v39 = vld [vmem:[#allocation23_spill] sm:$0xff] }
 0x1cb   :  { %8202 = vst [vmem:[#allocation139_spill] sm:$0xff] %v5498_v32  ;;  %8205 = vst [vmem:[#allocation104_spill] sm:$0xff] %v5511_v61  ;;  %v1260_v29 = vsel %vm1153_vm2, %v8207_v27, %v8206_v16  ;;  %v8208_v32 = vld [vmem:[#allocation193_spill] sm:$0xff]  ;;  %v5531_v7 = vadd.f32 %v1259_v23, %v8211_v53  ;;  %v8213_v61 = vld [vmem:[#allocation158_spill] sm:$0xff]  ;;  %v1200_v30 = vsel %vm1153_vm2, %v8206_v16, %v8207_v27  ;;  %v5556_v27 = vpop.permute.xlu1 %1446 }
 0x1cc   :  { %v1201_v51 = vsel %vm1153_vm2, %v8209_v59, %v8208_v32  ;;  %v1261_v52 = vsel %vm1153_vm2, %v8208_v32, %v8209_v59  ;;  %8210 = vst [vmem:[#allocation81_spill] sm:$0xff] %v5528_v49  ;;  %v5534_v2 = vadd.f32 %v1199_v57, %v8213_v61  ;;  %v5543_v59 = vadd.f32 %v1258_v13, %v8092_v45  ;;  %v8218_v28 = vld [vmem:[#allocation164_spill] sm:$0xff]  ;;  %v8219_v32 = vld [vmem:[#allocation58_spill] sm:$0xff]  ;;  %v8221_v45 = vld [vmem:[#allocation59_spill] sm:$0xff] }
 0x1cd   :  { %8212 = vst [vmem:[#allocation137_spill] sm:$0xff] %v5531_v7  ;;  %v5546_v62 = vadd.f32 %v1198_v60, %v8164_v37  ;;  %v1203_v57 = vsel %vm1153_vm2, %v8218_v28, %v8217_v39  ;;  %v1263_v23 = vsel %vm1153_vm2, %v8217_v39, %v8218_v28  ;;  %v5559_v12 = vadd.f32 %v1260_v29, %v8219_v32  ;;  %v8223_v37 = vld [vmem:[#allocation161_spill] sm:$0xff]  ;;  %v8225_v16 = vld [vmem:[#allocation166_spill] sm:$0xff]  ;;  %v8230_v28 = vld [vmem:[#allocation168_spill] sm:$0xff] }
 0x1ce   :  { %8214 = vst [vmem:[#allocation136_spill] sm:$0xff] %v5534_v2  ;;  %8215 = vst [vmem:[#allocation132_spill] sm:$0xff] %v5543_v59  ;;  %v5562_v13 = vadd.f32 %v1261_v52, %v8221_v45  ;;  %v5565_v60 = vadd.f32 %v1201_v51, %v8223_v37  ;;  %v8226_v2 = vld [vmem:[#allocation21_spill] sm:$0xff]  ;;  %v8227_v59 = vld [vmem:[#allocation163_spill] sm:$0xff]  ;;  %1486 = vrot.lane.b32.xlu1 %v8219_v32, %s2987_s25  ;;  %1462 = vrot.lane.b32.xlu0 %v8151_v3, %s2987_s25 }
 0x1cf   :  { %8216 = vst [vmem:[#allocation100_spill] sm:$0xff] %v5546_v62  ;;  %8220 = vst [vmem:[#allocation141_spill] sm:$0xff] %v5559_v12  ;;  %v1262_v7 = vsel %vm1153_vm2, %v8226_v2, %v8225_v16  ;;  %v5571_v62 = vpop.permute.xlu0 %1442  ;;  %v5574_v39 = vadd.f32 %v1200_v30, %v8227_v59  ;;  %v1202_v29 = vsel %vm1153_vm2, %v8225_v16, %v8226_v2  ;;  %v8229_v52 = vld [vmem:[#allocation31_spill] sm:$0xff]  ;;  %v8231_v30 = vld [vmem:[#allocation60_spill] sm:$0xff] }
 0x1d0   :  { %8222 = vst [vmem:[#allocation46_spill] sm:$0xff] %v5562_v13  ;;  %8224 = vst [vmem:[#allocation144_spill] sm:$0xff] %v5565_v60  ;;  %v1205_v51 = vsel %vm1153_vm2, %v8230_v28, %v8229_v52  ;;  %v1265_v60 = vsel %vm1153_vm2, %v8229_v52, %v8230_v28  ;;  %v5591_v13 = vadd.f32 %v1263_v23, %v8231_v30  ;;  %v8235_v2 = vld [vmem:[#allocation76_spill] sm:$0xff]  ;;  %v8236_v16 = vld [vmem:[#allocation171_spill] sm:$0xff] }
 0x1d1   :  { %8228 = vst [vmem:[#allocation28_spill] sm:$0xff] %v5574_v39  ;;  %v8233_v39 = vld [vmem:[#allocation165_spill] sm:$0xff]  ;;  %v1204_v49 = vsel %vm1153_vm2, %v8236_v16, %v8235_v2  ;;  %v1264_v50 = vsel %vm1153_vm2, %v8235_v2, %v8236_v16  ;;  %v8240_v28 = vld [vmem:[#allocation172_spill] sm:$0xff]  ;;  %v5621_v16 = vpop.permute.xlu1 %1470  ;;  %v8241_v3 = vld [vmem:[#allocation167_spill] sm:$0xff] }
 0x1d2   :  { %8232 = vst [vmem:[#allocation140_spill] sm:$0xff] %v5591_v13  ;;  %v5594_v12 = vadd.f32 %v1203_v57, %v8233_v39  ;;  %v8237_v32 = vld [vmem:[#allocation61_spill] sm:$0xff]  ;;  %v1267_v2 = vsel %vm1153_vm2, %v4852_v38, %v8240_v28  ;;  %v8243_v13 = vld [vmem:[#allocation63_spill] sm:$0xff]  ;;  %v8245_v39 = vld [vmem:[#allocation170_spill] sm:$0xff]  ;;  %1532 = vrot.lane.b32.xlu1 %v8029_v22, %s2987_s25  ;;  %1528 = vrot.lane.b32.xlu0 %v8019_v24, %s2987_s25 }
 0x1d3   :  { %v5607_v52 = vadd.f32 %v1262_v7, %v8237_v32  ;;  %v8239_v23 = vld [vmem:[#allocation173_spill] sm:$0xff]  ;;  %v5624_v7 = vadd.f32 %v1202_v29, %v8241_v3  ;;  %v5630_v30 = vadd.f32 %v1205_v51, %v8245_v39  ;;  %v5636_v45 = vpop.permute.xlu0 %1466  ;;  %v8247_v32 = vld [vmem:[#allocation62_spill] sm:$0xff]  ;;  %v1707_v29 = vsel %vm1634_vm3, %v5315_v33, %v5186_v35  ;;  %v8259_v24 = vld [vmem:[#allocation176_spill] sm:$0xff] }
 0x1d4   :  { %8234 = vst [vmem:[#allocation18_spill] sm:$0xff] %v5594_v12  ;;  %v1266_v57 = vsel %vm1153_vm2, %v4867_v44, %v8239_v23  ;;  %v1207_v12 = vsel %vm1153_vm2, %v8240_v28, %v4852_v38  ;;  %v1206_v37 = vsel %vm1153_vm2, %v8239_v23, %v4867_v44  ;;  %v5639_v38 = vadd.f32 %v1264_v50, %v8247_v32  ;;  %v8249_v28 = vld [vmem:[#allocation169_spill] sm:$0xff]  ;;  %v8253_v50 = vld [vmem:[#allocation64_spill] sm:$0xff] }
 0x1d5   :  { %8238 = vst [vmem:[#allocation145_spill] sm:$0xff] %v5607_v52  ;;  %8242 = vst [vmem:[#allocation159_spill] sm:$0xff] %v5624_v7  ;;  %v5627_v52 = vadd.f32 %v1265_v60, %v8243_v13  ;;  %v5642_v11 = vadd.f32 %v1204_v49, %v8249_v28  ;;  %v1647_v60 = vsel %vm1634_vm3, %v5186_v35, %v5315_v33  ;;  %v8251_v44 = vld [vmem:[#allocation65_spill] sm:$0xff]  ;;  %v8255_v49 = vld [vmem:[#allocation175_spill] sm:$0xff] }
 0x1d6   :  { %8246 = vst [vmem:[#allocation143_spill] sm:$0xff] %v5630_v30  ;;  %8248 = vst [vmem:[#allocation188_spill] sm:$0xff] %v5639_v38  ;;  %v5655_v51 = vadd.f32 %v1266_v57, %v8251_v44  ;;  %v5658_v23 = vadd.f32 %v1267_v2, %v8253_v50  ;;  %v5661_v30 = vadd.f32 %v1207_v12, %v8255_v49  ;;  %v8257_v35 = vld [vmem:[#allocation174_spill] sm:$0xff]  ;;  %v5684_v2 = vpop.permute.xlu1 %1520  ;;  %1556 = vrot.lane.b32.xlu1 %v8073_v63, %s2987_s25 }
 0x1d7   :  { %8244 = vst [vmem:[#allocation49_spill] sm:$0xff] %v5627_v52  ;;  %8250 = vst [vmem:[#allocation146_spill] sm:$0xff] %v5642_v11  ;;  %v1635_v52 = vsel %vm1634_vm3, %v5123_v5, %v5251_v42  ;;  %v5670_v33 = vadd.f32 %v1206_v37, %v8257_v35  ;;  %v1695_v22 = vsel %vm1634_vm3, %v5251_v42, %v5123_v5  ;;  %1552 = vrot.lane.b32.xlu0 %v8063_v41, %s2987_s25  ;;  %v8286_v7 = vld [vmem:[#allocation70_spill] sm:$0xff] }
 0x1d8   :  { %8252 = vst [vmem:[#allocation155_spill] sm:$0xff] %v5655_v51  ;;  %8254 = vst [vmem:[#allocation48_spill] sm:$0xff] %v5658_v23  ;;  %v1649_v12 = vsel %vm1634_vm3, %v5171_v21, %v5299_v48  ;;  %v1709_v57 = vsel %vm1634_vm3, %v5299_v48, %v5171_v21  ;;  %v1269_v37 = vsel %vm1153_vm2, %v4915_v1, %v8259_v24  ;;  %v5696_v23 = vpop.permute.xlu0 %1516  ;;  %v8260_v21 = vld [vmem:[#allocation177_spill] sm:$0xff]  ;;  %v8261_v51 = vld [vmem:[#allocation52_spill] sm:$0xff] }
 0x1d9   :  { %8256 = vst [vmem:[#allocation150_spill] sm:$0xff] %v5661_v30  ;;  %8258 = vst [vmem:[#allocation80_spill] sm:$0xff] %v5670_v33  ;;  %v1637_v42 = vsel %vm1634_vm3, %v5107_v10, %v5236_v6  ;;  %v1779_v5 = vadd.f32 %v1647_v60, %v5030_v54  ;;  %v1780_v30 = vadd.f32 %v1707_v29, %v5047_v17 }
 0x1da   :  { %v1208_v48 = vsel %vm1153_vm2, %v8260_v21, %v4931_v18  ;;  %v1209_v33 = vsel %vm1153_vm2, %v8259_v24, %v4915_v1  ;;  %v1755_v11 = vadd.f32 %v1635_v52, %v8261_v51  ;;  %v1697_v54 = vsel %vm1634_vm3, %v5236_v6, %v5107_v10  ;;  %v8262_v52 = vld [vmem:[#allocation66_spill] sm:$0xff]  ;;  %v8264_v10 = vld [vmem:[#allocation180_spill] sm:$0xff]  ;;  %v8266_v24 = vld [vmem:[#allocation67_spill] sm:$0xff]  ;;  %1606 = vrot.lane.b32.xlu1 %v8227_v59, %s2987_s25 }
 0x1db   :  { %v1268_v17 = vsel %vm1153_vm2, %v4931_v18, %v8260_v21  ;;  %v1756_v60 = vadd.f32 %v1695_v22, %v4855_v34  ;;  %v1783_v29 = vadd.f32 %v1649_v12, %v5062_v36  ;;  %v1784_v1 = vadd.f32 %v1709_v57, %v5065_v56  ;;  %v5734_v36 = vpop.permute.xlu1 %1540  ;;  %v8265_v56 = vld [vmem:[#allocation181_spill] sm:$0xff]  ;;  %v8268_v21 = vld [vmem:[#allocation178_spill] sm:$0xff]  ;;  %1582 = vrot.lane.b32.xlu0 %v8160_v15, %s2987_s25 }
 0x1dc   :  { %v5723_v51 = vadd.f32 %v1269_v37, %v8262_v52  ;;  %v1211_v63 = vsel %vm1153_vm2, %v8264_v10, %v4979_v25  ;;  %v1271_v34 = vsel %vm1153_vm2, %v4979_v25, %v8264_v10  ;;  %v1759_v18 = vadd.f32 %v1637_v42, %v4870_v58  ;;  %v5741_v57 = vpop.permute.xlu0 %1522  ;;  %v8270_v58 = vld [vmem:[#allocation179_spill] sm:$0xff] }
 0x1dd   :  { %v1270_v41 = vsel %vm1153_vm2, %v4994_v55, %v8265_v56  ;;  %v1760_v6 = vadd.f32 %v1697_v54, %v4873_v47  ;;  %v1899_v22 = vmul.f32 0.11111111, %v1779_v5  ;;  %v1900_v12 = vmul.f32 0.11111111, %v1780_v30 }
 0x1de   :  { %8263 = vst [vmem:[#allocation103_spill] sm:$0xff] %v5723_v51  ;;  %v5744_v37 = vadd.f32 %v1268_v17, %v8266_v24  ;;  %v5747_v25 = vadd.f32 %v1208_v48, %v8268_v21  ;;  %v5750_v42 = vadd.f32 %v1209_v33, %v8270_v58  ;;  %v1875_v10 = vmul.f32 0.11111111, %v1755_v11  ;;  %v8272_v48 = vld [vmem:[#allocation69_spill] sm:$0xff]  ;;  %v8274_v33 = vld [vmem:[#allocation68_spill] sm:$0xff]  ;;  %v8276_v11 = vld [vmem:[#allocation182_spill] sm:$0xff]  ;;  %1440 = vrot.lane.b32.xlu1 %v8082_v14, %s2987_s25 }
 0x1df   :  { %v1210_v47 = vsel %vm1153_vm2, %v8265_v56, %v4994_v55  ;;  %v1876_v30 = vmul.f32 0.11111111, %v1756_v60  ;;  %v1903_v5 = vmul.f32 0.11111111, %v1783_v29  ;;  %v1904_v54 = vmul.f32 0.11111111, %v1784_v1  ;;  %1416 = vrot.lane.b32.xlu0 %v8037_v40, %s2987_s25 }
 0x1e0   :  { %8267 = vst [vmem:[#allocation149_spill] sm:$0xff] %v5744_v37  ;;  %8269 = vst [vmem:[#allocation142_spill] sm:$0xff] %v5747_v25  ;;  %v5761_v17 = vadd.f32 %v1270_v41, %v8272_v48  ;;  %v5767_v51 = vadd.f32 %v1211_v63, %v8276_v11  ;;  %v1879_v59 = vmul.f32 0.11111111, %v1759_v18  ;;  %v5769_v25 = vpop.permute.xlu1 %1546  ;;  %v1880_v37 = vmul.f32 0.11111111, %v1760_v6  ;;  %v5777_v15 = vpop.permute.xlu0 %1544 }
 0x1e1   :  { %8271 = vst [vmem:[#allocation51_spill] sm:$0xff] %v5750_v42  ;;  %v5764_v42 = vadd.f32 %v1271_v34, %v8274_v33  ;;  %v5771_v55 = vmul.f32 %v1899_v22, %v1875_v10  ;;  %v5773_v60 = vmul.f32 %v1900_v12, %v1876_v30  ;;  %v5775_v29 = vmul.f32 %v1899_v22, %v1899_v22  ;;  %v8280_v1 = vld [vmem:[#allocation183_spill] sm:$0xff]  ;;  %v8282_v34 = vld [vmem:[#allocation184_spill] sm:$0xff]  ;;  %v8288_v11 = vld [vmem:[#allocation186_spill] sm:$0xff] }
 0x1e2   :  { %8273 = vst [vmem:[#allocation148_spill] sm:$0xff] %v5761_v17  ;;  %8277 = vst [vmem:[#allocation147_spill] sm:$0xff] %v5767_v51  ;;  %v5780_v56 = vadd.f32 %v1210_v47, %v8280_v1  ;;  %v1213_v63 = vsel %vm1153_vm2, %v8282_v34, %v5044_v0  ;;  %v1273_v18 = vsel %vm1153_vm2, %v5044_v0, %v8282_v34  ;;  %v8303_v1 = vld [vmem:[#allocation129_spill] sm:$0xff] }
 0x1e3   :  { %8275 = vst [vmem:[#allocation50_spill] sm:$0xff] %v5764_v42  ;;  %8278 = vst [vmem:[#allocation189_spill] sm:$0xff] %v5771_v55  ;;  %v5790_v41 = vmul.f32 %v1900_v12, %v1900_v12  ;;  %v5794_v6 = vmul.f32 %v1875_v10, %v1875_v10  ;;  %v5796_v22 = vmul.f32 %v1903_v5, %v1879_v59  ;;  %v8285_v42 = vld [vmem:[#allocation185_spill] sm:$0xff]  ;;  %v2139_v40 = vmul.f32 2.0, %v5771_v55 }
 0x1e4   :  { %8279 = vst [vmem:[#allocation152_spill] sm:$0xff] %v5773_v60  ;;  %8281 = vst [vmem:[#allocation53_spill] sm:$0xff] %v5780_v56  ;;  %v5798_v47 = vmul.f32 %v1904_v54, %v1880_v37  ;;  %v5800_v51 = vmul.f32 %v1903_v5, %v1903_v5  ;;  %v5808_v0 = vsel %vm1153_vm2, %v8285_v42, %v5059_v46  ;;  %v1567_v5 = vpop.permute.xlu1 %1566  ;;  %v2140_v56 = vmul.f32 2.0, %v5773_v60  ;;  %v1563_v38 = vpop.permute.xlu0 %1562 }
 0x1e5   :  { %8283 = vst [vmem:[#allocation153_spill] sm:$0xff] %v5796_v22  ;;  %v1272_v14 = vsel %vm1153_vm2, %v5059_v46, %v8285_v42  ;;  %v5814_v12 = vmul.f32 %v1876_v30, %v1876_v30  ;;  %v5816_v10 = vmul.f32 %v1904_v54, %v1904_v54  ;;  %v5818_v34 = vmul.f32 %v1879_v59, %v1879_v59  ;;  %v8290_v54 = vld [vmem:[#allocation44_spill] sm:$0xff]  ;;  %v8291_v59 = vld [vmem:[#allocation71_spill] sm:$0xff] }
 0x1e6   :  { %8284 = vst [vmem:[#allocation190_spill] sm:$0xff] %v5798_v47  ;;  %v2259_v17 = vadd.f32 %v5775_v29, %v5794_v6  ;;  %v5825_v58 = vadd.f32 %v1273_v18, %v8286_v7  ;;  %v5828_v46 = vadd.f32 %v1213_v63, %v8288_v11  ;;  %v5830_v42 = vmul.f32 %v1880_v37, %v1880_v37  ;;  %v8293_v63 = vld [vmem:[#allocation42_spill] sm:$0xff] }
 0x1e7   :  { %v2260_v30 = vadd.f32 %v5790_v41, %v5814_v12  ;;  %1460 = vrot.lane.b32.xlu1 %v8290_v54, %s2987_s25  ;;  %v5837_v60 = vadd.f32 %v1272_v14, %v8291_v59  ;;  %v2143_v55 = vmul.f32 2.0, %v5796_v22  ;;  %v2144_v52 = vmul.f32 2.0, %v5798_v47  ;;  %1456 = vrot.lane.b32.xlu0 %v8293_v63, %s2987_s25  ;;  %v8295_v54 = vld [vmem:[#allocation29_spill] sm:$0xff] }
 0x1e8   :  { %8287 = vst [vmem:[#allocation151_spill] sm:$0xff] %v5825_v58  ;;  %8289 = vst [vmem:[#allocation191_spill] sm:$0xff] %v5828_v46  ;;  %v2263_v18 = vadd.f32 %v5800_v51, %v5818_v34  ;;  %v5847_v37 = vadd.f32 %v5816_v10, %v5830_v42  ;;  %v8294_v46 = vld [vmem:[#allocation38_spill] sm:$0xff]  ;;  %v1638_v58 = vsel %vm1634_vm3, %v8295_v54, %v5684_v2  ;;  %v1591_v63 = vpop.permute.xlu1 %1590  ;;  %v5861_v47 = vadd.f32 0.0001, %v2139_v40  ;;  %v1587_v33 = vpop.permute.xlu0 %1586 }
 0x1e9   :  { %8292 = vst [vmem:[#allocation156_spill] sm:$0xff] %v5837_v60  ;;  %v1636_v14 = vsel %vm1634_vm3, %v8294_v46, %v5696_v23  ;;  %v1698_v60 = vsel %vm1634_vm3, %v5684_v2, %v8295_v54  ;;  %v5863_v22 = vadd.f32 0.0001, %v2140_v56  ;;  %v5865_v7 = vadd.f32 0.0001, %v2259_v17  ;;  %v8300_v54 = vld [vmem:[#allocation40_spill] sm:$0xff] }
 0x1ea   :  { %8296 = vst [vmem:[#allocation54_spill] sm:$0xff] %v5861_v47  ;;  %v1696_v11 = vsel %vm1634_vm3, %v5696_v23, %v8294_v46  ;;  %v5871_v59 = vadd.f32 0.0001, %v2260_v30  ;;  %v1639_v2 = vsel %vm1634_vm3, %v5443_v9, %v5741_v57  ;;  %v1699_v56 = vsel %vm1634_vm3, %v5741_v57, %v5443_v9  ;;  %v8298_v23 = vld [vmem:[#allocation73_spill] sm:$0xff]  ;;  %v8299_v46 = vld [vmem:[#allocation72_spill] sm:$0xff]  ;;  %v8302_v57 = vld [vmem:[#allocation75_spill] sm:$0xff] }
 0x1eb   :  { %8297 = vst [vmem:[#allocation154_spill] sm:$0xff] %v5863_v22  ;;  %v1659_v17 = vsel %vm1634_vm3, %v5571_v62, %v1563_v38  ;;  %1484 = vrot.lane.b32.xlu1 %v8211_v53, %s2987_s25  ;;  %v1757_v40 = vadd.f32 %v1636_v14, %v8298_v23  ;;  %v1761_v30 = vadd.f32 %v1638_v58, %v8299_v46  ;;  %v5894_v9 = vadd.f32 0.0001, %v2143_v55  ;;  %v8305_v14 = vld [vmem:[#allocation89_spill] sm:$0xff]  ;;  %v8306_v55 = vld [vmem:[#allocation43_spill] sm:$0xff] }
 0x1ec   :  { %v1762_v22 = vadd.f32 %v1698_v60, %v8300_v54  ;;  %v1719_v47 = vsel %vm1634_vm3, %v1563_v38, %v5571_v62  ;;  %1480 = vrot.lane.b32.xlu0 %v8199_v43, %s2987_s25  ;;  %v1758_v21 = vadd.f32 %v1696_v11, %v8302_v57  ;;  %v1648_v53 = vsel %vm1634_vm3, %v8303_v1, %v5734_v36  ;;  %v5905_v60 = vpop.permute.xlu1 %1428  ;;  %v8304_v62 = vld [vmem:[#allocation79_spill] sm:$0xff]  ;;  %v5913_v46 = vpop.permute.xlu0 %1404 }
 0x1ed   :  { %8301 = vst [vmem:[#allocation192_spill] sm:$0xff] %v5894_v9  ;;  %v1708_v58 = vsel %vm1634_vm3, %v5734_v36, %v8303_v1  ;;  %v1763_v38 = vadd.f32 %v1639_v2, %v8304_v62  ;;  %v1764_v43 = vadd.f32 %v1699_v56, %v8305_v14  ;;  %v1803_v23 = vadd.f32 %v1659_v17, %v8306_v55  ;;  %v8309_v9 = vld [vmem:[#allocation33_spill] sm:$0xff]  ;;  %v8310_v2 = vld [vmem:[#allocation115_spill] sm:$0xff]  ;;  %v8311_v14 = vld [vmem:[#allocation34_spill] sm:$0xff] }
 0x1ee   :  { %v1661_v11 = vsel %vm1634_vm3, %v5556_v27, %v1567_v5  ;;  %v5915_v54 = vadd.f32 0.0001, %v2144_v52  ;;  %v5917_v57 = vadd.f32 0.0001, %v2263_v18  ;;  %v1804_v36 = vadd.f32 %v1719_v47, %v8309_v9  ;;  %v8312_v18 = vld [vmem:[#allocation93_spill] sm:$0xff]  ;;  %v8313_v47 = vld [vmem:[#allocation94_spill] sm:$0xff] }
 0x1ef   :  { %v1721_v1 = vsel %vm1634_vm3, %v1567_v5, %v5556_v27  ;;  %1560 = vrot.lane.b32.xlu1 %v8310_v2, %s2987_s25  ;;  %v5925_v56 = vmul.f32 0.11111111, %v1757_v40  ;;  %v5927_v17 = vmul.f32 0.11111111, %v1761_v30  ;;  %v5929_v62 = vmul.f32 0.11111111, %v1762_v22 }
 0x1f0   :  { %8307 = vst [vmem:[#allocation157_spill] sm:$0xff] %v5915_v54  ;;  %8308 = vst [vmem:[#allocation162_spill] sm:$0xff] %v5917_v57  ;;  %v1807_v52 = vadd.f32 %v1661_v11, %v8311_v14  ;;  %1536 = vrot.lane.b32.xlu0 %v8312_v18, %s2987_s25  ;;  %v1878_v55 = vmul.f32 0.11111111, %v1758_v21  ;;  %v1781_v9 = vadd.f32 %v1648_v53, %v8313_v47  ;;  %v8314_v54 = vld [vmem:[#allocation25_spill] sm:$0xff]  ;;  %v8315_v27 = vld [vmem:[#allocation118_spill] sm:$0xff]  ;;  %v5937_v24 = vpop.permute.xlu1 %1448  ;;  %v5946_v2 = vpop.permute.xlu0 %1444 }
 0x1f1   :  { %v1782_v57 = vadd.f32 %v1708_v58, %v8314_v54  ;;  %v1808_v5 = vadd.f32 %v1721_v1, %v8315_v27  ;;  %v5939_v40 = vmul.f32 0.11111111, %v1763_v38  ;;  %v5941_v30 = vmul.f32 0.11111111, %v1764_v43  ;;  %v8316_v58 = vld [vmem:[#allocation27_spill] sm:$0xff]  ;;  %v8317_v43 = vld [vmem:[#allocation134_spill] sm:$0xff] }
 0x1f2   :  { %v1923_v22 = vmul.f32 0.11111111, %v1803_v23  ;;  %v1671_v11 = vsel %vm1634_vm3, %v5636_v45, %v1587_v33  ;;  %v1924_v21 = vmul.f32 0.11111111, %v1804_v36  ;;  %v1731_v53 = vsel %vm1634_vm3, %v1587_v33, %v5636_v45  ;;  %v8318_v45 = vld [vmem:[#allocation131_spill] sm:$0xff] }
 0x1f3   :  { %v1827_v54 = vadd.f32 %v1671_v11, %v8316_v58  ;;  %v1673_v38 = vsel %vm1634_vm3, %v5621_v16, %v1591_v63  ;;  %1580 = vrot.lane.b32.xlu1 %v8317_v43, %s2987_s25  ;;  %v1927_v23 = vmul.f32 0.11111111, %v1807_v52  ;;  %v1828_v1 = vadd.f32 %v1731_v53, %v5431_v19 }
 0x1f4   :  { %v1733_v36 = vsel %vm1634_vm3, %v1591_v63, %v5621_v16  ;;  %v1831_v14 = vadd.f32 %v1673_v38, %v5446_v31  ;;  %1576 = vrot.lane.b32.xlu0 %v8318_v45, %s2987_s25  ;;  %v1901_v33 = vmul.f32 0.11111111, %v1781_v9  ;;  %v1928_v18 = vmul.f32 0.11111111, %v1808_v5  ;;  %v5965_v11 = vpop.permute.xlu1 %1468  ;;  %v5971_v63 = vpop.permute.xlu0 %1450 }
 0x1f5   :  { %v1947_v47 = vmul.f32 0.11111111, %v1827_v54  ;;  %v1832_v27 = vadd.f32 %v1733_v36, %v5449_v26  ;;  %v1902_v58 = vmul.f32 0.11111111, %v1782_v57  ;;  %v1650_v19 = vsel %vm1634_vm3, %v5508_v8, %v5777_v15  ;;  %v8321_v36 = vld [vmem:[#allocation97_spill] sm:$0xff] }
 0x1f6   :  { %v1948_v52 = vmul.f32 0.11111111, %v1828_v1  ;;  %v1951_v16 = vmul.f32 0.11111111, %v1831_v14  ;;  %v1710_v31 = vsel %vm1634_vm3, %v5777_v15, %v5508_v8  ;;  %v2067_v9 = vsub.f32 %v1923_v22, %v5794_v6  ;;  %v8319_v8 = vld [vmem:[#allocation24_spill] sm:$0xff] }
 0x1f7   :  { %v2091_v26 = vsub.f32 %v1947_v47, %v5775_v29  ;;  %v1952_v5 = vmul.f32 0.11111111, %v1832_v27  ;;  %1604 = vrot.lane.b32.xlu1 %v8213_v61, %s2987_s25  ;;  %v2068_v57 = vsub.f32 %v1924_v21, %v5814_v12  ;;  %v2071_v53 = vsub.f32 %v1927_v23, %v5818_v34  ;;  %v8320_v34 = vld [vmem:[#allocation95_spill] sm:$0xff] }
 0x1f8   :  { %v2092_v54 = vsub.f32 %v1948_v52, %v5790_v41  ;;  %v2095_v38 = vsub.f32 %v1951_v16, %v5800_v51  ;;  %1600 = vrot.lane.b32.xlu0 %v8201_v4, %s2987_s25  ;;  %v1785_v15 = vadd.f32 %v1650_v19, %v8319_v8  ;;  %v2072_v6 = vsub.f32 %v1928_v18, %v5830_v42  ;;  %v5992_v61 = vpop.permute.xlu1 %1474  ;;  %v6002_v4 = vpop.permute.xlu0 %1472  ;;  %v8322_v18 = vld [vmem:[#allocation61_spill] sm:$0xff] }
 0x1f9   :  { %v5989_v29 = vadd.f32 %v2091_v26, %v2067_v9  ;;  %v2096_v22 = vsub.f32 %v1952_v5, %v5816_v10  ;;  %v5995_v12 = vadd.f32 0.0001, %v5847_v37  ;;  %v1786_v41 = vadd.f32 %v1710_v31, %v8320_v34 }
 0x1fa   :  { %v5998_v21 = vadd.f32 %v2092_v54, %v2068_v57  ;;  %v6000_v51 = vadd.f32 %v2095_v38, %v2071_v53  ;;  %v6006_v42 = vmul.f32 %v5925_v56, %v5925_v56  ;;  %v6010_v10 = vmul.f32 %v5927_v17, %v5927_v17  ;;  %v8326_v53 = vld [vmem:[#allocation127_spill] sm:$0xff]  ;;  %v8327_v38 = vld [vmem:[#allocation78_spill] sm:$0xff] }
 0x1fb   :  { %v6014_v37 = vmul.f32 %v5929_v62, %v5929_v62  ;;  %v6016_v43 = vadd.f32 %v2096_v22, %v2072_v6  ;;  %1494 = vrot.lane.b32.xlu1 %v8247_v32, %s2987_s25  ;;  %v6020_v23 = vmul.f32 %v1878_v55, %v1878_v55  ;;  %v6024_v1 = vmul.f32 %v5939_v40, %v5939_v40 }
 0x1fc   :  { %v1651_v14 = vsel %vm1634_vm3, %v8321_v36, %v5769_v25  ;;  %v1711_v45 = vsel %vm1634_vm3, %v5769_v25, %v8321_v36  ;;  %1490 = vrot.lane.b32.xlu0 %v8322_v18, %s2987_s25  ;;  %v6038_v32 = vmul.f32 %v5941_v30, %v5941_v30  ;;  %v6041_v47 = vmul.f32 %v1901_v33, %v5925_v56  ;;  %v1549_v52 = vpop.permute.xlu1 %1548  ;;  %v1525_v9 = vpop.permute.xlu0 %1524  ;;  %v8325_v56 = vld [vmem:[#allocation92_spill] sm:$0xff] }
 0x1fd   :  { %v6043_v27 = vmul.f32 %v1902_v58, %v1878_v55  ;;  %v1905_v19 = vmul.f32 0.11111111, %v1785_v15  ;;  %v6045_v16 = vmul.f32 %v1901_v33, %v1901_v33  ;;  %v1906_v31 = vmul.f32 0.11111111, %v1786_v41  ;;  %v8329_v15 = vld [vmem:[#allocation98_spill] sm:$0xff] }
 0x1fe   :  { %8323 = vst [vmem:[#allocation194_spill] sm:$0xff] %v6041_v47  ;;  %v1652_v25 = vsel %vm1634_vm3, %v5905_v60, %v1549_v52  ;;  %v1712_v26 = vsel %vm1634_vm3, %v1549_v52, %v5905_v60  ;;  %v6053_v5 = vmul.f32 %v1902_v58, %v1902_v58  ;;  %v1787_v57 = vadd.f32 %v1651_v14, %v8325_v56  ;;  %v8328_v60 = vld [vmem:[#allocation82_spill] sm:$0xff] }
 0x1ff   :  { %8324 = vst [vmem:[#allocation193_spill] sm:$0xff] %v6043_v27  ;;  %v1640_v55 = vsel %vm1634_vm3, %v5913_v46, %v1525_v9  ;;  %v1700_v33 = vsel %vm1634_vm3, %v1525_v9, %v5913_v46  ;;  %1614 = vrot.lane.b32.xlu1 %v8249_v28, %s2987_s25  ;;  %v1788_v54 = vadd.f32 %v1711_v45, %v8326_v53  ;;  %v2141_v22 = vmul.f32 2.0, %v6041_v47  ;;  %v8331_v28 = vld [vmem:[#allocation99_spill] sm:$0xff] }
 0x200   :  { %v1765_v8 = vadd.f32 %v1640_v55, %v8327_v38  ;;  %v1766_v58 = vadd.f32 %v1700_v33, %v8328_v60  ;;  %v1789_v6 = vadd.f32 %v1652_v25, %v8329_v15  ;;  %1610 = vrot.lane.b32.xlu0 %v8241_v3, %s2987_s25  ;;  %v6072_v34 = vmul.f32 2.0, %v6043_v27  ;;  %v1569_v36 = vpop.permute.xlu1 %1568  ;;  %v1565_v9 = vpop.permute.xlu0 %1564  ;;  %v8336_v38 = vld [vmem:[#allocation47_spill] sm:$0xff]  ;;  %v8339_v60 = vld [vmem:[#allocation32_spill] sm:$0xff]  ;;  %v8340_v15 = vld [vmem:[#allocation110_spill] sm:$0xff] }
 0x201   :  { %v6075_v46 = vmul.f32 %v1905_v19, %v5927_v17  ;;  %v1790_v41 = vadd.f32 %v1712_v26, %v8331_v28  ;;  %v6079_v14 = vmul.f32 %v1906_v31, %v5929_v62  ;;  %v1660_v3 = vsel %vm1634_vm3, %v5946_v2, %v1565_v9  ;;  %v8333_v62 = vld [vmem:[#allocation59_spill] sm:$0xff] }
 0x202   :  { %v1885_v45 = vmul.f32 0.11111111, %v1765_v8  ;;  %v1886_v18 = vmul.f32 0.11111111, %v1766_v58  ;;  %v1909_v52 = vmul.f32 0.11111111, %v1789_v6  ;;  %v1720_v17 = vsel %vm1634_vm3, %v1565_v9, %v5946_v2 }
 0x203   :  { %8330 = vst [vmem:[#allocation160_spill] sm:$0xff] %v6075_v46  ;;  %8332 = vst [vmem:[#allocation56_spill] sm:$0xff] %v6079_v14  ;;  %v1910_v25 = vmul.f32 0.11111111, %v1790_v41  ;;  %v1662_v26 = vsel %vm1634_vm3, %v5937_v24, %v1569_v36  ;;  %1488 = vrot.lane.b32.xlu1 %v8333_v62, %s2987_s25  ;;  %v1805_v58 = vadd.f32 %v1660_v3, %v8339_v60  ;;  %v6108_v41 = vmul.f32 0.11111111, %v1787_v57 }
 0x204   :  { %v6092_v56 = vmul.f32 %v1885_v45, %v1885_v45  ;;  %v6094_v55 = vmul.f32 %v1886_v18, %v1886_v18  ;;  %v6096_v33 = vmul.f32 %v1909_v52, %v1885_v45  ;;  %v6098_v53 = vmul.f32 %v1909_v52, %v1909_v52  ;;  %1464 = vrot.lane.b32.xlu0 %v8336_v38, %s2987_s25  ;;  %v1589_v28 = vpop.permute.xlu1 %1588  ;;  %v8342_v9 = vld [vmem:[#allocation96_spill] sm:$0xff]  ;;  %v1571_v62 = vpop.permute.xlu0 %1570  ;;  %v8344_v38 = vld [vmem:[#allocation161_spill] sm:$0xff] }
 0x205   :  { %v6102_v8 = vmul.f32 %v1910_v25, %v1886_v18  ;;  %v6104_v2 = vmul.f32 %v1910_v25, %v1910_v25  ;;  %v1806_v6 = vadd.f32 %v1720_v17, %v8340_v15  ;;  %v1722_v52 = vsel %vm1634_vm3, %v1569_v36, %v5937_v24  ;;  %v8346_v15 = vld [vmem:[#allocation138_spill] sm:$0xff] }
 0x206   :  { %8334 = vst [vmem:[#allocation158_spill] sm:$0xff] %v6096_v33  ;;  %8335 = vst [vmem:[#allocation23_spill] sm:$0xff] %v6098_v53  ;;  %v6112_v45 = vadd.f32 %v6098_v53, %v6092_v56  ;;  %v1809_v18 = vadd.f32 %v1662_v26, %v8342_v9  ;;  %v6120_v25 = vadd.f32 %v6045_v16, %v6006_v42  ;;  %v1925_v17 = vmul.f32 0.11111111, %v1805_v58  ;;  %v8347_v58 = vld [vmem:[#allocation117_spill] sm:$0xff] }
 0x207   :  { %8337 = vst [vmem:[#allocation164_spill] sm:$0xff] %v6102_v8  ;;  %8338 = vst [vmem:[#allocation58_spill] sm:$0xff] %v6104_v2  ;;  %v6124_v3 = vadd.f32 %v6053_v5, %v6020_v23  ;;  %v6128_v57 = vadd.f32 %v6104_v2, %v6094_v55  ;;  %1608 = vrot.lane.b32.xlu1 %v8344_v38, %s2987_s25  ;;  %v6132_v24 = vadd.f32 0.0001, %v2141_v22  ;;  %v1926_v60 = vmul.f32 0.11111111, %v1806_v6 }
 0x208   :  { %8341 = vst [vmem:[#allocation166_spill] sm:$0xff] %v6112_v45  ;;  %v2049_v36 = vmul.f32 %v1905_v19, %v1905_v19  ;;  %v6134_v26 = vmul.f32 %v1906_v31, %v1906_v31  ;;  %1584 = vrot.lane.b32.xlu0 %v8346_v15, %s2987_s25  ;;  %v6139_v9 = vmul.f32 2.0, %v6075_v46  ;;  %v6142_v27 = vmul.f32 2.0, %v6079_v14  ;;  %v1595_v38 = vpop.permute.xlu1 %1594  ;;  %v1593_v15 = vpop.permute.xlu0 %1592  ;;  %v8348_v14 = vld [vmem:[#allocation16_spill] sm:$0xff] }
 0x209   :  { %8343 = vst [vmem:[#allocation21_spill] sm:$0xff] %v6128_v57  ;;  %8345 = vst [vmem:[#allocation163_spill] sm:$0xff] %v6132_v24  ;;  %v6144_v47 = vmul.f32 0.11111111, %v1788_v54  ;;  %v1810_v57 = vadd.f32 %v1722_v52, %v8347_v58  ;;  %v6149_v19 = vmul.f32 %v6108_v41, %v6108_v41  ;;  %v1929_v31 = vmul.f32 0.11111111, %v1809_v18 }
 0x20a   :  { %v1663_v22 = vsel %vm1634_vm3, %v5971_v63, %v1571_v62  ;;  %v1723_v6 = vsel %vm1634_vm3, %v1571_v62, %v5971_v63  ;;  %v2069_v54 = vsub.f32 %v1925_v17, %v6006_v42  ;;  %v1672_v52 = vsel %vm1634_vm3, %v5965_v11, %v1589_v28  ;;  %v8349_v24 = vld [vmem:[#allocation39_spill] sm:$0xff] }
 0x20b   :  { %v1811_v46 = vadd.f32 %v1663_v22, %v8348_v14  ;;  %v1732_v18 = vsel %vm1634_vm3, %v1589_v28, %v5965_v11  ;;  %1496 = vrot.lane.b32.xlu1 %v8243_v13, %s2987_s25  ;;  %v2070_v58 = vsub.f32 %v1926_v60, %v6020_v23  ;;  %v1829_v63 = vadd.f32 %v1672_v52, %v8349_v24  ;;  %v8350_v62 = vld [vmem:[#allocation123_spill] sm:$0xff]  ;;  %v8351_v14 = vld [vmem:[#allocation60_spill] sm:$0xff]  ;;  %v8352_v22 = vld [vmem:[#allocation121_spill] sm:$0xff] }
 0x20c   :  { %v1830_v2 = vadd.f32 %v1732_v18, %v8350_v62  ;;  %v1674_v42 = vsel %vm1634_vm3, %v6002_v4, %v1593_v15  ;;  %1492 = vrot.lane.b32.xlu0 %v8351_v14, %s2987_s25  ;;  %v1930_v17 = vmul.f32 0.11111111, %v1810_v57  ;;  %v1812_v45 = vadd.f32 %v1723_v6, %v8352_v22  ;;  %v8353_v11 = vld [vmem:[#allocation41_spill] sm:$0xff]  ;;  %v6180_v28 = vpop.permute.xlu1 %1410  ;;  %v8354_v52 = vld [vmem:[#allocation130_spill] sm:$0xff]  ;;  %v6186_v14 = vpop.permute.xlu0 %1406 }
 0x20d   :  { %v1734_v13 = vsel %vm1634_vm3, %v1593_v15, %v6002_v4  ;;  %v1833_v23 = vadd.f32 %v1674_v42, %v8353_v11  ;;  %v1949_v24 = vmul.f32 0.11111111, %v1829_v63  ;;  %v1675_v62 = vsel %vm1634_vm3, %v5992_v61, %v1595_v38  ;;  %v8355_v15 = vld [vmem:[#allocation165_spill] sm:$0xff] }
 0x20e   :  { %v1950_v60 = vmul.f32 0.11111111, %v1830_v2  ;;  %v1834_v18 = vadd.f32 %v1734_v13, %v8354_v52  ;;  %v2073_v57 = vsub.f32 %v1929_v31, %v6010_v10  ;;  %v1931_v6 = vmul.f32 0.11111111, %v1811_v46  ;;  %v8356_v13 = vld [vmem:[#allocation77_spill] sm:$0xff] }
 0x20f   :  { %v1953_v22 = vmul.f32 0.11111111, %v1833_v23  ;;  %v1735_v4 = vsel %vm1634_vm3, %v1595_v38, %v5992_v61  ;;  %1612 = vrot.lane.b32.xlu1 %v8355_v15, %s2987_s25  ;;  %v2093_v2 = vsub.f32 %v1949_v24, %v6045_v16  ;;  %v1835_v11 = vadd.f32 %v1675_v62, %v8356_v13  ;;  %v8357_v52 = vld [vmem:[#allocation133_spill] sm:$0xff] }
 0x210   :  { %v2094_v63 = vsub.f32 %v1950_v60, %v6053_v5  ;;  %v1954_v42 = vmul.f32 0.11111111, %v1834_v18  ;;  %1498 = vrot.lane.b32.xlu0 %v8251_v44, %s2987_s25  ;;  %v2074_v46 = vsub.f32 %v1930_v17, %v6014_v37  ;;  %v1932_v31 = vmul.f32 0.11111111, %v1812_v45  ;;  %v6201_v61 = vpop.permute.xlu1 %1434  ;;  %v6208_v24 = vpop.permute.xlu0 %1430 }
 0x211   :  { %v2097_v23 = vsub.f32 %v1953_v22, %v2049_v36  ;;  %v1836_v53 = vadd.f32 %v1735_v4, %v8357_v52  ;;  %v6203_v38 = vadd.f32 %v2093_v2, %v2069_v54  ;;  %v1955_v5 = vmul.f32 0.11111111, %v1835_v11  ;;  %v8369_v52 = vld [vmem:[#allocation162_spill] sm:$0xff] }
 0x212   :  { %v6205_v15 = vadd.f32 %v2094_v63, %v2070_v58  ;;  %v2098_v16 = vsub.f32 %v1954_v42, %v6134_v26  ;;  %v2265_v60 = vadd.f32 %v2049_v36, %v6010_v10  ;;  %v2052_v44 = vmul.f32 %v6144_v47, %v6144_v47 }
 0x213   :  { %v6213_v45 = vadd.f32 %v2097_v23, %v2073_v57  ;;  %v1956_v17 = vmul.f32 0.11111111, %v1836_v53  ;;  %1618 = vrot.lane.b32.xlu1 %v8257_v35, %s2987_s25  ;;  %v6219_v54 = vmul.f32 %v6108_v41, %v5939_v40  ;;  %v2075_v58 = vsub.f32 %v1931_v6, %v6024_v1  ;;  %v8368_v23 = vld [vmem:[#allocation67_spill] sm:$0xff] }
 0x214   :  { %v6222_v18 = vadd.f32 %v2098_v16, %v2074_v46  ;;  %v2099_v62 = vsub.f32 %v1955_v5, %v6149_v19  ;;  %1616 = vrot.lane.b32.xlu0 %v8245_v39, %s2987_s25  ;;  %v2266_v10 = vadd.f32 %v6134_v26, %v6014_v37  ;;  %v2331_v53 = vadd.f32 0.0009, %v5989_v29  ;;  %v6231_v57 = vpop.permute.xlu1 %1476  ;;  %v6243_v22 = vpop.permute.xlu0 %1452 }
 0x215   :  { %8358 = vst [vmem:[#allocation31_spill] sm:$0xff] %v6219_v54  ;;  %v2076_v35 = vsub.f32 %v1932_v31, %v6038_v32  ;;  %v2100_v36 = vsub.f32 %v1956_v17, %v2052_v44  ;;  %v6234_v40 = vadd.f32 0.0001, %v6072_v34  ;;  %v6238_v41 = vmul.f32 %v6144_v47, %v5941_v30  ;;  %v8361_v30 = vld [vmem:[#allocation187_spill] sm:$0xff] }
 0x216   :  { %v2332_v6 = vadd.f32 0.0009, %v5998_v21  ;;  %v6241_v39 = vadd.f32 %v2099_v62, %v2075_v58  ;;  %v6246_v29 = vadd.f32 0.0001, %v6120_v25  ;;  %v6249_v37 = vadd.f32 0.0001, %v6124_v3 }
 0x217   :  { %8359 = vst [vmem:[#allocation168_spill] sm:$0xff] %v6238_v41  ;;  %v6252_v26 = vadd.f32 0.0001, %v6139_v9  ;;  %v6254_v34 = vadd.f32 %v2100_v36, %v2076_v35  ;;  %1620 = vrot.lane.b32.xlu1 %v8255_v49, %s2987_s25  ;;  %v6260_v21 = vadd.f32 %v5808_v0, %v8361_v30  ;;  %v6263_v47 = vadd.f32 0.0001, %v6142_v27  ;;  %v8367_v31 = vld [vmem:[#allocation91_spill] sm:$0xff] }
 0x218   :  { %v6265_v25 = vadd.f32 0.0001, %v2265_v60  ;;  %v2147_v3 = vmul.f32 2.0, %v6219_v54  ;;  %1500 = vrot.lane.b32.xlu0 %v8253_v50, %s2987_s25  ;;  %v6270_v9 = vadd.f32 0.0001, %v2266_v10  ;;  %v2355_v4 = vmul.f32 %v2331_v53, %v5865_v7  ;;  %v1531_v0 = vpop.permute.xlu1 %1530  ;;  %v1527_v42 = vpop.permute.xlu0 %1526  ;;  %v8371_v36 = vld [vmem:[#allocation183_spill] sm:$0xff] }
 0x219   :  { %8360 = vst [vmem:[#allocation76_spill] sm:$0xff] %v6252_v26  ;;  %8362 = vst [vmem:[#allocation171_spill] sm:$0xff] %v6260_v21  ;;  %v2335_v49 = vadd.f32 0.0009, %v6000_v51  ;;  %v2336_v2 = vadd.f32 0.0009, %v6016_v43  ;;  %v2356_v27 = vmul.f32 %v2332_v6, %v5871_v59  ;;  %v1643_v13 = vsel %vm1634_vm3, %v6180_v28, %v1531_v0 }
 0x21a   :  { %8363 = vst [vmem:[#allocation173_spill] sm:$0xff] %v6263_v47  ;;  %v6276_v63 = vmul.f32 2.0, %v6238_v41  ;;  %v1703_v50 = vsel %vm1634_vm3, %v1531_v0, %v6180_v28  ;;  %v6287_v7 = vadd.f32 %v6149_v19, %v6024_v1  ;;  %v6290_v51 = vadd.f32 %v2052_v44, %v6038_v32  ;;  %v8365_v28 = vld [vmem:[#allocation86_spill] sm:$0xff]  ;;  %v8366_v1 = vld [vmem:[#allocation20_spill] sm:$0xff] }
 0x21b   :  { %v1641_v59 = vsel %vm1634_vm3, %v6186_v14, %v1527_v42  ;;  %v1701_v43 = vsel %vm1634_vm3, %v1527_v42, %v6186_v14  ;;  %1506 = vrot.lane.b32.xlu1 %v8272_v48, %s2987_s25  ;;  %v6300_v11 = vadd.f32 0.0001, %v2147_v3  ;;  %v1771_v32 = vadd.f32 %v1643_v13, %v8367_v31  ;;  %v8370_v14 = vld [vmem:[#allocation90_spill] sm:$0xff]  ;;  %v8454_v26 = vld [vmem:[#allocation124_spill] sm:$0xff] }
 0x21c   :  { %v1767_v46 = vadd.f32 %v1641_v59, %v8365_v28  ;;  %v1768_v19 = vadd.f32 %v1701_v43, %v8366_v1  ;;  %1502 = vrot.lane.b32.xlu0 %v8368_v23, %s2987_s25  ;;  %2760 = vrcp.f32 %v2355_v4  ;;  %v2359_v16 = vmul.f32 %v2335_v49, %v8369_v52  ;;  %v1555_v44 = vpop.permute.xlu1 %1554  ;;  %v1551_v58 = vpop.permute.xlu0 %1550  ;;  %v8375_v42 = vld [vmem:[#allocation30_spill] sm:$0xff] }
 0x21d   :  { %8364 = vst [vmem:[#allocation172_spill] sm:$0xff] %v6300_v11  ;;  %v2360_v5 = vmul.f32 %v2336_v2, %v5995_v12  ;;  %v1772_v60 = vadd.f32 %v1703_v50, %v8370_v14  ;;  %2762 = vrcp.f32 %v2356_v27  ;;  %v1655_v62 = vsel %vm1634_vm3, %v6201_v61, %v1555_v44  ;;  %v8373_v2 = vld [vmem:[#allocation178_spill] sm:$0xff]  ;;  %v8374_v27 = vld [vmem:[#allocation35_spill] sm:$0xff] }
 0x21e   :  { %v1887_v48 = vmul.f32 0.11111111, %v1767_v46  ;;  %v1888_v17 = vmul.f32 0.11111111, %v1768_v19  ;;  %v2333_v10 = vadd.f32 0.0009, %v6203_v38  ;;  %v1653_v53 = vsel %vm1634_vm3, %v6208_v24, %v1551_v58 }
 0x21f   :  { %v1713_v12 = vsel %vm1634_vm3, %v1551_v58, %v6208_v24  ;;  %v1715_v35 = vsel %vm1634_vm3, %v1555_v44, %v6201_v61  ;;  %1626 = vrot.lane.b32.xlu1 %v8371_v36, %s2987_s25  ;;  %v2334_v6 = vadd.f32 0.0009, %v6205_v15  ;;  %v1891_v3 = vmul.f32 0.11111111, %v1771_v32  ;;  %v8372_v38 = vld [vmem:[#allocation105_spill] sm:$0xff]  ;;  %v8376_v50 = vld [vmem:[#allocation106_spill] sm:$0xff] }
 0x220   :  { %v1892_v4 = vmul.f32 0.11111111, %v1772_v60  ;;  %v1791_v49 = vadd.f32 %v1653_v53, %v8372_v38  ;;  %1622 = vrot.lane.b32.xlu0 %v8373_v2, %s2987_s25  ;;  %v6329_v0 = vmul.f32 %v1887_v48, %v1887_v48  ;;  %v1792_v24 = vadd.f32 %v1713_v12, %v8374_v27  ;;  %v1597_v59 = vpop.permute.xlu1 %1596  ;;  %v1573_v15 = vpop.permute.xlu0 %1572  ;;  %v8378_v44 = vld [vmem:[#allocation71_spill] sm:$0xff]  ;;  %v8383_v27 = vld [vmem:[#allocation68_spill] sm:$0xff] }
 0x221   :  { %v1795_v13 = vadd.f32 %v1655_v62, %v8375_v42  ;;  %v1796_v61 = vadd.f32 %v1715_v35, %v8376_v50  ;;  %v6334_v43 = vmul.f32 %v1888_v17, %v1888_v17  ;;  %v1676_v46 = vsel %vm1634_vm3, %v6231_v57, %v1597_v59  ;;  %v8384_v50 = vld [vmem:[#allocation66_spill] sm:$0xff] }
 0x222   :  { %v1911_v28 = vmul.f32 0.11111111, %v1791_v49  ;;  %v1736_v1 = vsel %vm1634_vm3, %v1597_v59, %v6231_v57  ;;  %v1912_v19 = vmul.f32 0.11111111, %v1792_v24  ;;  %v1664_v23 = vsel %vm1634_vm3, %v6243_v22, %v1573_v15 }
 0x223   :  { %v1915_v31 = vmul.f32 0.11111111, %v1795_v13  ;;  %v1916_v32 = vmul.f32 0.11111111, %v1796_v61  ;;  %1630 = vrot.lane.b32.xlu1 %v8361_v30, %s2987_s25  ;;  %v6347_v52 = vmul.f32 %v1891_v3, %v1891_v3  ;;  %v1724_v57 = vsel %vm1634_vm3, %v1573_v15, %v6243_v22 }
 0x224   :  { %v6349_v14 = vmul.f32 %v1911_v28, %v1887_v48  ;;  %v6351_v60 = vmul.f32 %v1911_v28, %v1911_v28  ;;  %1510 = vrot.lane.b32.xlu0 %v8378_v44, %s2987_s25  ;;  %v6358_v58 = vmul.f32 %v1912_v19, %v1888_v17  ;;  %v6360_v62 = vmul.f32 %v1912_v19, %v1912_v19  ;;  %v6366_v12 = vpop.permute.xlu1 %1438  ;;  %v6378_v17 = vpop.permute.xlu0 %1414  ;;  %v8385_v28 = vld [vmem:[#allocation17_spill] sm:$0xff] }
 0x225   :  { %v6362_v53 = vmul.f32 %v1915_v31, %v1891_v3  ;;  %v6364_v30 = vmul.f32 %v1916_v32, %v1892_v4  ;;  %v6368_v48 = vmul.f32 %v1892_v4, %v1892_v4  ;;  %v6374_v22 = vmul.f32 %v1915_v31, %v1915_v31  ;;  %v8382_v4 = vld [vmem:[#allocation114_spill] sm:$0xff]  ;;  %v8386_v31 = vld [vmem:[#allocation128_spill] sm:$0xff] }
 0x226   :  { %8377 = vst [vmem:[#allocation167_spill] sm:$0xff] %v6349_v14  ;;  %8379 = vst [vmem:[#allocation63_spill] sm:$0xff] %v6358_v58  ;;  %v6372_v35 = vadd.f32 %v6351_v60, %v6329_v0  ;;  %v6376_v36 = vmul.f32 %v1916_v32, %v1916_v32  ;;  %v6380_v38 = vpop.eup %2760  ;;  %2764 = vrcp.f32 %v2359_v16  ;;  %v2337_v3 = vadd.f32 0.0009, %v6213_v45 }
 0x227   :  { %8380 = vst [vmem:[#allocation170_spill] sm:$0xff] %v6362_v53  ;;  %8381 = vst [vmem:[#allocation62_spill] sm:$0xff] %v6364_v30  ;;  %v6385_v49 = vadd.f32 %v6360_v62, %v6334_v43  ;;  %v1813_v2 = vadd.f32 %v1664_v23, %v8382_v4  ;;  %1508 = vrot.lane.b32.xlu1 %v8383_v27, %s2987_s25  ;;  %v6390_v24 = vpop.eup %2762  ;;  %v2357_v42 = vmul.f32 %v2333_v10, %v6246_v29  ;;  %v8387_v4 = vld [vmem:[#allocation74_spill] sm:$0xff] }
 0x228   :  { %v2338_v13 = vadd.f32 0.0009, %v6222_v18  ;;  %v6396_v16 = vadd.f32 %v6374_v22, %v6347_v52  ;;  %v6400_v45 = vadd.f32 %v6376_v36, %v6368_v48  ;;  %1504 = vrot.lane.b32.xlu0 %v8384_v50, %s2987_s25  ;;  %v2291_v61 = vadd.f32 0.0001, %v6287_v7  ;;  %v6407_v10 = vpop.permute.xlu1 %1458  ;;  %v6413_v23 = vpop.permute.xlu0 %1454 }
 0x229   :  { %2766 = vrcp.f32 %v2360_v5  ;;  %v2339_v59 = vadd.f32 0.0009, %v6241_v39  ;;  %v1814_v29 = vadd.f32 %v1724_v57, %v8385_v28  ;;  %v2149_v18 = vmul.f32 2.0, %v6096_v33  ;;  %v8388_v57 = vld [vmem:[#allocation182_spill] sm:$0xff] }
 0x22a   :  { %v2150_v15 = vmul.f32 2.0, %v6102_v8  ;;  %v2358_v19 = vmul.f32 %v2334_v6, %v6249_v37  ;;  %v1837_v32 = vadd.f32 %v1676_v46, %v8386_v31  ;;  %v2361_v44 = vmul.f32 %v2337_v3, %v6265_v25  ;;  %v8389_v37 = vld [vmem:[#allocation179_spill] sm:$0xff]  ;;  %v8395_v31 = vld [vmem:[#allocation186_spill] sm:$0xff] }
 0x22b   :  { %v1933_v7 = vmul.f32 0.11111111, %v1813_v2  ;;  %v1934_v5 = vmul.f32 0.11111111, %v1814_v29  ;;  %v1838_v39 = vadd.f32 %v1736_v1, %v8387_v4  ;;  %1628 = vrot.lane.b32.xlu1 %v8388_v57, %s2987_s25  ;;  %2768 = vrcp.f32 %v2357_v42 }
 0x22c   :  { %v2362_v27 = vmul.f32 %v2338_v13, %v6270_v9  ;;  %v2340_v50 = vadd.f32 0.0009, %v6254_v34  ;;  %v1957_v28 = vmul.f32 0.11111111, %v1837_v32  ;;  %1624 = vrot.lane.b32.xlu0 %v8389_v37, %s2987_s25  ;;  %v2363_v6 = vmul.f32 %v2339_v59, %v2291_v61  ;;  %v6425_v2 = vpop.permute.xlu1 %1482  ;;  %v8391_v9 = vld [vmem:[#allocation23_spill] sm:$0xff]  ;;  %v6432_v13 = vpop.permute.xlu0 %1478  ;;  %v8393_v61 = vld [vmem:[#allocation166_spill] sm:$0xff] }
 0x22d   :  { %v2077_v46 = vsub.f32 %v1933_v7, %v6092_v56  ;;  %v2078_v25 = vsub.f32 %v1934_v5, %v6094_v55  ;;  %v1958_v3 = vmul.f32 0.11111111, %v1838_v39  ;;  %v6428_v1 = vadd.f32 0.0001, %v6276_v63  ;;  %v8394_v56 = vld [vmem:[#allocation58_spill] sm:$0xff]  ;;  %v8397_v63 = vld [vmem:[#allocation21_spill] sm:$0xff] }
 0x22e   :  { %v2292_v42 = vadd.f32 0.0001, %v6290_v51  ;;  %2770 = vrcp.f32 %v2358_v19  ;;  %v2101_v34 = vsub.f32 %v1957_v28, %v8391_v9  ;;  %v6434_v29 = vadd.f32 0.0001, %v2149_v18  ;;  %v8398_v19 = vld [vmem:[#allocation70_spill] sm:$0xff] }
 0x22f   :  { %8390 = vst [vmem:[#allocation169_spill] sm:$0xff] %v6428_v1  ;;  %v2293_v59 = vadd.f32 0.0001, %v8393_v61  ;;  %2772 = vrcp.f32 %v2361_v44  ;;  %v2102_v55 = vsub.f32 %v1958_v3, %v8394_v56  ;;  %1632 = vrot.lane.b32.xlu1 %v8395_v31, %s2987_s25  ;;  %v6440_v32 = vadd.f32 0.0001, %v2150_v15  ;;  %v8399_v3 = vld [vmem:[#allocation111_spill] sm:$0xff] }
 0x230   :  { %8392 = vst [vmem:[#allocation65_spill] sm:$0xff] %v6434_v29  ;;  %v2294_v7 = vadd.f32 0.0001, %v8397_v63  ;;  %2774 = vrcp.f32 %v2362_v27  ;;  %v2317_v51 = vadd.f32 %v2101_v34, %v2077_v46  ;;  %1512 = vrot.lane.b32.xlu0 %v8398_v19, %s2987_s25  ;;  %v6445_v5 = vpop.eup %2764  ;;  %v2364_v18 = vmul.f32 %v2340_v50, %v2292_v42  ;;  %v1559_v39 = vpop.permute.xlu1 %1558  ;;  %v8400_v34 = vld [vmem:[#allocation112_spill] sm:$0xff] }
 0x231   :  { %8396 = vst [vmem:[#allocation64_spill] sm:$0xff] %v6440_v32  ;;  %2776 = vrcp.f32 %v2363_v6  ;;  %v2151_v44 = vmul.f32 2.0, %v6349_v14  ;;  %v2318_v4 = vadd.f32 %v2102_v55, %v2078_v25  ;;  %v2152_v57 = vmul.f32 2.0, %v6358_v58  ;;  %v1535_v15 = vpop.permute.xlu0 %1534  ;;  %v8401_v56 = vld [vmem:[#allocation108_spill] sm:$0xff]  ;;  %v8414_v58 = vld [vmem:[#allocation126_spill] sm:$0xff] }
 0x232   :  { %v2341_v28 = vadd.f32 0.0009, %v2317_v51  ;;  %v1657_v27 = vsel %vm1634_vm3, %v6366_v12, %v1559_v39  ;;  %v1717_v37 = vsel %vm1634_vm3, %v1559_v39, %v6366_v12  ;;  %v1645_v6 = vsel %vm1634_vm3, %v6378_v17, %v1535_v15  ;;  %v8402_v12 = vld [vmem:[#allocation45_spill] sm:$0xff] }
 0x233   :  { %v6455_v46 = vpop.eup %2766  ;;  %v2342_v50 = vadd.f32 0.0009, %v2318_v4  ;;  %v1705_v25 = vsel %vm1634_vm3, %v1535_v15, %v6378_v17  ;;  %v1799_v42 = vadd.f32 %v1657_v27, %v8399_v3  ;;  %v1775_v61 = vadd.f32 %v1645_v6, %v8400_v34  ;;  %v6667_v1 = vld [vmem:[#allocation2 + $0x50] sm:$0xff] }
 0x234   :  { %v6464_v9 = vmul.f32 %v2341_v28, %v2293_v59  ;;  %v1776_v55 = vadd.f32 %v1705_v25, %v8401_v56  ;;  %v1800_v31 = vadd.f32 %v1717_v37, %v8402_v12  ;;  %v2155_v63 = vmul.f32 2.0, %v6362_v53  ;;  %v1579_v39 = vpop.permute.xlu1 %1578  ;;  %8438 = vst [vmem:[#allocation33_spill] sm:$0xff] %v6667_v1 }
 0x235   :  { %v2156_v51 = vmul.f32 2.0, %v6364_v30  ;;  %v6471_v19 = vmul.f32 %v2342_v50, %v2294_v7  ;;  %v1919_v4 = vmul.f32 0.11111111, %v1799_v42  ;;  %v6473_v21 = vpop.eup %2768  ;;  %2778 = vrcp.f32 %v2364_v18  ;;  %v1575_v15 = vpop.permute.xlu0 %1574 }
 0x236   :  { %v1895_v17 = vmul.f32 0.11111111, %v1775_v61  ;;  %v1896_v59 = vmul.f32 0.11111111, %v1776_v55  ;;  %v1920_v28 = vmul.f32 0.11111111, %v1800_v31  ;;  %v1665_v37 = vsel %vm1634_vm3, %v6413_v23, %v1575_v15 }
 0x237   :  { %v6475_v27 = vadd.f32 0.0001, %v2151_v44  ;;  %v6477_v6 = vmul.f32 %v1919_v4, %v1919_v4  ;;  %v1725_v7 = vsel %vm1634_vm3, %v1575_v15, %v6413_v23  ;;  %v8407_v61 = vld [vmem:[#allocation120_spill] sm:$0xff]  ;;  %v8408_v55 = vld [vmem:[#allocation26_spill] sm:$0xff]  ;;  %v1667_v23 = vsel %vm1634_vm3, %v6407_v10, %v1579_v39 }
 0x238   :  { %v6485_v50 = vpop.eup %2770  ;;  %v6487_v25 = vmul.f32 %v1895_v17, %v1895_v17  ;;  %v6489_v18 = vmul.f32 %v1896_v59, %v1896_v59  ;;  %v6491_v3 = vmul.f32 %v1919_v4, %v1895_v17  ;;  %v6493_v44 = vmul.f32 %v1920_v28, %v1896_v59  ;;  %v1603_v31 = vpop.permute.xlu1 %1602 }
 0x239   :  { %8403 = vst [vmem:[#allocation175_spill] sm:$0xff] %v6475_v27  ;;  %v6495_v42 = vpop.eup %2772  ;;  %v6497_v34 = vmul.f32 %v1920_v28, %v1920_v28  ;;  %v1815_v56 = vadd.f32 %v1665_v37, %v8407_v61  ;;  %v1816_v12 = vadd.f32 %v1725_v7, %v8408_v55  ;;  %v6506_v30 = vadd.f32 0.0001, %v2152_v57  ;;  %v1599_v28 = vpop.permute.xlu0 %1598  ;;  %v8412_v57 = vld [vmem:[#allocation37_spill] sm:$0xff] }
 0x23a   :  { %8404 = vst [vmem:[#allocation174_spill] sm:$0xff] %v6491_v3  ;;  %8405 = vst [vmem:[#allocation176_spill] sm:$0xff] %v6493_v44  ;;  %v6504_v15 = vpop.eup %2774  ;;  %v6509_v4 = vadd.f32 0.0001, %v6372_v35  ;;  %v2279_v17 = vadd.f32 %v6477_v6, %v6487_v25  ;;  %v1727_v59 = vsel %vm1634_vm3, %v1579_v39, %v6407_v10  ;;  %v1819_v53 = vadd.f32 %v1667_v23, %v8412_v57 }
 0x23b   :  { %8406 = vst [vmem:[#allocation177_spill] sm:$0xff] %v6495_v42  ;;  %8409 = vst [vmem:[#allocation52_spill] sm:$0xff] %v6504_v15  ;;  %v6516_v37 = vpop.eup %2776  ;;  %v2280_v7 = vadd.f32 %v6497_v34, %v6489_v18  ;;  %v1935_v61 = vmul.f32 0.11111111, %v1815_v56  ;;  %v1936_v55 = vmul.f32 0.11111111, %v1816_v12  ;;  %v1820_v14 = vadd.f32 %v1727_v59, %v8414_v58 }
 0x23c   :  { %8410 = vst [vmem:[#allocation180_spill] sm:$0xff] %v6506_v30  ;;  %8411 = vst [vmem:[#allocation181_spill] sm:$0xff] %v6516_v37  ;;  %v6522_v35 = vadd.f32 0.0001, %v6385_v49  ;;  %v6524_v30 = vadd.f32 0.0001, %v2155_v63  ;;  %v6531_v56 = vpop.permute.xlu1 %1412  ;;  %v1677_v49 = vsel %vm1634_vm3, %v6432_v13, %v1599_v28  ;;  %v1737_v63 = vsel %vm1634_vm3, %v1599_v28, %v6432_v13 }
 0x23d   :  { %v2159_v27 = vmul.f32 2.0, %v6491_v3  ;;  %v2160_v10 = vmul.f32 2.0, %v6493_v44  ;;  %v2079_v39 = vsub.f32 %v1935_v61, %v6329_v0  ;;  %v2080_v32 = vsub.f32 %v1936_v55, %v6334_v43  ;;  %v6542_v23 = vpop.permute.xlu0 %1408  ;;  %v8415_v43 = vld [vmem:[#allocation104_spill] sm:$0xff]  ;;  %v8416_v59 = vld [vmem:[#allocation81_spill] sm:$0xff] }
 0x23e   :  { %8413 = vst [vmem:[#allocation69_spill] sm:$0xff] %v6524_v30  ;;  %v1939_v29 = vmul.f32 0.11111111, %v1819_v53  ;;  %v1940_v12 = vmul.f32 0.11111111, %v1820_v14  ;;  %v1679_v58 = vsel %vm1634_vm3, %v6425_v2, %v1603_v31  ;;  %v1839_v53 = vadd.f32 %v1677_v49, %v8415_v43  ;;  %v8419_v28 = vld [vmem:[#allocation132_spill] sm:$0xff] }
 0x23f   :  { %v1840_v14 = vadd.f32 %v1737_v63, %v8416_v59  ;;  %v1739_v61 = vsel %vm1634_vm3, %v1603_v31, %v6425_v2  ;;  %v6550_v55 = vpop.eup %2778  ;;  %v6552_v57 = vadd.f32 0.0001, %v2156_v51  ;;  %v1843_v30 = vadd.f32 %v1679_v58, %v8419_v28  ;;  %v8420_v44 = vld [vmem:[#allocation100_spill] sm:$0xff]  ;;  %v2809_v59 = vld [vmem:[#allocation5] sm:$0xff] }
 0x240   :  { %v2083_v0 = vsub.f32 %v1939_v29, %v6347_v52  ;;  %8417 = vst [vmem:[#allocation184_spill] sm:$0xff] %v6550_v55  ;;  %v2084_v13 = vsub.f32 %v1940_v12, %v6368_v48  ;;  %v1844_v3 = vadd.f32 %v1739_v61, %v8420_v44  ;;  %v2299_v52 = vadd.f32 0.0001, %v6396_v16  ;;  %v6559_v63 = vpop.permute.xlu1 %1436  ;;  %v6661_v37 = vld [vmem:[#allocation2 + $0x48] sm:$0xff] }
 0x241   :  { %8418 = vst [vmem:[#allocation185_spill] sm:$0xff] %v6552_v57  ;;  %2780 = vrcp.f32 %v6464_v9  ;;  %v1959_v29 = vmul.f32 0.11111111, %v1839_v53  ;;  %v1960_v49 = vmul.f32 0.11111111, %v1840_v14  ;;  %v6563_v43 = vpop.permute.xlu0 %1432  ;;  %8436 = vst [vmem:[#allocation89_spill] sm:$0xff] %v6661_v37 }
 0x242   :  { %v2300_v2 = vadd.f32 0.0001, %v6400_v45  ;;  %2782 = vrcp.f32 %v6471_v19  ;;  %v1963_v51 = vmul.f32 0.11111111, %v1843_v30  ;;  %v1964_v31 = vmul.f32 0.11111111, %v1844_v3 }
 0x243   :  { %v6565_v48 = vadd.f32 0.0001, %v2159_v27  ;;  %v6567_v12 = vadd.f32 0.0001, %v2160_v10  ;;  %v2103_v16 = vsub.f32 %v1959_v29, %v6351_v60  ;;  %v2104_v9 = vsub.f32 %v1960_v49, %v6360_v62  ;;  %v2808_v10 = vld [vmem:[#allocation2] sm:$0xff]  ;;  %v6593_v29 = vld [vmem:[#allocation2 + $0x10] sm:$0xff] }
 0x244   :  { %v6571_v44 = vadd.f32 0.0001, %v2279_v17  ;;  %v6573_v58 = vadd.f32 0.0001, %v2280_v7  ;;  %v2107_v45 = vsub.f32 %v1963_v51, %v6374_v22  ;;  %v2108_v19 = vsub.f32 %v1964_v31, %v6376_v36  ;;  %v6577_v53 = vpop.permute.xlu1 %1486  ;;  %v8424_v7 = vld [vmem:[#allocation15_spill] sm:$0xff]  ;;  %v6595_v49 = vld [vmem:[#allocation5 + $0x10] sm:$0xff] }
 0x245   :  { %8421 = vst [vmem:[#allocation44_spill] sm:$0xff] %v6565_v48  ;;  %8422 = vst [vmem:[#allocation42_spill] sm:$0xff] %v6567_v12  ;;  %v2319_v30 = vadd.f32 %v2103_v16, %v2079_v39  ;;  %v2320_v3 = vadd.f32 %v2104_v9, %v2080_v32  ;;  %v6580_v27 = vadd.s32 128, %v4774_v20  ;;  %v2584_v60 = vsub.f32 %v2809_v59, %v2808_v10  ;;  %v6582_v17 = vpop.permute.xlu0 %1462  ;;  %v6587_v22 = vld [vmem:[#allocation2 + $0x8] sm:$0xff]  ;;  %v6601_v51 = vld [vmem:[#allocation5 + $0x18] sm:$0xff] }
 0x246   :  { %v2323_v14 = vadd.f32 %v2107_v45, %v2083_v0  ;;  %v2324_v62 = vadd.f32 %v2108_v19, %v2084_v13  ;;  %v6585_v61 = vadd.s32 8, %v8424_v7  ;;  %v6589_v36 = vld [vmem:[#allocation5 + $0x8] sm:$0xff]  ;;  %v6599_v13 = vld [vmem:[#allocation2 + $0x18] sm:$0xff]  ;;  %v6605_v45 = vld [vmem:[#allocation2 + $0x20] sm:$0xff] }
 0x247   :  { %8423 = vst [vmem:[#allocation38_spill] sm:$0xff] %v6580_v27  ;;  %v2343_v39 = vadd.f32 0.0009, %v2319_v30  ;;  %v2344_v28 = vadd.f32 0.0009, %v2320_v3  ;;  %v6607_v19 = vld [vmem:[#allocation5 + $0x20] sm:$0xff] }
 0x248   :  { %8425 = vst [vmem:[#allocation29_spill] sm:$0xff] %v6585_v61  ;;  %v2347_v16 = vadd.f32 0.0009, %v2323_v14  ;;  %v2348_v9 = vadd.f32 0.0009, %v2324_v62  ;;  %v6611_v3 = vld [vmem:[#allocation2 + $0x28] sm:$0xff]  ;;  %v1533_v14 = vpop.permute.xlu1 %1532 }
 0x249   :  { %v6613_v10 = vld [vmem:[#allocation5 + $0x28] sm:$0xff]  ;;  %v2367_v0 = vmul.f32 %v2343_v39, %v6509_v4  ;;  %v2368_v31 = vmul.f32 %v2344_v28, %v6522_v35  ;;  %v6619_v62 = vld [vmem:[#allocation2 + $0x30] sm:$0xff]  ;;  %v6625_v30 = vld [vmem:[#allocation2 + $0x38] sm:$0xff]  ;;  %v1529_v35 = vpop.permute.xlu0 %1528  ;;  %v1644_v39 = vsel %vm1634_vm3, %v6531_v56, %v1533_v14  ;;  %v1704_v28 = vsel %vm1634_vm3, %v1533_v14, %v6531_v56 }
 0x24a   :  { %v6621_v32 = vld [vmem:[#allocation5 + $0x30] sm:$0xff]  ;;  %8426 = vst [vmem:[#allocation73_spill] sm:$0xff] %v6625_v30  ;;  %v6627_v27 = vld [vmem:[#allocation5 + $0x38] sm:$0xff]  ;;  %v6631_v59 = vmul.f32 %v2347_v16, %v2299_v52  ;;  %v6633_v4 = vmul.f32 %v2348_v9, %v2300_v2  ;;  %v1642_v12 = vsel %vm1634_vm3, %v6542_v23, %v1529_v35  ;;  %v1702_v52 = vsel %vm1634_vm3, %v1529_v35, %v6542_v23  ;;  %v6650_v9 = vld [vmem:[#allocation2 + $0x40] sm:$0xff] }
 0x24b   :  { %8427 = vst [vmem:[#allocation72_spill] sm:$0xff] %v6627_v27  ;;  %v6641_v61 = vpop.eup %2780  ;;  %v8429_v2 = vld [vmem:[#allocation84_spill] sm:$0xff]  ;;  %8430 = vst [vmem:[#allocation75_spill] sm:$0xff] %v6650_v9  ;;  %v6652_v7 = vld [vmem:[#allocation5 + $0x40] sm:$0xff]  ;;  %2784 = vrcp.f32 %v2367_v0 }
 0x24c   :  { %8428 = vst [vmem:[#allocation40_spill] sm:$0xff] %v6641_v61  ;;  %v1773_v16 = vadd.f32 %v1644_v39, %v8429_v2  ;;  %8431 = vst [vmem:[#allocation129_spill] sm:$0xff] %v6652_v7  ;;  %v6656_v56 = vpop.eup %2782  ;;  %v8433_v14 = vld [vmem:[#allocation83_spill] sm:$0xff]  ;;  %v8434_v48 = vld [vmem:[#allocation85_spill] sm:$0xff]  ;;  %v1557_v2 = vpop.permute.xlu1 %1556  ;;  %2786 = vrcp.f32 %v2368_v31 }
 0x24d   :  { %8432 = vst [vmem:[#allocation79_spill] sm:$0xff] %v6656_v56  ;;  %v1769_v27 = vadd.f32 %v1642_v12, %v8433_v14  ;;  %v1770_v57 = vadd.f32 %v1702_v52, %v8434_v48  ;;  %v8435_v61 = vld [vmem:[#allocation88_spill] sm:$0xff]  ;;  %v6673_v14 = vld [vmem:[#allocation2 + $0x58] sm:$0xff]  ;;  %v1553_v37 = vpop.permute.xlu0 %1552  ;;  %2788 = vrcp.f32 %v6631_v59 }
 0x24e   :  { %v1774_v55 = vadd.f32 %v1704_v28, %v8435_v61  ;;  %v6663_v23 = vld [vmem:[#allocation5 + $0x48] sm:$0xff]  ;;  %v1893_v39 = vmul.f32 0.11111111, %v1773_v16  ;;  %v6669_v30 = vld [vmem:[#allocation5 + $0x50] sm:$0xff]  ;;  %8440 = vst [vmem:[#allocation34_spill] sm:$0xff] %v6673_v14  ;;  %v6675_v48 = vld [vmem:[#allocation5 + $0x58] sm:$0xff]  ;;  %v1714_v12 = vsel %vm1634_vm3, %v1553_v37, %v6563_v43  ;;  %v1656_v61 = vsel %vm1634_vm3, %v6559_v63, %v1557_v2 }
 0x24f   :  { %8437 = vst [vmem:[#allocation43_spill] sm:$0xff] %v6663_v23  ;;  %8439 = vst [vmem:[#allocation115_spill] sm:$0xff] %v6669_v30  ;;  %v6679_v28 = vand.u32 2147483647, %v2584_v60  ;;  %v1889_v52 = vmul.f32 0.11111111, %v1769_v27  ;;  %v1654_v23 = vsel %vm1634_vm3, %v6563_v43, %v1553_v37  ;;  %v1716_v37 = vsel %vm1634_vm3, %v1557_v2, %v6559_v63 }
 0x250   :  { %8441 = vst [vmem:[#allocation93_spill] sm:$0xff] %v6675_v48  ;;  %v1890_v16 = vmul.f32 0.11111111, %v1770_v57  ;;  %v1894_v35 = vmul.f32 0.11111111, %v1774_v55  ;;  %v6694_v57 = vmul.f32 %v1893_v39, %v1893_v39  ;;  %v8442_v55 = vld [vmem:[#allocation102_spill] sm:$0xff]  ;;  %v1607_v30 = vpop.permute.xlu1 %1606  ;;  %2790 = vrcp.f32 %v6633_v4 }
 0x251   :  { %v6690_v60 = vmul.f32 %v1889_v52, %v1889_v52  ;;  %v1793_v27 = vadd.f32 %v1654_v23, %v8442_v55  ;;  %v8443_v14 = vld [vmem:[#allocation101_spill] sm:$0xff]  ;;  %v8444_v43 = vld [vmem:[#allocation107_spill] sm:$0xff]  ;;  %v1583_v11 = vpop.permute.xlu0 %1582  ;;  %v1681_v15 = vsel %vm1634_vm3, %v6577_v53, %v1607_v30  ;;  %v1741_v23 = vsel %vm1634_vm3, %v1607_v30, %v6577_v53 }
 0x252   :  { %v6692_v0 = vmul.f32 %v1890_v16, %v1890_v16  ;;  %v6697_v31 = vmul.f32 %v1894_v35, %v1894_v35  ;;  %v1794_v48 = vadd.f32 %v1714_v12, %v8443_v14  ;;  %v1797_v1 = vadd.f32 %v1656_v61, %v8444_v43  ;;  %v8445_v7 = vld [vmem:[#allocation109_spill] sm:$0xff]  ;;  %v108_v61 = vld [vmem:[#allocation7 + $0x8] sm:$0xff] }
 0x253   :  { %v1913_v9 = vmul.f32 0.11111111, %v1793_v27  ;;  %v1798_v56 = vadd.f32 %v1716_v37, %v8445_v7  ;;  %v1669_v63 = vsel %vm1634_vm3, %v6582_v17, %v1583_v11  ;;  %v1729_v2 = vsel %vm1634_vm3, %v1583_v11, %v6582_v17  ;;  %v107_v7 = vld [vmem:[#allocation7] sm:$0xff] }
 0x254   :  { %v1914_v12 = vmul.f32 0.11111111, %v1794_v48  ;;  %v1917_v14 = vmul.f32 0.11111111, %v1797_v1  ;;  %v2699_v43 = vadd.f32 %v108_v61, %v107_v7  ;;  %v6729_v48 = vpop.permute.xlu1 %1440  ;;  %v1824_v33 = vadd.f32 %v1729_v2, %v8454_v26 }
 0x255   :  { %v6717_v55 = vmul.f32 %v1913_v9, %v1889_v52  ;;  %v6719_v27 = vmul.f32 %v1913_v9, %v1913_v9  ;;  %v1918_v37 = vmul.f32 0.11111111, %v1798_v56  ;;  %v6738_v56 = vpop.permute.xlu0 %1416  ;;  %v6746_v61 = vpop.eup %2784 }
 0x256   :  { %v6721_v42 = vmul.f32 %v1914_v12, %v1890_v16  ;;  %v6723_v53 = vmul.f32 %v1914_v12, %v1914_v12  ;;  %v6725_v1 = vmul.f32 %v1917_v14, %v1893_v39  ;;  %v6727_v30 = vmul.f32 %v1917_v14, %v1917_v14  ;;  %v8450_v14 = vld [vmem:[#allocation19_spill] sm:$0xff]  ;;  %8451 = vst [vmem:[#allocation134_spill] sm:$0xff] %v6746_v61  ;;  %v6753_v8 = vpop.eup %2786 }
 0x257   :  { %8446 = vst [vmem:[#allocation94_spill] sm:$0xff] %v6717_v55  ;;  %v2153_v11 = vmul.f32 2.0, %v6717_v55  ;;  %v2273_v17 = vadd.f32 %v6719_v27, %v6690_v60  ;;  %v6734_v52 = vmul.f32 %v1918_v37, %v1894_v35  ;;  %v6736_v9 = vmul.f32 %v1918_v37, %v1918_v37  ;;  %8452 = vst [vmem:[#allocation131_spill] sm:$0xff] %v6753_v8 }
 0x258   :  { %8447 = vst [vmem:[#allocation25_spill] sm:$0xff] %v6721_v42  ;;  %8448 = vst [vmem:[#allocation118_spill] sm:$0xff] %v6725_v1  ;;  %v2154_v16 = vmul.f32 2.0, %v6721_v42  ;;  %v2274_v39 = vadd.f32 %v6723_v53, %v6692_v0  ;;  %v2277_v12 = vadd.f32 %v6727_v30, %v6694_v57  ;;  %v1823_v7 = vadd.f32 %v1669_v63, %v8450_v14  ;;  %v109_v42 = vld [vmem:[#allocation7 + $0x10] sm:$0xff] }
 0x259   :  { %8449 = vst [vmem:[#allocation27_spill] sm:$0xff] %v6734_v52  ;;  %v2157_v35 = vmul.f32 2.0, %v6725_v1  ;;  %v2158_v37 = vmul.f32 2.0, %v6734_v52  ;;  %v2278_v55 = vadd.f32 %v6736_v9, %v6697_v31  ;;  %v6755_v47 = vadd.f32 0.0001, %v2153_v11  ;;  %v6758_v41 = vpop.permute.xlu1 %1460  ;;  %v6777_v2 = vpop.permute.xlu0 %1456 }
 0x25a   :  { %v8455_v63 = vsub.f32 %v6589_v36, %v6587_v22  ;;  %v8457_v14 = vsub.f32 %v6595_v49, %v6593_v29  ;;  %v6770_v1 = vadd.f32 0.0001, %v2154_v16  ;;  %v6772_v61 = vadd.f32 0.0001, %v2273_v17  ;;  %v8460_v22 = vld [vmem:[#allocation28_spill] sm:$0xff] }
 0x25b   :  { %8453 = vst [vmem:[#allocation24_spill] sm:$0xff] %v6755_v47  ;;  %v6774_v11 = vadd.f32 0.0001, %v2274_v39  ;;  %v8459_v47 = vld [vmem:[#allocation141_spill] sm:$0xff]  ;;  %v1943_v8 = vmul.f32 0.11111111, %v1823_v7  ;;  %v1848_v36 = vadd.f32 %v1741_v23, %v8460_v22 }
 0x25c   :  { %v6763_v59 = vand.u32 2147483647, %v8455_v63  ;;  %v6768_v52 = vand.u32 2147483647, %v8457_v14  ;;  %v1847_v26 = vadd.f32 %v1681_v15, %v8459_v47  ;;  %v1944_v54 = vmul.f32 0.11111111, %v1824_v33 }
 0x25d   :  { %v110_v63 = vld [vmem:[#allocation7 + $0x18] sm:$0xff]  ;;  %v6781_v29 = vadd.f32 0.0001, %v2157_v35  ;;  %v6783_v49 = vadd.f32 0.0001, %v2158_v37  ;;  %v2087_v16 = vsub.f32 %v1943_v8, %v6487_v25  ;;  %v6787_v15 = vpop.permute.xlu1 %1484  ;;  %v6796_v35 = vld [vmem:[#allocation2 + $0x60] sm:$0xff] }
 0x25e   :  { %8456 = vst [vmem:[#allocation95_spill] sm:$0xff] %v6763_v59  ;;  %8458 = vst [vmem:[#allocation97_spill] sm:$0xff] %v6768_v52  ;;  %v2700_v59 = vadd.f32 %v2699_v43, %v109_v42  ;;  %v1967_v17 = vmul.f32 0.11111111, %v1847_v26  ;;  %v2088_v39 = vsub.f32 %v1944_v54, %v6489_v18  ;;  %v1968_v47 = vmul.f32 0.11111111, %v1848_v36  ;;  %v6794_v4 = vpop.permute.xlu0 %1480 }
 0x25f   :  { %v6789_v33 = vadd.f32 0.0001, %v2277_v12  ;;  %v6791_v23 = vadd.f32 0.0001, %v2278_v55  ;;  %v111_v43 = vld [vmem:[#allocation7 + $0x20] sm:$0xff]  ;;  %8461 = vst [vmem:[#allocation61_spill] sm:$0xff] %v6796_v35 }
 0x260   :  { %v2701_v7 = vadd.f32 %v2700_v59, %v110_v63  ;;  %v2111_v42 = vsub.f32 %v1967_v17, %v6477_v6  ;;  %v6798_v37 = vld [vmem:[#allocation5 + $0x60] sm:$0xff]  ;;  %v2112_v54 = vsub.f32 %v1968_v47, %v6497_v34  ;;  %v6803_v18 = vld [vmem:[#allocation2 + $0x68] sm:$0xff]  ;;  %v6809_v55 = vld [vmem:[#allocation2 + $0x70] sm:$0xff] }
 0x261   :  { %8462 = vst [vmem:[#allocation92_spill] sm:$0xff] %v6798_v37  ;;  %8463 = vst [vmem:[#allocation127_spill] sm:$0xff] %v6803_v18  ;;  %v6805_v12 = vld [vmem:[#allocation5 + $0x68] sm:$0xff]  ;;  %v6811_v59 = vld [vmem:[#allocation5 + $0x70] sm:$0xff]  ;;  %v1561_v14 = vpop.permute.xlu1 %1560 }
 0x262   :  { %v2702_v25 = vadd.f32 %v2701_v7, %v111_v43  ;;  %8464 = vst [vmem:[#allocation78_spill] sm:$0xff] %v6805_v12  ;;  %8465 = vst [vmem:[#allocation82_spill] sm:$0xff] %v6809_v55  ;;  %v2327_v26 = vadd.f32 %v2111_v42, %v2087_v16  ;;  %v6815_v22 = vld [vmem:[#allocation2 + $0x78] sm:$0xff]  ;;  %v6821_v63 = vld [vmem:[#allocation2 + $0x80] sm:$0xff]  ;;  %v2328_v42 = vadd.f32 %v2112_v54, %v2088_v39  ;;  %v6851_v54 = vpop.eup %2788 }
 0x263   :  { %8466 = vst [vmem:[#allocation98_spill] sm:$0xff] %v6811_v59  ;;  %8467 = vst [vmem:[#allocation99_spill] sm:$0xff] %v6815_v22  ;;  %v6817_v36 = vld [vmem:[#allocation5 + $0x78] sm:$0xff]  ;;  %v6823_v17 = vld [vmem:[#allocation5 + $0x80] sm:$0xff]  ;;  %v1658_v22 = vsel %vm1634_vm3, %v6729_v48, %v1561_v14 }
 0x264   :  { %8468 = vst [vmem:[#allocation59_spill] sm:$0xff] %v6817_v36  ;;  %8469 = vst [vmem:[#allocation47_spill] sm:$0xff] %v6821_v63  ;;  %v6827_v7 = vld [vmem:[#allocation2 + $0x88] sm:$0xff]  ;;  %v6833_v8 = vld [vmem:[#allocation2 + $0x90] sm:$0xff] }
 0x265   :  { %8470 = vst [vmem:[#allocation32_spill] sm:$0xff] %v6823_v17  ;;  %8471 = vst [vmem:[#allocation110_spill] sm:$0xff] %v6827_v7  ;;  %v6829_v43 = vld [vmem:[#allocation5 + $0x88] sm:$0xff]  ;;  %v6835_v34 = vld [vmem:[#allocation5 + $0x90] sm:$0xff]  ;;  %v2351_v7 = vadd.f32 0.0009, %v2327_v26 }
 0x266   :  { %8472 = vst [vmem:[#allocation96_spill] sm:$0xff] %v6829_v43  ;;  %v112_v6 = vld [vmem:[#allocation7 + $0x28] sm:$0xff]  ;;  %8473 = vst [vmem:[#allocation161_spill] sm:$0xff] %v6833_v8  ;;  %v6839_v36 = vld [vmem:[#allocation2 + $0x98] sm:$0xff]  ;;  %v1537_v43 = vpop.permute.xlu0 %1536  ;;  %v1718_v8 = vsel %vm1634_vm3, %v1561_v14, %v6729_v48  ;;  %v1581_v14 = vpop.permute.xlu1 %1580 }
 0x267   :  { %8474 = vst [vmem:[#allocation138_spill] sm:$0xff] %v6835_v34  ;;  %8475 = vst [vmem:[#allocation117_spill] sm:$0xff] %v6839_v36  ;;  %v6841_v47 = vld [vmem:[#allocation5 + $0x98] sm:$0xff]  ;;  %v6845_v17 = vld [vmem:[#allocation2 + $0xa0] sm:$0xff]  ;;  %v2703_v63 = vadd.f32 %v2702_v25, %v112_v6  ;;  %v2352_v36 = vadd.f32 0.0009, %v2328_v42  ;;  %v1706_v39 = vsel %vm1634_vm3, %v1537_v43, %v6738_v56 }
 0x268   :  { %8476 = vst [vmem:[#allocation16_spill] sm:$0xff] %v6841_v47  ;;  %8477 = vst [vmem:[#allocation39_spill] sm:$0xff] %v6845_v17  ;;  %v6847_v16 = vld [vmem:[#allocation5 + $0xa0] sm:$0xff]  ;;  %v1646_v47 = vsel %vm1634_vm3, %v6738_v56, %v1537_v43  ;;  %v8479_v26 = vld [vmem:[#allocation116_spill] sm:$0xff] }
 0x269   :  { %8478 = vst [vmem:[#allocation123_spill] sm:$0xff] %v6847_v16  ;;  %v1801_v17 = vadd.f32 %v1658_v22, %v8479_v26  ;;  %v2375_v16 = vmul.f32 %v2351_v7, %v6571_v44  ;;  %v8480_v34 = vld [vmem:[#allocation22_spill] sm:$0xff]  ;;  %v8481_v59 = vld [vmem:[#allocation87_spill] sm:$0xff]  ;;  %v8482_v12 = vld [vmem:[#allocation113_spill] sm:$0xff]  ;;  %v2376_v25 = vmul.f32 %v2352_v36, %v6573_v58  ;;  %v8491_v26 = vsub.f32 %v6607_v19, %v6605_v45 }
 0x26a   :  { %v1777_v55 = vadd.f32 %v1646_v47, %v8480_v34  ;;  %v1778_v18 = vadd.f32 %v1706_v39, %v8481_v59  ;;  %v1802_v48 = vadd.f32 %v1718_v8, %v8482_v12  ;;  %v113_v42 = vld [vmem:[#allocation7 + $0x30] sm:$0xff]  ;;  %v6871_v35 = vld [vmem:[#allocation2 + $0xa8] sm:$0xff]  ;;  %v6883_v8 = vpop.eup %2790  ;;  %v1577_v34 = vpop.permute.xlu0 %1576  ;;  %v6887_v47 = vld [vmem:[#allocation5 + $0xb8] sm:$0xff] }
 0x26b   :  { %v1921_v6 = vmul.f32 0.11111111, %v1801_v17  ;;  %8483 = vst [vmem:[#allocation60_spill] sm:$0xff] %v6871_v35  ;;  %v6873_v37 = vld [vmem:[#allocation5 + $0xa8] sm:$0xff]  ;;  %v6877_v22 = vld [vmem:[#allocation2 + $0xb0] sm:$0xff]  ;;  %v6885_v17 = vld [vmem:[#allocation2 + $0xb8] sm:$0xff]  ;;  %v1666_v43 = vsel %vm1634_vm3, %v6777_v2, %v1577_v34  ;;  %v1726_v39 = vsel %vm1634_vm3, %v1577_v34, %v6777_v2  ;;  %v1605_v45 = vpop.permute.xlu1 %1604  ;;  %2792 = vrcp.f32 %v2375_v16 }
 0x26c   :  { %8484 = vst [vmem:[#allocation121_spill] sm:$0xff] %v6873_v37  ;;  %8485 = vst [vmem:[#allocation41_spill] sm:$0xff] %v6877_v22  ;;  %v6879_v44 = vld [vmem:[#allocation5 + $0xb0] sm:$0xff]  ;;  %v1897_v58 = vmul.f32 0.11111111, %v1777_v55  ;;  %2794 = vrcp.f32 %v2376_v25 }
 0x26d   :  { %8486 = vst [vmem:[#allocation130_spill] sm:$0xff] %v6879_v44  ;;  %v1898_v12 = vmul.f32 0.11111111, %v1778_v18  ;;  %v1922_v36 = vmul.f32 0.11111111, %v1802_v48  ;;  %8487 = vst [vmem:[#allocation165_spill] sm:$0xff] %v6885_v17  ;;  %v8489_v18 = vsub.f32 %v6601_v51, %v6599_v13  ;;  %v2704_v17 = vadd.f32 %v2703_v63, %v113_v42 }
 0x26e   :  { %8488 = vst [vmem:[#allocation77_spill] sm:$0xff] %v6887_v47  ;;  %v6905_v48 = vand.u32 2147483647, %v8491_v26  ;;  %v6909_v7 = vmul.f32 %v1921_v6, %v1897_v58  ;;  %v8492_v2 = vld [vmem:[#allocation57_spill] sm:$0xff]  ;;  %v8493_v22 = vld [vmem:[#allocation36_spill] sm:$0xff]  ;;  %v1668_v51 = vsel %vm1634_vm3, %v6758_v41, %v1581_v14  ;;  %v1601_v63 = vpop.permute.xlu0 %1600  ;;  %v8494_v42 = vsub.f32 %v6613_v10, %v6611_v3 }
 0x26f   :  { %v6900_v55 = vand.u32 2147483647, %v8489_v18  ;;  %v6907_v59 = vmul.f32 %v1898_v12, %v1898_v12  ;;  %v6911_v56 = vmul.f32 %v1922_v36, %v1898_v12  ;;  %v6913_v47 = vmul.f32 %v1922_v36, %v1922_v36 }
 0x270   :  { %v1817_v34 = vadd.f32 %v1666_v43, %v8492_v2  ;;  %v1818_v13 = vadd.f32 %v1726_v39, %v8493_v22  ;;  %v2161_v19 = vmul.f32 2.0, %v6909_v7  ;;  %v1728_v12 = vsel %vm1634_vm3, %v1581_v14, %v6758_v41  ;;  %v8495_v39 = vld [vmem:[#allocation122_spill] sm:$0xff] }
 0x271   :  { %8490 = vst [vmem:[#allocation133_spill] sm:$0xff] %v6900_v55  ;;  %v2162_v18 = vmul.f32 2.0, %v6911_v56  ;;  %v6928_v36 = vand.u32 2147483647, %v8494_v42  ;;  %v6932_v22 = vadd.f32 %v6913_v47, %v6907_v59  ;;  %v1821_v26 = vadd.f32 %v1668_v51, %v8495_v39  ;;  %v8496_v55 = vld [vmem:[#allocation55_spill] sm:$0xff]  ;;  %v6938_v14 = vld [vmem:[#allocation7 + $0x38] sm:$0xff]  ;;  %v1495_v42 = vpop.permute.xlu1 %1494 }
 0x272   :  { %v1937_v43 = vmul.f32 0.11111111, %v1817_v34  ;;  %v6935_v2 = vmul.f32 %v1921_v6, %v1921_v6  ;;  %v1938_v44 = vmul.f32 0.11111111, %v1818_v13  ;;  %v1822_v41 = vadd.f32 %v1728_v12, %v8496_v55  ;;  %v1491_v55 = vpop.permute.xlu0 %1490  ;;  %v8499_v13 = vld [vmem:[#allocation135_spill] sm:$0xff] }
 0x273   :  { %v6940_v35 = vmul.f32 %v1897_v58, %v1897_v58  ;;  %v6942_v3 = vadd.f32 0.0001, %v2161_v19  ;;  %v6944_v10 = vadd.f32 0.0001, %v2162_v18  ;;  %v1941_v16 = vmul.f32 0.11111111, %v1821_v26 }
 0x274   :  { %v1942_v37 = vmul.f32 0.11111111, %v1822_v41  ;;  %v1678_v25 = vsel %vm1634_vm3, %v6794_v4, %v1601_v63  ;;  %v1738_v6 = vsel %vm1634_vm3, %v1601_v63, %v6794_v4  ;;  %v1680_v58 = vsel %vm1634_vm3, %v6787_v15, %v1605_v45  ;;  %v8500_v19 = vld [vmem:[#allocation139_spill] sm:$0xff]  ;;  %v8501_v26 = vld [vmem:[#allocation137_spill] sm:$0xff]  ;;  %v8502_v4 = vld [vmem:[#allocation136_spill] sm:$0xff] }
 0x275   :  { %8497 = vst [vmem:[#allocation187_spill] sm:$0xff] %v6942_v3  ;;  %8498 = vst [vmem:[#allocation86_spill] sm:$0xff] %v6944_v10  ;;  %v2081_v34 = vsub.f32 %v1937_v43, %v6690_v60  ;;  %v1841_v51 = vadd.f32 %v1678_v25, %v8499_v13  ;;  %v1842_v18 = vadd.f32 %v1738_v6, %v8500_v19  ;;  %v1615_v13 = vpop.permute.xlu1 %1614 }
 0x276   :  { %v1740_v12 = vsel %vm1634_vm3, %v1605_v45, %v6787_v15  ;;  %v2082_v39 = vsub.f32 %v1938_v44, %v6692_v0  ;;  %v1845_v41 = vadd.f32 %v1680_v58, %v8501_v26  ;;  %v2705_v10 = vadd.f32 %v2704_v17, %v6938_v14  ;;  %v1611_v52 = vpop.permute.xlu0 %1610  ;;  %v8506_v26 = vld [vmem:[#allocation146_spill] sm:$0xff] }
 0x277   :  { %v1846_v63 = vadd.f32 %v1740_v12, %v8502_v4  ;;  %v2085_v3 = vsub.f32 %v1941_v16, %v6694_v57  ;;  %v2086_v60 = vsub.f32 %v1942_v37, %v6697_v31  ;;  %v1961_v43 = vmul.f32 0.11111111, %v1841_v51  ;;  %v8503_v16 = vld [vmem:[#allocation145_spill] sm:$0xff]  ;;  %v8504_v51 = vld [vmem:[#allocation159_spill] sm:$0xff]  ;;  %v8505_v12 = vld [vmem:[#allocation188_spill] sm:$0xff] }
 0x278   :  { %v1962_v25 = vmul.f32 0.11111111, %v1842_v18  ;;  %v1965_v6 = vmul.f32 0.11111111, %v1845_v41  ;;  %v1685_v15 = vsel %vm1634_vm3, %v1495_v42, %v1615_v13  ;;  %v1745_v0 = vsel %vm1634_vm3, %v1615_v13, %v1495_v42  ;;  %2706 = vadd.xlane.f32.xlu1 %v2705_v10  ;;  %v6981_v42 = vpop.eup %2792 }
 0x279   :  { %v1966_v19 = vmul.f32 0.11111111, %v1846_v63  ;;  %v2105_v44 = vsub.f32 %v1961_v43, %v6719_v27  ;;  %v1683_v57 = vsel %vm1634_vm3, %v1491_v55, %v1611_v52  ;;  %v1743_v31 = vsel %vm1634_vm3, %v1611_v52, %v1491_v55  ;;  %v1489_v4 = vpop.permute.xlu1 %1488  ;;  %v6985_v63 = vpop.eup %2794 }
 0x27a   :  { %v2106_v17 = vsub.f32 %v1962_v25, %v6723_v53  ;;  %v2109_v37 = vsub.f32 %v1965_v6, %v6727_v30  ;;  %v1851_v58 = vadd.f32 %v1683_v57, %v8503_v16  ;;  %v1852_v18 = vadd.f32 %v1743_v31, %v8504_v51  ;;  %v8509_v31 = vld [vmem:[#allocation153_spill] sm:$0xff] }
 0x27b   :  { %v2110_v45 = vsub.f32 %v1966_v19, %v6736_v9  ;;  %v2321_v10 = vadd.f32 %v2105_v44, %v2081_v34  ;;  %v1855_v53 = vadd.f32 %v1685_v15, %v8505_v12  ;;  %v1856_v41 = vadd.f32 %v1745_v0, %v8506_v26  ;;  %v1465_v9 = vpop.permute.xlu0 %1464  ;;  %v8507_v44 = vld [vmem:[#allocation189_spill] sm:$0xff] }
 0x27c   :  { %v2322_v27 = vadd.f32 %v2106_v17, %v2082_v39  ;;  %v2325_v52 = vadd.f32 %v2109_v37, %v2085_v3  ;;  %v1971_v30 = vmul.f32 0.11111111, %v1851_v58  ;;  %v1972_v43 = vmul.f32 0.11111111, %v1852_v18  ;;  %v8508_v17 = vld [vmem:[#allocation152_spill] sm:$0xff] }
 0x27d   :  { %v2326_v55 = vadd.f32 %v2110_v45, %v2086_v60  ;;  %v2281_v25 = vadd.f32 %v6935_v2, %v6940_v35  ;;  %v2345_v13 = vadd.f32 0.0009, %v2321_v10  ;;  %v1975_v19 = vmul.f32 0.11111111, %v1855_v53  ;;  %v1609_v45 = vpop.permute.xlu1 %1608 }
 0x27e   :  { %v2346_v6 = vadd.f32 0.0009, %v2322_v27  ;;  %v2349_v34 = vadd.f32 0.0009, %v2325_v52  ;;  %v2115_v15 = vsub.f32 %v1971_v30, %v8507_v44  ;;  %v2116_v0 = vsub.f32 %v1972_v43, %v8508_v17  ;;  %v8511_v30 = vld [vmem:[#allocation125_spill] sm:$0xff]  ;;  %v8515_v44 = vld [vmem:[#allocation119_spill] sm:$0xff] }
 0x27f   :  { %v2350_v39 = vadd.f32 0.0009, %v2326_v55  ;;  %v6992_v57 = vmul.f32 %v2345_v13, %v6772_v61  ;;  %v1976_v60 = vmul.f32 0.11111111, %v1856_v41  ;;  %v2119_v37 = vsub.f32 %v1975_v19, %v8509_v31  ;;  %v1585_v10 = vpop.permute.xlu0 %1584  ;;  %v8510_v61 = vld [vmem:[#allocation190_spill] sm:$0xff] }
 0x280   :  { %v6995_v3 = vmul.f32 %v2346_v6, %v6774_v11  ;;  %v6999_v16 = vmul.f32 %v2349_v34, %v6789_v33  ;;  %v2187_v51 = vmul.f32 2.0, %v2115_v15  ;;  %v2188_v18 = vmul.f32 2.0, %v2116_v0  ;;  %v8513_v19 = vld [vmem:[#allocation54_spill] sm:$0xff] }
 0x281   :  { %v7002_v58 = vmul.f32 %v2350_v39, %v6791_v23  ;;  %v7004_v27 = vadd.f32 0.0001, %v2281_v25  ;;  %v2120_v12 = vsub.f32 %v1976_v60, %v8510_v61  ;;  %v2191_v53 = vmul.f32 2.0, %v2119_v37  ;;  %v1497_v25 = vpop.permute.xlu1 %1496  ;;  %v8514_v39 = vld [vmem:[#allocation154_spill] sm:$0xff]  ;;  %v8516_v60 = vld [vmem:[#allocation192_spill] sm:$0xff]  ;;  %v8517_v61 = vld [vmem:[#allocation157_spill] sm:$0xff] }
 0x282   :  { %v1670_v11 = vsel %vm1634_vm3, %v1465_v9, %v1585_v10  ;;  %v7010_v26 = vadd.f32 0.0001, %v6932_v22  ;;  %v2211_v41 = vadd.f32 0.0009, %v2187_v51  ;;  %v2212_v33 = vadd.f32 0.0009, %v2188_v18 }
 0x283   :  { %v1730_v23 = vsel %vm1634_vm3, %v1585_v10, %v1465_v9  ;;  %v2192_v52 = vmul.f32 2.0, %v2120_v12  ;;  %v2215_v55 = vadd.f32 0.0009, %v2191_v53  ;;  %v1825_v43 = vadd.f32 %v1670_v11, %v8511_v30  ;;  %v1493_v17 = vpop.permute.xlu0 %1492  ;;  %v8518_v53 = vld [vmem:[#allocation46_spill] sm:$0xff] }
 0x284   :  { %v8512_v13 = vsub.f32 %v6621_v32, %v6619_v62  ;;  %v2235_v34 = vmul.f32 %v2211_v41, %v8513_v19  ;;  %v2236_v22 = vmul.f32 %v2212_v33, %v8514_v39  ;;  %v1826_v15 = vadd.f32 %v1730_v23, %v8515_v44 }
 0x285   :  { %v7025_v9 = vadd.f32 %v6905_v48, %v6679_v28  ;;  %v2216_v0 = vadd.f32 0.0009, %v2192_v52  ;;  %v2239_v31 = vmul.f32 %v2215_v55, %v8516_v60  ;;  %v1945_v37 = vmul.f32 0.11111111, %v1825_v43  ;;  %v1613_v41 = vpop.permute.xlu1 %1612  ;;  %v8521_v60 = vld [vmem:[#allocation18_spill] sm:$0xff] }
 0x286   :  { %v7018_v6 = vand.u32 2147483647, %v8512_v13  ;;  %v1682_v32 = vsel %vm1634_vm3, %v1489_v4, %v1609_v45  ;;  %v2380_v62 = vmul.f32 %v6380_v38, %v2235_v34  ;;  %v2382_v51 = vmul.f32 %v6390_v24, %v2236_v22  ;;  %v8519_v38 = vld [vmem:[#allocation144_spill] sm:$0xff] }
 0x287   :  { %v1946_v18 = vmul.f32 0.11111111, %v1826_v15  ;;  %v1742_v10 = vsel %vm1634_vm3, %v1609_v45, %v1489_v4  ;;  %v2240_v12 = vmul.f32 %v2216_v0, %v8517_v61  ;;  %v2388_v28 = vmul.f32 %v6445_v5, %v2239_v31  ;;  %v1499_v24 = vpop.permute.xlu0 %1498  ;;  %v8520_v22 = vld [vmem:[#allocation140_spill] sm:$0xff] }
 0x288   :  { %v2089_v48 = vsub.f32 %v1945_v37, %v6940_v35  ;;  %v1849_v11 = vadd.f32 %v1682_v32, %v8518_v53  ;;  %v2427_v33 = vsub.f32 1.0, %v2380_v62  ;;  %v2428_v23 = vsub.f32 1.0, %v2382_v51 }
 0x289   :  { %v2090_v52 = vsub.f32 %v1946_v18, %v6907_v59  ;;  %v1850_v55 = vadd.f32 %v1742_v10, %v8519_v38  ;;  %v2390_v30 = vmul.f32 %v6455_v46, %v2240_v12  ;;  %v2431_v43 = vsub.f32 1.0, %v2388_v28  ;;  %v1619_v32 = vpop.permute.xlu1 %1618  ;;  %v8523_v38 = vld [vmem:[#allocation193_spill] sm:$0xff] }
 0x28a   :  { %v1969_v4 = vmul.f32 0.11111111, %v1849_v11  ;;  %v1684_v45 = vsel %vm1634_vm3, %v1493_v17, %v1613_v41  ;;  %v2451_v5 = vmul.f32 0.5, %v2427_v33  ;;  %v2452_v13 = vmul.f32 0.5, %v2428_v23 }
 0x28b   :  { %v1970_v35 = vmul.f32 0.11111111, %v1850_v55  ;;  %v1744_v19 = vsel %vm1634_vm3, %v1613_v41, %v1493_v17  ;;  %v2432_v34 = vsub.f32 1.0, %v2390_v30  ;;  %v2455_v39 = vmul.f32 0.5, %v2431_v43  ;;  %v1617_v37 = vpop.permute.xlu0 %1616  ;;  %v8522_v41 = vld [vmem:[#allocation194_spill] sm:$0xff] }
 0x28c   :  { %v2113_v59 = vsub.f32 %v1969_v4, %v6935_v2  ;;  %v1853_v44 = vadd.f32 %v1684_v45, %v8520_v22  ;;  %v2475_v15 = vmax.f32 %v2451_v5, 0.0  ;;  %v2476_v0 = vmax.f32 %v2452_v13, 0.0  ;;  %v8524_v13 = vld [vmem:[#allocation49_spill] sm:$0xff] }
 0x28d   :  { %v2114_v46 = vsub.f32 %v1970_v35, %v6913_v47  ;;  %v1854_v31 = vadd.f32 %v1744_v19, %v8521_v60  ;;  %v2456_v62 = vmul.f32 0.5, %v2432_v34  ;;  %v2479_v51 = vmax.f32 %v2455_v39, 0.0  ;;  %v8525_v19 = vld [vmem:[#allocation143_spill] sm:$0xff]  ;;  %v1621_v39 = vpop.permute.xlu1 %1620 }
 0x28e   :  { %v2329_v18 = vadd.f32 %v2113_v59, %v2089_v48  ;;  %v1973_v10 = vmul.f32 0.11111111, %v1853_v44  ;;  %v2499_v61 = vmin.f32 %v2475_v15, 1.0  ;;  %v2500_v17 = vmin.f32 %v2476_v0, 1.0  ;;  %v8526_v0 = vld [vmem:[#allocation163_spill] sm:$0xff] }
 0x28f   :  { %v2330_v12 = vadd.f32 %v2114_v46, %v2090_v52  ;;  %v1974_v28 = vmul.f32 0.11111111, %v1854_v31  ;;  %v2480_v53 = vmax.f32 %v2456_v62, 0.0  ;;  %v2503_v2 = vmin.f32 %v2479_v51, 1.0  ;;  %v1501_v48 = vpop.permute.xlu0 %1500  ;;  %v8527_v31 = vld [vmem:[#allocation155_spill] sm:$0xff]  ;;  %v8528_v51 = vld [vmem:[#allocation160_spill] sm:$0xff] }
 0x290   :  { %v2353_v11 = vadd.f32 0.0009, %v2329_v18  ;;  %v2117_v33 = vsub.f32 %v1973_v10, %v8522_v41  ;;  %v1686_v55 = vsel %vm1634_vm3, %v1497_v25, %v1617_v37  ;;  %v1746_v30 = vsel %vm1634_vm3, %v1617_v37, %v1497_v25  ;;  %v8529_v10 = vld [vmem:[#allocation56_spill] sm:$0xff] }
 0x291   :  { %v2354_v23 = vadd.f32 0.0009, %v2330_v12  ;;  %v2118_v47 = vsub.f32 %v1974_v28, %v8523_v38  ;;  %2796 = vrcp.f32 %v6992_v57  ;;  %v2504_v43 = vmin.f32 %v2480_v53, 1.0  ;;  %v8532_v38 = vld [vmem:[#allocation31_spill] sm:$0xff] }
 0x292   :  { %v7056_v52 = vadd.f32 %v2503_v2, %v2499_v61  ;;  %v2189_v4 = vmul.f32 2.0, %v2117_v33  ;;  %v1857_v35 = vadd.f32 %v1686_v55, %v8524_v13  ;;  %v1858_v34 = vadd.f32 %v1746_v30, %v8525_v19  ;;  %v8530_v61 = vld [vmem:[#allocation80_spill] sm:$0xff]  ;;  %v8533_v55 = vld [vmem:[#allocation150_spill] sm:$0xff] }
 0x293   :  { %v7059_v45 = vmul.f32 %v2354_v23, %v7010_v26  ;;  %v2190_v5 = vmul.f32 2.0, %v2118_v47  ;;  %2798 = vrcp.f32 %v6995_v3  ;;  %v7064_v59 = vadd.f32 %v2504_v43, %v2500_v17  ;;  %v1503_v12 = vpop.permute.xlu0 %1502  ;;  %v8534_v13 = vld [vmem:[#allocation168_spill] sm:$0xff] }
 0x294   :  { %v2213_v25 = vadd.f32 0.0009, %v2189_v4  ;;  %v1687_v57 = vsel %vm1634_vm3, %v1499_v24, %v1619_v32  ;;  %v7069_v22 = vmul.f32 %v2353_v11, %v7004_v27  ;;  %v1977_v26 = vmul.f32 0.11111111, %v1857_v35 }
 0x295   :  { %v2214_v44 = vadd.f32 0.0009, %v2190_v5  ;;  %v1978_v15 = vmul.f32 0.11111111, %v1858_v34  ;;  %v1747_v60 = vsel %vm1634_vm3, %v1619_v32, %v1499_v24  ;;  %v1859_v37 = vadd.f32 %v1687_v57, %v8527_v31  ;;  %v8531_v32 = vld [vmem:[#allocation48_spill] sm:$0xff] }
 0x296   :  { %v2237_v46 = vmul.f32 %v2213_v25, %v8526_v0  ;;  %v1688_v3 = vsel %vm1634_vm3, %v1501_v48, %v1621_v39  ;;  %v2121_v18 = vsub.f32 %v1977_v26, %v8528_v51  ;;  %v1860_v17 = vadd.f32 %v1747_v60, %v8530_v61 }
 0x297   :  { %v2238_v62 = vmul.f32 %v2214_v44, %v6234_v40  ;;  %v2122_v27 = vsub.f32 %v1978_v15, %v8529_v10  ;;  %v1979_v53 = vmul.f32 0.11111111, %v1859_v37  ;;  %v1748_v24 = vsel %vm1634_vm3, %v1621_v39, %v1501_v48  ;;  %v8536_v44 = vld [vmem:[#allocation76_spill] sm:$0xff]  ;;  %v8537_v15 = vld [vmem:[#allocation173_spill] sm:$0xff]  ;;  %v1623_v60 = vpop.permute.xlu0 %1622 }
 0x298   :  { %v2384_v28 = vmul.f32 %v6473_v21, %v2237_v46  ;;  %v1861_v2 = vadd.f32 %v1688_v3, %v8531_v32  ;;  %v2193_v41 = vmul.f32 2.0, %v2121_v18  ;;  %v1980_v40 = vmul.f32 0.11111111, %v1860_v17  ;;  %v8540_v17 = vld [vmem:[#allocation52_spill] sm:$0xff] }
 0x299   :  { %v2386_v11 = vmul.f32 %v6485_v50, %v2238_v62  ;;  %v2194_v33 = vmul.f32 2.0, %v2122_v27  ;;  %v2123_v47 = vsub.f32 %v1979_v53, %v8532_v38  ;;  %v1862_v30 = vadd.f32 %v1748_v24, %v8533_v55  ;;  %v8535_v50 = vld [vmem:[#allocation158_spill] sm:$0xff]  ;;  %v8538_v62 = vld [vmem:[#allocation164_spill] sm:$0xff]  ;;  %v8539_v27 = vld [vmem:[#allocation177_spill] sm:$0xff]  ;;  %v1507_v24 = vpop.permute.xlu1 %1506 }
 0x29a   :  { %v2429_v23 = vsub.f32 1.0, %v2384_v28  ;;  %v1981_v43 = vmul.f32 0.11111111, %v1861_v2  ;;  %v2217_v5 = vadd.f32 0.0009, %v2193_v41  ;;  %v2124_v35 = vsub.f32 %v1980_v40, %v8534_v13  ;;  %v8541_v2 = vld [vmem:[#allocation172_spill] sm:$0xff] }
 0x29b   :  { %v2430_v4 = vsub.f32 1.0, %v2386_v11  ;;  %v2218_v21 = vadd.f32 0.0009, %v2194_v33  ;;  %v7089_v19 = vpop.eup %2796  ;;  %v2195_v34 = vmul.f32 2.0, %v2123_v47  ;;  %v1982_v39 = vmul.f32 0.11111111, %v1862_v30 }
 0x29c   :  { %v2453_v48 = vmul.f32 0.5, %v2429_v23  ;;  %v2125_v25 = vsub.f32 %v1981_v43, %v8535_v50  ;;  %v2241_v26 = vmul.f32 %v2217_v5, %v8536_v44  ;;  %v2196_v46 = vmul.f32 2.0, %v2124_v35  ;;  %v8542_v47 = vld [vmem:[#allocation169_spill] sm:$0xff]  ;;  %v8546_v44 = vld [vmem:[#allocation64_spill] sm:$0xff] }
 0x29d   :  { %v2454_v57 = vmul.f32 0.5, %v2430_v4  ;;  %v2242_v0 = vmul.f32 %v2218_v21, %v8537_v15  ;;  %v7094_v31 = vpop.eup %2798  ;;  %v2219_v3 = vadd.f32 0.0009, %v2195_v34  ;;  %v2126_v51 = vsub.f32 %v1982_v39, %v8538_v62  ;;  %v8543_v30 = vld [vmem:[#allocation181_spill] sm:$0xff]  ;;  %v8545_v34 = vld [vmem:[#allocation184_spill] sm:$0xff] }
 0x29e   :  { %v2477_v37 = vmax.f32 %v2453_v48, 0.0  ;;  %v2197_v18 = vmul.f32 2.0, %v2125_v25  ;;  %v2392_v61 = vmul.f32 %v8539_v27, %v2241_v26  ;;  %v2220_v53 = vadd.f32 0.0009, %v2196_v46  ;;  %v8544_v5 = vld [vmem:[#allocation65_spill] sm:$0xff]  ;;  %v1511_v25 = vpop.permute.xlu0 %1510  ;;  %v8547_v15 = vld [vmem:[#allocation40_spill] sm:$0xff]  ;;  %v1627_v27 = vpop.permute.xlu1 %1626 }
 0x29f   :  { %v2478_v10 = vmax.f32 %v2454_v57, 0.0  ;;  %v2394_v28 = vmul.f32 %v8540_v17, %v2242_v0  ;;  %v2243_v11 = vmul.f32 %v2219_v3, %v8541_v2  ;;  %v2198_v41 = vmul.f32 2.0, %v2126_v51  ;;  %v8548_v46 = vld [vmem:[#allocation149_spill] sm:$0xff]  ;;  %v8550_v17 = vld [vmem:[#allocation79_spill] sm:$0xff] }
 0x2a0   :  { %v2501_v32 = vmin.f32 %v2477_v37, 1.0  ;;  %v2221_v33 = vadd.f32 0.0009, %v2197_v18  ;;  %v2433_v23 = vsub.f32 1.0, %v2392_v61  ;;  %v2244_v55 = vmul.f32 %v2220_v53, %v8542_v47  ;;  %v8549_v18 = vld [vmem:[#allocation142_spill] sm:$0xff]  ;;  %v8551_v47 = vld [vmem:[#allocation167_spill] sm:$0xff] }
 0x2a1   :  { %v2502_v40 = vmin.f32 %v2478_v10, 1.0  ;;  %v2434_v38 = vsub.f32 1.0, %v2394_v28  ;;  %v2396_v43 = vmul.f32 %v8543_v30, %v2243_v11  ;;  %v2222_v4 = vadd.f32 0.0009, %v2198_v41 }
 0x2a2   :  { %v2245_v21 = vmul.f32 %v2221_v33, %v8544_v5  ;;  %v1689_v13 = vsel %vm1634_vm3, %v1503_v12, %v1623_v60  ;;  %v2457_v35 = vmul.f32 0.5, %v2433_v23  ;;  %v2398_v39 = vmul.f32 %v8545_v34, %v2244_v55  ;;  %v8552_v5 = vld [vmem:[#allocation63_spill] sm:$0xff] }
 0x2a3   :  { %v2458_v48 = vmul.f32 0.5, %v2434_v38  ;;  %v1749_v50 = vsel %vm1634_vm3, %v1623_v60, %v1503_v12  ;;  %v2435_v57 = vsub.f32 1.0, %v2396_v43  ;;  %v2246_v26 = vmul.f32 %v2222_v4, %v8546_v44 }
 0x2a4   :  { %v2400_v0 = vmul.f32 %v8547_v15, %v2245_v21  ;;  %v1863_v37 = vadd.f32 %v1689_v13, %v8548_v46  ;;  %v2481_v3 = vmax.f32 %v2457_v35, 0.0  ;;  %v2436_v51 = vsub.f32 1.0, %v2398_v39  ;;  %v1505_v13 = vpop.permute.xlu0 %1504  ;;  %v1631_v15 = vpop.permute.xlu1 %1630 }
 0x2a5   :  { %v2482_v62 = vmax.f32 %v2458_v48, 0.0  ;;  %v1864_v10 = vadd.f32 %v1749_v50, %v8549_v18  ;;  %v2459_v61 = vmul.f32 0.5, %v2435_v57  ;;  %v2402_v28 = vmul.f32 %v8550_v17, %v2246_v26  ;;  %v8554_v18 = vld [vmem:[#allocation53_spill] sm:$0xff] }
 0x2a6   :  { %v2437_v53 = vsub.f32 1.0, %v2400_v0  ;;  %v1983_v2 = vmul.f32 0.11111111, %v1863_v37  ;;  %v2505_v12 = vmin.f32 %v2481_v3, 1.0  ;;  %v2460_v11 = vmul.f32 0.5, %v2436_v51 }
 0x2a7   :  { %v2506_v60 = vmin.f32 %v2482_v62, 1.0  ;;  %v1984_v41 = vmul.f32 0.11111111, %v1864_v10  ;;  %v2483_v33 = vmax.f32 %v2459_v61, 0.0  ;;  %v2438_v23 = vsub.f32 1.0, %v2402_v28  ;;  %v8553_v62 = vld [vmem:[#allocation148_spill] sm:$0xff] }
 0x2a8   :  { %v2461_v38 = vmul.f32 0.5, %v2437_v53  ;;  %v2127_v55 = vsub.f32 %v1983_v2, %v8551_v47  ;;  %v2527_v30 = vadd.f32 %v2505_v12, %v2501_v32  ;;  %v2484_v4 = vmax.f32 %v2460_v11, 0.0  ;;  %v8560_v47 = vld [vmem:[#allocation62_spill] sm:$0xff] }
 0x2a9   :  { %v2529_v43 = vadd.f32 %v2506_v60, %v2502_v40  ;;  %v2128_v21 = vsub.f32 %v1984_v41, %v8552_v5  ;;  %v2507_v35 = vmin.f32 %v2483_v33, 1.0  ;;  %v2462_v48 = vmul.f32 0.5, %v2438_v23  ;;  %v8557_v60 = vld [vmem:[#allocation134_spill] sm:$0xff]  ;;  %v8558_v41 = vld [vmem:[#allocation131_spill] sm:$0xff]  ;;  %v8561_v5 = vld [vmem:[#allocation156_spill] sm:$0xff] }
 0x2aa   :  { %v2485_v34 = vmax.f32 %v2461_v38, 0.0  ;;  %v2199_v39 = vmul.f32 2.0, %v2127_v55  ;;  %v2508_v50 = vmin.f32 %v2484_v4, 1.0  ;;  %v1691_v44 = vsel %vm1634_vm3, %v1507_v24, %v1627_v27  ;;  %v8559_v23 = vld [vmem:[#allocation170_spill] sm:$0xff] }
 0x2ab   :  { %v2200_v57 = vmul.f32 2.0, %v2128_v21  ;;  %v1751_v26 = vsel %vm1634_vm3, %v1627_v27, %v1507_v24  ;;  %v7120_v32 = vadd.f32 %v7056_v52, %v2507_v35  ;;  %v2486_v40 = vmax.f32 %v2462_v48, 0.0  ;;  %v8555_v24 = vld [vmem:[#allocation175_spill] sm:$0xff]  ;;  %v8556_v52 = vld [vmem:[#allocation180_spill] sm:$0xff] }
 0x2ac   :  { %v2509_v0 = vmin.f32 %v2485_v34, 1.0  ;;  %v2223_v46 = vadd.f32 0.0009, %v2199_v39  ;;  %v7123_v37 = vadd.f32 %v7064_v59, %v2508_v50  ;;  %v1867_v51 = vadd.f32 %v1691_v44, %v8553_v62  ;;  %v1625_v59 = vpop.permute.xlu0 %1624 }
 0x2ad   :  { %v2224_v3 = vadd.f32 0.0009, %v2200_v57  ;;  %v1868_v10 = vadd.f32 %v1751_v26, %v8554_v18  ;;  %2800 = vrcp.f32 %v6999_v16  ;;  %v2510_v61 = vmin.f32 %v2486_v40, 1.0  ;;  %v8563_v40 = vld [vmem:[#allocation103_spill] sm:$0xff]  ;;  %v8565_v18 = vld [vmem:[#allocation174_spill] sm:$0xff] }
 0x2ae   :  { %v7128_v17 = vadd.f32 %v2527_v30, %v2509_v0  ;;  %v2247_v27 = vmul.f32 %v2223_v46, %v8555_v24  ;;  %2802 = vrcp.f32 %v7002_v58  ;;  %v1987_v53 = vmul.f32 0.11111111, %v1867_v51  ;;  %v1509_v30 = vpop.permute.xlu1 %1508 }
 0x2af   :  { %v2248_v28 = vmul.f32 %v2224_v3, %v8556_v52  ;;  %v1988_v2 = vmul.f32 0.11111111, %v1868_v10  ;;  %2804 = vrcp.f32 %v7069_v22  ;;  %v7134_v12 = vadd.f32 %v2529_v43, %v2510_v61  ;;  %v8562_v43 = vld [vmem:[#allocation171_spill] sm:$0xff]  ;;  %v8566_v61 = vld [vmem:[#allocation176_spill] sm:$0xff] }
 0x2b0   :  { %v2404_v11 = vmul.f32 %v8557_v60, %v2247_v27  ;;  %v1693_v16 = vsel %vm1634_vm3, %v1511_v25, %v1631_v15  ;;  %v2131_v38 = vsub.f32 %v1987_v53, %v8559_v23  ;;  %v1753_v55 = vsel %vm1634_vm3, %v1631_v15, %v1511_v25  ;;  %v8564_v3 = vld [vmem:[#allocation51_spill] sm:$0xff]  ;;  %v8569_v23 = vld [vmem:[#allocation94_spill] sm:$0xff] }
 0x2b1   :  { %v2406_v33 = vmul.f32 %v8558_v41, %v2248_v28  ;;  %v2132_v58 = vsub.f32 %v1988_v2, %v8560_v47  ;;  %v1871_v22 = vadd.f32 %v1693_v16, %v8561_v5  ;;  %v1872_v21 = vadd.f32 %v1753_v55, %v8562_v43  ;;  %v8567_v28 = vld [vmem:[#allocation69_spill] sm:$0xff] }
 0x2b2   :  { %v2439_v4 = vsub.f32 1.0, %v2404_v11  ;;  %v1690_v35 = vsel %vm1634_vm3, %v1505_v13, %v1625_v59  ;;  %v2203_v34 = vmul.f32 2.0, %v2131_v38  ;;  %v1750_v50 = vsel %vm1634_vm3, %v1625_v59, %v1505_v13  ;;  %v8568_v13 = vld [vmem:[#allocation185_spill] sm:$0xff]  ;;  %v1629_v60 = vpop.permute.xlu1 %1628 }
 0x2b3   :  { %v2440_v48 = vsub.f32 1.0, %v2406_v33  ;;  %v2204_v39 = vmul.f32 2.0, %v2132_v58  ;;  %v1991_v44 = vmul.f32 0.11111111, %v1871_v22  ;;  %v1992_v26 = vmul.f32 0.11111111, %v1872_v21 }
 0x2b4   :  { %v2463_v57 = vmul.f32 0.5, %v2439_v4  ;;  %v1865_v25 = vadd.f32 %v1690_v35, %v8563_v40  ;;  %v2227_v0 = vadd.f32 0.0009, %v2203_v34  ;;  %v1866_v62 = vadd.f32 %v1750_v50, %v8564_v3  ;;  %v8570_v5 = vld [vmem:[#allocation25_spill] sm:$0xff]  ;;  %v8572_v40 = vld [vmem:[#allocation42_spill] sm:$0xff] }
 0x2b5   :  { %v2464_v15 = vmul.f32 0.5, %v2440_v48  ;;  %v2228_v46 = vadd.f32 0.0009, %v2204_v39  ;;  %v2135_v10 = vsub.f32 %v1991_v44, %v8565_v18  ;;  %v2136_v24 = vsub.f32 %v1992_v26, %v8566_v61  ;;  %v8571_v26 = vld [vmem:[#allocation44_spill] sm:$0xff] }
 0x2b6   :  { %v2487_v51 = vmax.f32 %v2463_v57, 0.0  ;;  %v1985_v27 = vmul.f32 0.11111111, %v1865_v25  ;;  %v2251_v53 = vmul.f32 %v2227_v0, %v8567_v28  ;;  %v1986_v59 = vmul.f32 0.11111111, %v1866_v62 }
 0x2b7   :  { %v2488_v52 = vmax.f32 %v2464_v15, 0.0  ;;  %v2252_v2 = vmul.f32 %v2228_v46, %v8568_v13  ;;  %v7156_v11 = vpop.eup %2800  ;;  %v2207_v41 = vmul.f32 2.0, %v2135_v10  ;;  %v2208_v33 = vmul.f32 2.0, %v2136_v24  ;;  %v8573_v15 = vld [vmem:[#allocation50_spill] sm:$0xff]  ;;  %v8575_v24 = vld [vmem:[#allocation24_spill] sm:$0xff] }
 0x2b8   :  { %v2511_v16 = vmin.f32 %v2487_v51, 1.0  ;;  %v2129_v38 = vsub.f32 %v1985_v27, %v8569_v23  ;;  %v7159_v47 = vpop.eup %2802  ;;  %v2412_v55 = vmul.f32 %v6851_v54, %v2251_v53  ;;  %v2130_v22 = vsub.f32 %v1986_v59, %v8570_v5  ;;  %v8574_v51 = vld [vmem:[#allocation147_spill] sm:$0xff]  ;;  %v8577_v59 = vld [vmem:[#allocation38_spill] sm:$0xff]  ;;  %v8579_v23 = vld [vmem:[#allocation29_spill] sm:$0xff] }
 0x2b9   :  { %v2512_v58 = vmin.f32 %v2488_v52, 1.0  ;;  %v2414_v4 = vmul.f32 %v6883_v8, %v2252_v2  ;;  %v7164_v43 = vpop.eup %2804  ;;  %v2231_v21 = vadd.f32 0.0009, %v2207_v41  ;;  %v2232_v35 = vadd.f32 0.0009, %v2208_v33  ;;  %v8578_v33 = vld [vmem:[#allocation118_spill] sm:$0xff] }
 0x2ba   :  { %v2201_v48 = vmul.f32 2.0, %v2129_v38  ;;  %v1692_v34 = vsel %vm1634_vm3, %v1509_v30, %v1629_v60  ;;  %v2443_v39 = vsub.f32 1.0, %v2412_v55  ;;  %v2202_v57 = vmul.f32 2.0, %v2130_v22  ;;  %v8580_v5 = vld [vmem:[#allocation27_spill] sm:$0xff] }
 0x2bb   :  { %v2444_v50 = vsub.f32 1.0, %v2414_v4  ;;  %v1752_v44 = vsel %vm1634_vm3, %v1629_v60, %v1509_v30  ;;  %v2255_v54 = vmul.f32 %v2231_v21, %v8571_v26  ;;  %v2256_v8 = vmul.f32 %v2232_v35, %v8572_v40  ;;  %v8576_v30 = vld [vmem:[#allocation15_spill] sm:$0xff] }
 0x2bc   :  { %v2225_v25 = vadd.f32 0.0009, %v2201_v48  ;;  %v1869_v0 = vadd.f32 %v1692_v34, %v8573_v15  ;;  %v2467_v46 = vmul.f32 0.5, %v2443_v39  ;;  %v2226_v62 = vadd.f32 0.0009, %v2202_v57  ;;  %v1513_v34 = vpop.permute.xlu0 %1512  ;;  %v1633_v39 = vpop.permute.xlu1 %1632 }
 0x2bd   :  { %v2468_v3 = vmul.f32 0.5, %v2444_v50  ;;  %v1870_v18 = vadd.f32 %v1752_v44, %v8574_v51  ;;  %v2420_v10 = vmul.f32 %v6981_v42, %v2255_v54  ;;  %v2422_v61 = vmul.f32 %v6985_v63, %v2256_v8  ;;  %v8581_v51 = vld [vmem:[#allocation151_spill] sm:$0xff] }
 0x2be   :  { %v2249_v27 = vmul.f32 %v2225_v25, %v8575_v24  ;;  %v1989_v52 = vmul.f32 0.11111111, %v1869_v0  ;;  %vm2550_vm4 = vcmp.ge.s32.totalorder %v8576_v30, 1  ;;  %v2491_v28 = vmax.f32 %v2467_v46, 0.0  ;;  %v2859_v30 = vld [vmem:[#allocation7 + $0x18] sm:$0xff] }
 0x2bf   :  { %v2492_v53 = vmax.f32 %v2468_v3, 0.0  ;;  %v2250_v13 = vmul.f32 %v2226_v62, %v6770_v1  ;;  %v1990_v2 = vmul.f32 0.11111111, %v1870_v18  ;;  %vm2563_vm6 = vcmp.le.s32.totalorder %v8577_v59, 254  ;;  %vm7204_vm8 = vmand %vm2550_vm4, %vm2556_vm5 }
 0x2c0   :  { %v2447_v60 = vsub.f32 1.0, %v2420_v10  ;;  %v2448_v41 = vsub.f32 1.0, %v2422_v61  ;;  %v2408_v42 = vmul.f32 %v7089_v19, %v2249_v27  ;;  %v2133_v63 = vsub.f32 %v1989_v52, %v8578_v33  ;;  %v8582_v10 = vld [vmem:[#allocation191_spill] sm:$0xff]  ;;  %vm7218_vm9 = vmand %vm2550_vm4, %vm2563_vm6 }
 0x2c1   :  { %vm2553_vm7 = vcmp.le.s32.totalorder %v8579_v23, 14  ;;  %v2515_v38 = vmin.f32 %v2491_v28, 1.0  ;;  %v2516_v55 = vmin.f32 %v2492_v53, 1.0  ;;  %v2410_v4 = vmul.f32 %v7094_v31, %v2250_v13 }
 0x2c2   :  { %v2134_v22 = vsub.f32 %v1990_v2, %v8580_v5  ;;  %v2471_v21 = vmul.f32 0.5, %v2447_v60  ;;  %v2472_v35 = vmul.f32 0.5, %v2448_v41  ;;  %v2441_v1 = vsub.f32 1.0, %v2408_v42  ;;  %v8587_v60 = vld [vmem:[#allocation95_spill] sm:$0xff]  ;;  %vm7232_vm10 = vmand %vm2553_vm7, %vm2556_vm5 }
 0x2c3   :  { %v2205_v48 = vmul.f32 2.0, %v2133_v63  ;;  %v2531_v50 = vadd.f32 %v2515_v38, %v2511_v16  ;;  %v2533_v57 = vadd.f32 %v2516_v55, %v2512_v58  ;;  %v2442_v44 = vsub.f32 1.0, %v2410_v4  ;;  %vm7308_vm11 = vmand %vm2553_vm7, %vm2563_vm6 }
 0x2c4   :  { %v2206_v19 = vmul.f32 2.0, %v2134_v22  ;;  %v2495_v26 = vmax.f32 %v2471_v21, 0.0  ;;  %v2496_v54 = vmax.f32 %v2472_v35, 0.0  ;;  %v2465_v40 = vmul.f32 0.5, %v2441_v1 }
 0x2c5   :  { %v2229_v8 = vadd.f32 0.0009, %v2205_v48  ;;  %v2466_v25 = vmul.f32 0.5, %v2442_v44  ;;  %v1694_v31 = vsel %vm1634_vm3, %v1513_v34, %v1633_v39  ;;  %v1754_v0 = vsel %vm1634_vm3, %v1633_v39, %v1513_v34  ;;  %v8590_v44 = vld [vmem:[#allocation72_spill] sm:$0xff] }
 0x2c6   :  { %v2230_v15 = vadd.f32 0.0009, %v2206_v19  ;;  %2806 = vrcp.f32 %v7059_v45  ;;  %v2519_v46 = vmin.f32 %v2495_v26, 1.0  ;;  %v2520_v3 = vmin.f32 %v2496_v54, 1.0  ;;  %v8593_v54 = vld [vmem:[#allocation129_spill] sm:$0xff] }
 0x2c7   :  { %v2253_v16 = vmul.f32 %v2229_v8, %v6781_v29  ;;  %v2489_v58 = vmax.f32 %v2465_v40, 0.0  ;;  %v1873_v18 = vadd.f32 %v1694_v31, %v8581_v51  ;;  %v1874_v61 = vadd.f32 %v1754_v0, %v8582_v10  ;;  %v8594_v40 = vld [vmem:[#allocation75_spill] sm:$0xff]  ;;  %v8600_v51 = vld [vmem:[#allocation89_spill] sm:$0xff] }
 0x2c8   :  { %v2254_v62 = vmul.f32 %v2230_v15, %v6783_v49  ;;  %v2532_v24 = vadd.f32 %v2531_v50, %v2519_v46  ;;  %v2534_v27 = vadd.f32 %v2533_v57, %v2520_v3  ;;  %v2490_v52 = vmax.f32 %v2466_v25, 0.0  ;;  %v8596_v15 = vld [vmem:[#allocation97_spill] sm:$0xff]  ;;  %v8597_v46 = vld [vmem:[#allocation187_spill] sm:$0xff] }
 0x2c9   :  { %v2416_v28 = vmul.f32 %v7156_v11, %v2253_v16  ;;  %v7197_v53 = vmul.f32 0.33333334, %v7120_v32  ;;  %v1993_v13 = vmul.f32 0.11111111, %v1873_v18  ;;  %v1994_v2 = vmul.f32 0.11111111, %v1874_v61 }
 0x2ca   :  { %v2418_v45 = vmul.f32 %v7159_v47, %v2254_v62  ;;  %v7209_v49 = vmul.f32 0.33333334, %v7123_v37  ;;  %v7212_v11 = vmul.f32 0.33333334, %v7128_v17  ;;  %v2634_v41 = vadd.f32 %v6928_v36, %v8587_v60  ;;  %v8598_v16 = vld [vmem:[#allocation86_spill] sm:$0xff]  ;;  %v8599_v62 = vld [vmem:[#allocation43_spill] sm:$0xff] }
 0x2cb   :  { %v2445_v32 = vsub.f32 1.0, %v2416_v28  ;;  %v7224_v42 = vmul.f32 0.33333334, %v2532_v24  ;;  %v2137_v37 = vsub.f32 %v1993_v13, %v6909_v7  ;;  %v2138_v17 = vsub.f32 %v1994_v2, %v6911_v56  ;;  %v8602_v24 = vld [vmem:[#allocation115_spill] sm:$0xff]  ;;  %v8606_v13 = vld [vmem:[#allocation61_spill] sm:$0xff]  ;;  %v8608_v60 = vld [vmem:[#allocation78_spill] sm:$0xff] }
 0x2cc   :  { %v2446_v33 = vsub.f32 1.0, %v2418_v45  ;;  %v7236_v63 = vmul.f32 0.33333334, %v2534_v27  ;;  %v2513_v38 = vmin.f32 %v2489_v58, 1.0  ;;  %v2514_v55 = vmin.f32 %v2490_v52, 1.0  ;;  %v8603_v27 = vld [vmem:[#allocation33_spill] sm:$0xff] }
 0x2cd   :  { %v2469_v36 = vmul.f32 0.5, %v2445_v32  ;;  %v2209_v5 = vmul.f32 2.0, %v2137_v37  ;;  %v2210_v22 = vmul.f32 2.0, %v2138_v17  ;;  %v2576_v56 = vsel %vm7204_vm8, %v7197_v53, 0.0  ;;  %v8605_v45 = vld [vmem:[#allocation92_spill] sm:$0xff] }
 0x2ce   :  { %v2470_v4 = vmul.f32 0.5, %v2446_v33  ;;  %v7242_v20 = vmul.f32 0.33333334, %v7134_v12  ;;  %v2577_v21 = vsel %vm7218_vm9, %v7209_v49, 0.0  ;;  %v2578_v35 = vsel %vm7232_vm10, %v7212_v11, 0.0  ;;  %v8591_v12 = vld [vmem:[#allocation73_spill] sm:$0xff] }
 0x2cf   :  { %v2493_v7 = vmax.f32 %v2469_v36, 0.0  ;;  %v2233_v48 = vadd.f32 0.0009, %v2209_v5  ;;  %v2234_v34 = vadd.f32 0.0009, %v2210_v22  ;;  %v2580_v39 = vsel %vm7204_vm8, %v7224_v42, 0.0 }
 0x2d0   :  { %v2494_v1 = vmax.f32 %v2470_v4, 0.0  ;;  %v2807_v50 = vpop.eup %2806  ;;  %v8592_v19 = vsub.f32 %v8590_v44, %v8591_v12  ;;  %v8595_v8 = vsub.f32 %v8593_v54, %v8594_v40  ;;  %v2636_v31 = vadd.f32 %v7018_v6, %v8596_v15  ;;  %v8609_v6 = vld [vmem:[#allocation127_spill] sm:$0xff]  ;;  %v8611_v5 = vld [vmem:[#allocation98_spill] sm:$0xff]  ;;  %v8617_v44 = vld [vmem:[#allocation96_spill] sm:$0xff] }
 0x2d1   :  { %v2517_v57 = vmin.f32 %v2493_v7, 1.0  ;;  %v2257_v3 = vmul.f32 %v2233_v48, %v8597_v46  ;;  %v2258_v58 = vmul.f32 %v2234_v34, %v8598_v16  ;;  %v8601_v18 = vsub.f32 %v8599_v62, %v8600_v51  ;;  %v8612_v22 = vld [vmem:[#allocation82_spill] sm:$0xff]  ;;  %v8615_v48 = vld [vmem:[#allocation47_spill] sm:$0xff] }
 0x2d2   :  { %v2615_v26 = vand.u32 2147483647, %v8592_v19  ;;  %v2616_v25 = vand.u32 2147483647, %v8595_v8  ;;  %v2518_v0 = vmin.f32 %v2494_v1, 1.0  ;;  %v8604_v52 = vsub.f32 %v8602_v24, %v8603_v27  ;;  %v8614_v1 = vld [vmem:[#allocation32_spill] sm:$0xff] }
 0x2d3   :  { %v2617_v10 = vand.u32 2147483647, %v8601_v18  ;;  %v2535_v61 = vadd.f32 %v2517_v57, %v2513_v38  ;;  %v8607_v2 = vsub.f32 %v8605_v45, %v8606_v13  ;;  %v8610_v33 = vsub.f32 %v8608_v60, %v8609_v6  ;;  %v8618_v12 = vld [vmem:[#allocation110_spill] sm:$0xff]  ;;  %v8621_v8 = vld [vmem:[#allocation161_spill] sm:$0xff]  ;;  %v8626_v62 = vld [vmem:[#allocation123_spill] sm:$0xff] }
 0x2d4   :  { %v2618_v28 = vand.u32 2147483647, %v8604_v52  ;;  %v2537_v17 = vadd.f32 %v2518_v0, %v2514_v55  ;;  %v2424_v36 = vmul.f32 %v7164_v43, %v2257_v3  ;;  %v2426_v4 = vmul.f32 %v2807_v50, %v2258_v58  ;;  %v8620_v40 = vld [vmem:[#allocation138_spill] sm:$0xff]  ;;  %v8623_v0 = vld [vmem:[#allocation93_spill] sm:$0xff]  ;;  %v8627_v51 = vld [vmem:[#allocation39_spill] sm:$0xff] }
 0x2d5   :  { %v2620_v32 = vand.u32 2147483647, %v8607_v2  ;;  %v2621_v37 = vand.u32 2147483647, %v8610_v33  ;;  %v8613_v7 = vsub.f32 %v8611_v5, %v8612_v22  ;;  %v8616_v34 = vsub.f32 %v8614_v1, %v8615_v48  ;;  %v8624_v3 = vld [vmem:[#allocation34_spill] sm:$0xff]  ;;  %v8629_v27 = vld [vmem:[#allocation59_spill] sm:$0xff] }
 0x2d6   :  { %v8619_v19 = vsub.f32 %v8617_v44, %v8618_v12  ;;  %v8622_v15 = vsub.f32 %v8620_v40, %v8621_v8  ;;  %v2633_v55 = vadd.f32 %v7025_v9, %v2616_v25  ;;  %v2449_v43 = vsub.f32 1.0, %v2424_v36  ;;  %v8630_v52 = vld [vmem:[#allocation99_spill] sm:$0xff]  ;;  %v8632_v2 = vld [vmem:[#allocation16_spill] sm:$0xff]  ;;  %v8633_v60 = vld [vmem:[#allocation117_spill] sm:$0xff] }
 0x2d7   :  { %v2622_v38 = vand.u32 2147483647, %v8613_v7  ;;  %v2624_v57 = vand.u32 2147483647, %v8616_v34  ;;  %v2450_v50 = vsub.f32 1.0, %v2426_v4  ;;  %v8625_v16 = vsub.f32 %v8623_v0, %v8624_v3  ;;  %v8635_v5 = vld [vmem:[#allocation121_spill] sm:$0xff] }
 0x2d8   :  { %v2625_v54 = vand.u32 2147483647, %v8619_v19  ;;  %v2626_v46 = vand.u32 2147483647, %v8622_v15  ;;  %v8628_v18 = vsub.f32 %v8626_v62, %v8627_v51  ;;  %v8631_v45 = vsub.f32 %v8629_v27, %v8630_v52  ;;  %v8636_v9 = vld [vmem:[#allocation60_spill] sm:$0xff]  ;;  %v8640_v48 = vld [vmem:[#allocation133_spill] sm:$0xff] }
 0x2d9   :  { %v2619_v58 = vand.u32 2147483647, %v8625_v16  ;;  %v8634_v6 = vsub.f32 %v8632_v2, %v8633_v60  ;;  %v8637_v25 = vsub.f32 %v8635_v5, %v8636_v9  ;;  %v2635_v4 = vadd.f32 %v2634_v41, %v2617_v10  ;;  %v8641_v12 = vld [vmem:[#allocation130_spill] sm:$0xff]  ;;  %v8642_v19 = vld [vmem:[#allocation41_spill] sm:$0xff]  ;;  %v2857_v9 = vld [vmem:[#allocation7 + $0x8] sm:$0xff] }
 0x2da   :  { %v2628_v24 = vand.u32 2147483647, %v8628_v18  ;;  %v2623_v13 = vand.u32 2147483647, %v8631_v45  ;;  %v2473_v22 = vmul.f32 0.5, %v2449_v43  ;;  %v2474_v7 = vmul.f32 0.5, %v2450_v50 }
 0x2db   :  { %v2627_v33 = vand.u32 2147483647, %v8634_v6  ;;  %v2629_v36 = vand.u32 2147483647, %v8637_v25  ;;  %v2638_v34 = vadd.f32 %v2615_v26, %v8640_v48  ;;  %v2640_v44 = vadd.f32 %v2624_v57, %v2620_v32  ;;  %v8644_v32 = vld [vmem:[#allocation77_spill] sm:$0xff]  ;;  %v2856_v11 = vld [vmem:[#allocation7] sm:$0xff] }
 0x2dc   :  { %v8643_v40 = vsub.f32 %v8641_v12, %v8642_v19  ;;  %v2637_v15 = vadd.f32 %v2636_v31, %v2618_v28  ;;  %v2642_v0 = vadd.f32 %v2625_v54, %v2621_v37  ;;  %v2644_v41 = vadd.f32 %v2626_v46, %v2622_v38  ;;  %v8645_v57 = vld [vmem:[#allocation165_spill] sm:$0xff]  ;;  %v2861_v1 = vld [vmem:[#allocation7 + $0x28] sm:$0xff] }
 0x2dd   :  { %v2497_v10 = vmax.f32 %v2473_v22, 0.0  ;;  %v2498_v43 = vmax.f32 %v2474_v7, 0.0  ;;  %v2639_v50 = vadd.f32 %v2638_v34, %v2619_v58  ;;  %v2641_v59 = vadd.f32 %v2640_v44, %v2628_v24  ;;  %v2860_v44 = vld [vmem:[#allocation7 + $0x20] sm:$0xff] }
 0x2de   :  { %v2630_v8 = vand.u32 2147483647, %v8643_v40  ;;  %v2579_v23 = vsel %vm7308_vm11, %v7242_v20, 0.0  ;;  %v2581_v26 = vsel %vm7218_vm9, %v7236_v63, 0.0  ;;  %v8646_v3 = vsub.f32 %v8644_v32, %v8645_v57 }
 0x2df   :  { %v2646_v62 = vadd.f32 %v2627_v33, %v2623_v13  ;;  %v2521_v31 = vmin.f32 %v2497_v10, 1.0  ;;  %v2522_v28 = vmin.f32 %v2498_v43, 1.0  ;;  %v2643_v37 = vadd.f32 %v2642_v0, %v2629_v36  ;;  %v2862_v0 = vld [vmem:[#allocation7 + $0x30] sm:$0xff] }
 0x2e0   :  { %v2631_v16 = vand.u32 2147483647, %v8646_v3  ;;  %v2648_v38 = vmul.f32 0.15, %v2633_v55  ;;  %v2645_v54 = vadd.f32 %v2644_v41, %v2630_v8  ;;  %v2649_v46 = vmul.f32 0.15, %v2635_v4 }
 0x2e1   :  { %v2650_v58 = vmul.f32 0.15, %v2637_v15  ;;  %v2651_v51 = vmul.f32 0.15, %v2639_v50  ;;  %v2536_v18 = vadd.f32 %v2535_v61, %v2521_v31  ;;  %v2538_v24 = vadd.f32 %v2537_v17, %v2522_v28 }
 0x2e2   :  { %v2652_v20 = vmul.f32 0.15, %v2641_v59  ;;  %v2656_v63 = vmul.f32 0.85, %v2576_v56  ;;  %v2647_v27 = vadd.f32 %v2646_v62, %v2631_v16  ;;  %v2657_v52 = vmul.f32 0.85, %v2577_v21 }
 0x2e3   :  { %v2658_v55 = vmul.f32 0.85, %v2578_v35  ;;  %v2659_v45 = vmul.f32 0.85, %v2579_v23  ;;  %v2546_v61 = vmul.f32 0.33333334, %v2536_v18 }
 0x2e4   :  { %v2547_v17 = vmul.f32 0.33333334, %v2538_v24  ;;  %v2660_v53 = vmul.f32 0.85, %v2580_v39  ;;  %v2664_v56 = vadd.f32 %v2656_v63, %v2648_v38  ;;  %v2653_v13 = vmul.f32 0.15, %v2643_v37 }
 0x2e5   :  { %v2654_v2 = vmul.f32 0.15, %v2645_v54  ;;  %v2665_v47 = vadd.f32 %v2657_v52, %v2649_v46  ;;  %v2666_v60 = vadd.f32 %v2658_v55, %v2650_v58  ;;  %v2582_v49 = vsel %vm7232_vm10, %v2546_v61, 0.0  ;;  %v2858_v39 = vld [vmem:[#allocation7 + $0x10] sm:$0xff] }
 0x2e6   :  { %v2661_v21 = vmul.f32 0.85, %v2581_v26  ;;  %v2667_v6 = vadd.f32 %v2659_v45, %v2651_v51  ;;  %v2672_v35 = vmul.f32 %v2856_v11, %v2664_v56  ;;  %v2583_v33 = vsel %vm7308_vm11, %v2547_v17, 0.0 }
 0x2e7   :  { %v2662_v5 = vmul.f32 0.85, %v2582_v49  ;;  %v2668_v29 = vadd.f32 %v2660_v53, %v2652_v20  ;;  %v2673_v42 = vmul.f32 %v2857_v9, %v2665_v47  ;;  %v2674_v25 = vmul.f32 %v2858_v39, %v2666_v60 }
 0x2e8   :  { %v2655_v4 = vmul.f32 0.15, %v2647_v27  ;;  %v2663_v22 = vmul.f32 0.85, %v2583_v33  ;;  %v2669_v7 = vadd.f32 %v2661_v21, %v2653_v13  ;;  %v2675_v34 = vmul.f32 %v2859_v30, %v2667_v6 }
 0x2e9   :  { %v2680_v36 = vadd.f32 %v2673_v42, %v2672_v35  ;;  %v2670_v48 = vadd.f32 %v2662_v5, %v2654_v2  ;;  %v2676_v12 = vmul.f32 %v2860_v44, %v2668_v29 }
 0x2ea   :  { %v2671_v8 = vadd.f32 %v2663_v22, %v2655_v4  ;;  %v2677_v15 = vmul.f32 %v2861_v1, %v2669_v7 }
 0x2eb   :  { %v2681_v19 = vadd.f32 %v2680_v36, %v2674_v25  ;;  %v2678_v41 = vmul.f32 %v2862_v0, %v2670_v48 }
 0x2ec   :  { %v2679_v50 = vmul.f32 %v2671_v8, %v6938_v14 }
 0x2ed   :  { %v2682_v40 = vadd.f32 %v2681_v19, %v2675_v34 }
 0x2ef   :  { %v2683_v10 = vadd.f32 %v2682_v40, %v2676_v12 }
 0x2f1   :  { %v2684_v43 = vadd.f32 %v2683_v10, %v2677_v15 }
 0x2f3   :  { %v2685_v59 = vadd.f32 %v2684_v43, %v2678_v41 }
 0x2f5   :  { %v2686_v23 = vadd.f32 %v2685_v59, %v2679_v50 }
 0x2f7   :  { %2687 = vadd.xlane.f32.xlu0 %v2686_v23 }
 0x305   :  { %v2707_v26 = vpop.xlane.xlu1 %2706 }
 0x306   :  { %v2708_v32 = vrot.slane %v2707_v26, 4 }
 0x308   :  { %v2709_v57 = vadd.f32 %v2708_v32, %v2707_v26 }
 0x30a   :  { %v2710_v3 = vrot.slane %v2709_v57, 2 }
 0x30c   :  { %v2711_v28 = vadd.f32 %v2710_v3, %v2709_v57 }
 0x30e   :  { %v2712_v54 = vrot.slane %v2711_v28, 1 }
 0x310   :  { %v2713_v51 = vadd.f32 %v2712_v54, %v2711_v28 }
 0x384   :  { %v2688_v16 = vpop.xlane.xlu0 %2687 }
 0x385   :  { %v2689_v62 = vrot.slane %v2688_v16, 4 }
 0x387   :  { %v2690_v31 = vadd.f32 %v2689_v62, %v2688_v16 }
 0x389   :  { %v2691_v37 = vrot.slane %v2690_v31, 2 }
 0x38b   :  { %v2692_v38 = vadd.f32 %v2691_v37, %v2690_v31 }
 0x38d   :  { %v2693_v46 = vrot.slane %v2692_v38, 1 }
 0x38f   :  { %v2694_v58 = vadd.f32 %v2693_v46, %v2692_v38 }
 0x391   :  { %2747 = vpush %v2694_v58 }
 0x392   :  { %2749 = vpush %v2713_v51 }
 0x3c2   :  { %s2748_s30 = spop %2747 }
 0x3c3   :  { %v2696_v14 = vstv %s2748_s30  ;;  %s2750_s5 = spop %2749 }
 0x3c4   :  { %v2715_v18 = vstv %s2750_s5  ;;  %2698 = vst.msk [vmem:[#allocation8] sm:$0x1] %vm2697_vm12, %v2696_v14 }
 0x3c5   :  { %2940 = shalt.err (!%p2937_p0)
}
 0x3c6   :  { %s2941_s10 = scalar_lea.hbm %s7383_s3, 16 }
 0x3c7   :  { %p2942_p1 = scmp.ne.s32.totalorder %s7383_s3, %s2941_s10  ;;  %p2945_p2 = scmp.lt.u32.totalorder %s2941_s10, %s7383_s3 }
 0x3c9   :  { %p2947_p3 = pnand %p2945_p2, %p2942_p1 }
 0x3cb   :  { %2950 = shalt.err (!%p2947_p3)
}
 0x3cc   :  { %2726 = dma.vmem_to_hbm [thread:$0]  %s2724_s27, 16, %s7383_s3, [#allocation4]   ;;  %2716 = vst.msk [vmem:[#allocation9] sm:$0x1] %vm2697_vm12, %v2715_v18 }
 0x3cd   :  { %s2951_s16 = scalar_lea.vmem %s7346_s29, 16  ;;  %s2955_s17 = scalar_lea.vmem %s7346_s29, 32 }
 0x3ce   :  { %p2952_p4 = scmp.ne.s32.totalorder %s7346_s29, %s2951_s16  ;;  %p2956_p5 = scmp.lt.s32.totalorder %s7346_s29, %s7346_s29 }
 0x3cf   :  { %p2957_p6 = scmp.lt.s32.totalorder %s2955_s17, %s2951_s16 }
 0x3d1   :  { %p2958_p7 = por %p2957_p6, %p2956_p5 }
 0x3d3   :  { %p2959_p8 = pnand %p2958_p7, %p2952_p4 }
 0x3d5   :  { %2962 = shalt.err (!%p2959_p8)
}
 0x3d6   :  { %s2963_s21 = scalar_lea.hbm %s7384_s4, 16 }
 0x3d7   :  { %p2964_p9 = scmp.ne.s32.totalorder %s7384_s4, %s2963_s21  ;;  %p2967_p10 = scmp.lt.u32.totalorder %s2963_s21, %s7384_s4 }
 0x3d9   :  { %p2969_p11 = pnand %p2967_p10, %p2964_p9 }
 0x3db   :  { %2972 = shalt.err (!%p2969_p11)
}
 0x3dc   :  { %2736 = dma.vmem_to_hbm [thread:$0]  %s7346_s29, 16, %s7384_s4, [#allocation10]  }
 0x3dd   :  { %2977 = dma.done.wait [#allocation4], 16  }
 0x3de   :  { %2978 = vsyncadd [#allocation4], 4294967280 }
 0x3df   :  { %2979 = dma.done.wait [#allocation10], 16  }
 0x3e0   :  { %2980 = vsyncadd [#allocation10], 4294967280 }
 0x3e1   :  { %2743 = vsyncpa [#allocation3], 1 }
 0x3e2   :  { %2744 = vsyncpa [#allocation6], 1 }
 0x3e3   :  { %2745 = vsyncpa [#allocation4], 1 }
 0x3e4   :  { %2746 = vsyncpa [#allocation10], 1 }

</bundles_post_ra>
